<compile_context>
chip_gen: v7x
topology: tpu7x:2x2x1
jax: 0.10.0
libtpu: 0.0.40
codegen_flags: <defaults>
</compile_context>

<pallas_src>
import functools
import math

import numpy as np

import jax
import jax.numpy as jnp
from jax import lax
from jax.experimental import pallas as pl
from jax.experimental.pallas import tpu as pltpu


def _round_up(x, m):
    return (x + m - 1) // m * m


# ----------------------------- fused Pallas kernel -------------------------- #

def _decoder_kernel(x_ref, wih0_ref, whh0_ref, b0_ref, wstk_ref, bstk_ref,
                    lw_ref, lb_ref, out_ref,
                    gx0_sc, act_sc, h_sc, c_sc, *, hidden):
    """Fused multi-layer LSTM (wavefront over layers) + vocab projection.

    x_ref   : (S*N, W)        time-major flattened input, row = t*N + n
    wih0_ref: (W, W)          layer-0 input weights (rows>=E, cols>=4H zero)
    whh0_ref: (W, W)          layer-0 recurrent weights (rows>=H zero)
    b0_ref  : (1, W)
    wstk_ref: (max(L-1,1), 2W, W)   stacked [Wih_l ; Whh_l] for layers >= 1
    bstk_ref: (max(L-1,1), 1, W)
    lw_ref  : (W, Vp)  lb_ref: (1, Vp)   out_ref: (S*N, Vp)

    Compact gate layout: gates [i|f|g|o] at `hidden`-lane offsets inside 128 lanes.
    h/c are valid in lanes [0, hidden); lanes [hidden, 128) carry bounded junk that
    is annihilated by the zero-padded weight rows downstream.
    """
    L, N, W = h_sc.shape
    S = x_ref.shape[0] // N
    Hh = hidden

    # Layer-0 input-to-hidden hoisted out of the recurrence: one big MXU call
    # straight from x_ref (no VMEM->VMEM staging copy), bias added once.
    gx0_sc[...] = (
        jnp.dot(x_ref[...], wih0_ref[...], preferred_element_type=jnp.float32)
        + b0_ref[...]
    )

    h_sc[...] = jnp.zeros_like(h_sc)
    c_sc[...] = jnp.zeros_like(c_sc)

    def lstm_cell(gates, c_prev):
        # Full-width sigmoid/tanh once, then align gate groups to lanes [0, Hh)
        # with XLU rolls (the rolls/VPU selects land in otherwise-idle slots).
        sig = jax.nn.sigmoid(gates)                     # i @0, f @Hh, o @3Hh valid
        th = jnp.tanh(gates)                            # g @2Hh valid
        f_al = pltpu.roll(sig, W - Hh, axis=1)          # f -> lanes [0, Hh)
        g_al = pltpu.roll(th, W - 2 * Hh, axis=1)       # g -> lanes [0, Hh)
        o_al = pltpu.roll(sig, W - 3 * Hh, axis=1)      # o -> lanes [0, Hh)
        c_new = f_al * c_prev + sig * g_al              # valid in lanes [0, Hh)
        h_new = o_al * jnp.tanh(c_new)
        return h_new, c_new

    # Wavefront schedule: in wave w, layer l runs step t = w - l, so the L serial
    # chains are independent inside a wave and overlap on the MXU/EUP/VPU.
    # TODO(synk): stage Whh / the stacked RHS in MXU weight registers across steps
    # (pltpu.matmul_push_rhs / matmul_acc_lhs / matmul_pop); kept on jnp.dot for
    # robustness.  TODO(synk): bf16 weights would halve weight traffic but breaks the
    # 2e-5 f32 check, so left in f32.
    for w in range(S + L - 1):
        for l in range(L):
            t = w - l
            if not (0 <= t < S):
                continue
            r0 = t * N
            if l == 0:
                gates = gx0_sc[r0:r0 + N, :] + jnp.dot(
                    h_sc[0], whh0_ref[...], preferred_element_type=jnp.float32)
            else:
                # Fold input-to-hidden + hidden-to-hidden into ONE matmul:
                # [h_{l-1,t} ; h_{l,t-1}] @ [Wih_l ; Whh_l] + b_l
                lhs = jnp.concatenate(
                    [act_sc[l - 1, r0:r0 + N, :], h_sc[l]], axis=1)
                gates = jnp.dot(lhs, wstk_ref[l - 1],
                                preferred_element_type=jnp.float32) + bstk_ref[l - 1]
            h_new, c_new = lstm_cell(gates, c_sc[l])
            h_sc[l, :, :] = h_new
            c_sc[l, :, :] = c_new
            act_sc[l, r0:r0 + N, :] = h_new

    # Vocab projection fused into the same kernel: one MXU call over all rows of the
    # last layer's outputs (padded / past-length rows are dropped by the wrapper gather).
    out_ref[...] = (
        jnp.dot(act_sc[L - 1], lw_ref[...], preferred_element_type=jnp.float32)
        + lb_ref[...]
    )


def decoder_pallas(x_flat, wih0, whh0, b0, wstk, bstk, lw, lb,
                   *, n_pad, num_layers, hidden):
    s_n, w = x_flat.shape
    v_pad = lw.shape[1]
    kernel = functools.partial(_decoder_kernel, hidden=hidden)
    return pl.pallas_call(
        kernel,
        out_shape=jax.ShapeDtypeStruct((s_n, v_pad), jnp.float32),
        in_specs=[pl.BlockSpec(memory_space=pltpu.MemorySpace.VMEM)] * 8,
        out_specs=pl.BlockSpec(memory_space=pltpu.MemorySpace.VMEM),
        scratch_shapes=[
            pltpu.VMEM((s_n, w), jnp.float32),                 # layer-0 input gates
            pltpu.VMEM((num_layers, s_n, w), jnp.float32),     # per-layer output sequences
            pltpu.VMEM((num_layers, n_pad, w), jnp.float32),   # h state per layer
            pltpu.VMEM((num_layers, n_pad, w), jnp.float32),   # c state per layer
        ],
    )(x_flat, wih0, whh0, b0, wstk, bstk, lw, lb)


# ------------------------------ params ------------------------------------- #

def init_params(key, embed_size, hidden_size, vocab_size, num_layers):
    keys = jax.random.split(key, 3 + 4 * num_layers)
    params = {}
    params["embed_w"] = jax.random.normal(
        keys[0], (vocab_size, embed_size), jnp.float32)   # nn.Embedding default N(0,1)
    k = 1.0 / math.sqrt(hidden_size)
    ki = 1
    lstm = []
    for l in range(num_layers):
        in_size = embed_size if l == 0 else hidden_size
        w_ih = jax.random.uniform(keys[ki], (4 * hidden_size, in_size), jnp.float32, -k, k); ki += 1
        w_hh = jax.random.uniform(keys[ki], (4 * hidden_size, hidden_size), jnp.float32, -k, k); ki += 1
        b_ih = jax.random.uniform(keys[ki], (4 * hidden_size,), jnp.float32, -k, k); ki += 1
        b_hh = jax.random.uniform(keys[ki], (4 * hidden_size,), jnp.float32, -k, k); ki += 1
        lstm.append({"w_ih": w_ih, "w_hh": w_hh, "b_ih": b_ih, "b_hh": b_hh})
    params["lstm"] = lstm
    params["lin_w"] = jax.random.uniform(keys[ki], (vocab_size, hidden_size), jnp.float32, -k, k)
    params["lin_b"] = jax.random.uniform(keys[ki + 1], (vocab_size,), jnp.float32, -k, k)
    return params


def pack_decoder_params(params, embed_size, hidden_size, vocab_size):
    """One-time: transpose, fold biases, zero-pad to a compact 128-lane layout.

    4H stays compact (== 128 for H=32); padding rows/cols are exact zeros so junk in
    h/c lanes [H, 128) never leaks into real outputs.
    """
    H = hidden_size
    W = 128
    # Compact single-vreg gate layout; larger sizes would need the tiled variant.
    assert 4 * H <= W and embed_size <= W
    V_pad = _round_up(vocab_size, 128)

    def pad2(a, rows, cols):
        return jnp.pad(a, ((0, rows - a.shape[0]), (0, cols - a.shape[1])))

    lstm = params["lstm"]
    wih0 = pad2(lstm[0]["w_ih"].T, W, W)          # (W, W): rows >= E, cols >= 4H are zero
    whh0 = pad2(lstm[0]["w_hh"].T, W, W)          # (W, W): rows >= H zero
    b0 = pad2((lstm[0]["b_ih"] + lstm[0]["b_hh"])[None, :], 1, W)

    wstk, bstk = [], []
    for layer in lstm[1:]:
        wih = pad2(layer["w_ih"].T, W, W)
        whh = pad2(layer["w_hh"].T, W, W)
        wstk.append(jnp.concatenate([wih, whh], axis=0))        # (2W, W)
        bstk.append(pad2((layer["b_ih"] + layer["b_hh"])[None, :], 1, W))
    if not wstk:   # num_layers == 1: dummy operand (never read by the kernel)
        wstk = [jnp.zeros((2 * W, W), jnp.float32)]
        bstk = [jnp.zeros((1, W), jnp.float32)]

    arrays = {
        "embed_w": params["embed_w"],
        "wih0": wih0, "whh0": whh0, "b0": b0,
        "wstk": jnp.stack(wstk), "bstk": jnp.stack(bstk),
        "lw": pad2(params["lin_w"].T, W, V_pad),    # (W, V_pad)
        "lb": pad2(params["lin_b"][None, :], 1, V_pad),
    }
    meta = dict(E=embed_size, H=H, V=vocab_size, L=len(lstm), W=W, V_pad=V_pad)
    return arrays, meta


# ------------------------------ forward ------------------------------------- #

def _packed_indices(lengths):
    """pack_padded_sequence(batch_first=True, enforce_sorted=False) ordering."""
    lengths_np = np.asarray(lengths)
    order = np.argsort(-lengths_np, kind="stable")   # descending by length, stable
    t_idx, n_idx = [], []
    for t in range(int(lengths_np.max())):
        for j in order:
            if lengths_np[j] > t:
                t_idx.append(t)
                n_idx.append(int(j))
    return np.array(t_idx, np.int64), np.array(n_idx, np.int64)


@functools.partial(jax.jit,
                   static_argnames=("hidden_size", "vocab_size", "num_layers", "n_pad"))
def _decoder_forward_jit(arrays, features, captions, flat_idx, *,
                         hidden_size, vocab_size, num_layers, n_pad):
    # Device-side glue lives under one jit so it dispatches as a single program and the
    # pad/transpose fuses into the kernel's input.
    emb = arrays["embed_w"][captions]                              # (N, T, E)
    feats = jnp.repeat(features, 5, axis=0)                        # (B*5, E)
    x = jnp.concatenate([feats[:, None, :], emb], axis=1)          # (N, S, E)
    N, S, E = x.shape
    W = arrays["wih0"].shape[0]

    x_tm = jnp.transpose(x, (1, 0, 2)).astype(jnp.float32)         # (S, N, E)
    x_tm = jnp.pad(x_tm, ((0, 0), (0, n_pad - N), (0, W - E)))     # (S, n_pad, W)
    x_flat = x_tm.reshape(S * n_pad, W)                            # row = t*n_pad + n

    # Hot path: one fused Pallas kernel (all LSTM layers + vocab projection).
    logits_all = decoder_pallas(
        x_flat, arrays["wih0"], arrays["whh0"], arrays["b0"],
        arrays["wstk"], arrays["bstk"], arrays["lw"], arrays["lb"],
        n_pad=n_pad, num_layers=num_layers, hidden=hidden_size)

    return logits_all[flat_idx][:, :vocab_size]                    # (P, V)


def decoder_forward(arrays, meta, features, captions, lengths):
    # TODO(synk): pack_padded_sequence index bookkeeping stays host-side (tiny,
    # data-dependent); the resulting gather runs inside the jit on the small logits.
    N = captions.shape[0]
    n_pad = _round_up(N, 8)
    t_idx, n_idx = _packed_indices(lengths)
    flat_idx = jnp.asarray(t_idx * n_pad + n_idx, dtype=jnp.int32)
    return _decoder_forward_jit(arrays, features, captions, flat_idx,
                                hidden_size=meta["H"], vocab_size=meta["V"],
                                num_layers=meta["L"], n_pad=n_pad)


def decoder_forward_ref(params, features, captions, lengths):
    """Pure-JAX reference (same math, unpadded) for correctness checking."""
    emb = params["embed_w"][captions]
    feats = jnp.repeat(features, 5, axis=0)
    x = jnp.concatenate([feats[:, None, :], emb], axis=1)
    N = x.shape[0]
    H = params["lstm"][0]["w_hh"].shape[1]
    h_seq = jnp.transpose(x, (1, 0, 2)).astype(jnp.float32)
    for layer in params["lstm"]:
        w_ih, w_hh = layer["w_ih"], layer["w_hh"]
        b = layer["b_ih"] + layer["b_hh"]

        def step(carry, x_t, w_ih=w_ih, w_hh=w_hh, b=b):
            h_prev, c_prev = carry
            gates = x_t @ w_ih.T + h_prev @ w_hh.T + b
            i, f, g, o = jnp.split(gates, 4, axis=-1)
            c = jax.nn.sigmoid(f) * c_prev + jax.nn.sigmoid(i) * jnp.tanh(g)
            hh = jax.nn.sigmoid(o) * jnp.tanh(c)
            return (hh, c), hh

        init = (jnp.zeros((N, H), jnp.float32), jnp.zeros((N, H), jnp.float32))
        _, h_seq = lax.scan(step, init, h_seq)
    t_idx, n_idx = _packed_indices(lengths)
    packed_h = h_seq[jnp.asarray(t_idx), jnp.asarray(n_idx), :]
    return packed_h @ params["lin_w"].T + params["lin_b"]


# ---------------------------------- main ------------------------------------ #

if __name__ == "__main__":
    embed_size = 32
    hidden_size = 32
    vocab_size = 40
    num_layers = 2
    B = 2                      # image features batch; torch code repeats each 5x
    N = B * 5                  # number of caption sequences
    T = 7                      # caption tokens; sequence length incl. feature = T+1 = 8

    key = jax.random.PRNGKey(0)
    k_param, k_feat, k_cap = jax.random.split(key, 3)
    params = init_params(k_param, embed_size, hidden_size, vocab_size, num_layers)
    arrays, meta = pack_decoder_params(params, embed_size, hidden_size, vocab_size)

    features = jax.random.normal(k_feat, (B, embed_size), jnp.float32)
    captions = jax.random.randint(k_cap, (N, T), 0, vocab_size, jnp.int32)
    lengths = [8, 7, 6, 5, 8, 4, 3, 6, 2, 5]        # each in [1, T+1]

    out = decoder_forward(arrays, meta, features, captions, lengths)
    out = jax.block_until_ready(out)

    ref = jax.block_until_ready(decoder_forward_ref(params, features, captions, lengths))
    assert out.shape == (int(np.sum(lengths)), vocab_size), out.shape
    np.testing.assert_allclose(np.asarray(out), np.asarray(ref), rtol=2e-5, atol=2e-5)

    print("KERNEL_OK")
</pallas_src>

<mosaic_0001>
module attributes {stable_mosaic.version = 11 : i64} {
  func.func @_decoder_kernel(%arg0: memref<128x128xf32, #tpu.memory_space<vmem>>, %arg1: memref<128x128xf32, #tpu.memory_space<vmem>>, %arg2: memref<128x128xf32, #tpu.memory_space<vmem>>, %arg3: memref<1x128xf32, #tpu.memory_space<vmem>>, %arg4: memref<1x256x128xf32, #tpu.memory_space<vmem>>, %arg5: memref<1x1x128xf32, #tpu.memory_space<vmem>>, %arg6: memref<128x128xf32, #tpu.memory_space<vmem>>, %arg7: memref<1x128xf32, #tpu.memory_space<vmem>>, %arg8: memref<128x128xf32, #tpu.memory_space<vmem>>, %arg9: memref<128x128xf32, #tpu.memory_space<vmem>>, %arg10: memref<2x128x128xf32, #tpu.memory_space<vmem>>, %arg11: memref<2x16x128xf32, #tpu.memory_space<vmem>>, %arg12: memref<2x16x128xf32, #tpu.memory_space<vmem>>) attributes {dimension_semantics = [], scalar_prefetch = 0 : i64, scratch_operands = 4 : i64, tpu.core_type = #tpu.core_type<tc>} {
    %c0 = arith.constant 0 : index
    %c0_0 = arith.constant 0 : index
    %0 = vector.load %arg0[%c0, %c0_0] : memref<128x128xf32, #tpu.memory_space<vmem>>, vector<128x128xf32>
    %c0_1 = arith.constant 0 : index
    %c0_2 = arith.constant 0 : index
    %1 = vector.load %arg1[%c0_1, %c0_2] : memref<128x128xf32, #tpu.memory_space<vmem>>, vector<128x128xf32>
    %cst = arith.constant dense<0.000000e+00> : vector<128x128xf32>
    %2 = tpu.matmul %0, %1, %cst {dimension_numbers = #tpu.dot_dimension_numbers<[1], [0], [0], [1], [0, 0, 1, 1], [], []>} : vector<128x128xf32>, vector<128x128xf32>, vector<128x128xf32> -> vector<128x128xf32>
    %c0_3 = arith.constant 0 : index
    %c0_4 = arith.constant 0 : index
    %3 = vector.load %arg3[%c0_3, %c0_4] : memref<1x128xf32, #tpu.memory_space<vmem>>, vector<1x128xf32>
    %4 = vector.broadcast %3 : vector<1x128xf32> to vector<128x128xf32>
    %5 = arith.addf %2, %4 : vector<128x128xf32>
    %c0_5 = arith.constant 0 : index
    %c0_6 = arith.constant 0 : index
    %6 = vector.load %arg9[%c0_5, %c0_6] : memref<128x128xf32, #tpu.memory_space<vmem>>, vector<128x128xf32>
    tpu.vector_store %arg9[%c0_5, %c0_6], %5 {strides = array<i32>} : memref<128x128xf32, #tpu.memory_space<vmem>>, vector<128x128xf32>,
    %cst_7 = arith.constant 0.000000e+00 : f32
    %7 = vector.broadcast %cst_7 : f32 to vector<2x16x128xf32>
    %c0_8 = arith.constant 0 : index
    %c0_9 = arith.constant 0 : index
    %c0_10 = arith.constant 0 : index
    %8 = vector.load %arg11[%c0_8, %c0_9, %c0_10] : memref<2x16x128xf32, #tpu.memory_space<vmem>>, vector<2x16x128xf32>
    tpu.vector_store %arg11[%c0_8, %c0_9, %c0_10], %7 {strides = array<i32>} : memref<2x16x128xf32, #tpu.memory_space<vmem>>, vector<2x16x128xf32>,
    %cst_11 = arith.constant 0.000000e+00 : f32
    %9 = vector.broadcast %cst_11 : f32 to vector<2x16x128xf32>
    %c0_12 = arith.constant 0 : index
    %c0_13 = arith.constant 0 : index
    %c0_14 = arith.constant 0 : index
    %10 = vector.load %arg12[%c0_12, %c0_13, %c0_14] : memref<2x16x128xf32, #tpu.memory_space<vmem>>, vector<2x16x128xf32>
    tpu.vector_store %arg12[%c0_12, %c0_13, %c0_14], %9 {strides = array<i32>} : memref<2x16x128xf32, #tpu.memory_space<vmem>>, vector<2x16x128xf32>,
    %c0_15 = arith.constant 0 : index
    %c0_16 = arith.constant 0 : index
    %11 = vector.load %arg9[%c0_15, %c0_16] : memref<128x128xf32, #tpu.memory_space<vmem>>, vector<16x128xf32>
    %c0_17 = arith.constant 0 : index
    %c0_18 = arith.constant 0 : index
    %c0_19 = arith.constant 0 : index
    %12 = vector.load %arg11[%c0_17, %c0_18, %c0_19] : memref<2x16x128xf32, #tpu.memory_space<vmem>>, vector<1x16x128xf32>
    %13 = vector.shape_cast %12 : vector<1x16x128xf32> to vector<16x128xf32>
    %c0_20 = arith.constant 0 : index
    %c0_21 = arith.constant 0 : index
    %14 = vector.load %arg2[%c0_20, %c0_21] : memref<128x128xf32, #tpu.memory_space<vmem>>, vector<128x128xf32>
    %cst_22 = arith.constant dense<0.000000e+00> : vector<16x128xf32>
    %15 = tpu.matmul %13, %14, %cst_22 {dimension_numbers = #tpu.dot_dimension_numbers<[1], [0], [0], [1], [0, 0, 1, 1], [], []>} : vector<16x128xf32>, vector<128x128xf32>, vector<16x128xf32> -> vector<16x128xf32>
    %16 = arith.addf %11, %15 : vector<16x128xf32>
    %c0_23 = arith.constant 0 : index
    %c0_24 = arith.constant 0 : index
    %c0_25 = arith.constant 0 : index
    %17 = vector.load %arg12[%c0_23, %c0_24, %c0_25] : memref<2x16x128xf32, #tpu.memory_space<vmem>>, vector<1x16x128xf32>
    %18 = vector.shape_cast %17 : vector<1x16x128xf32> to vector<16x128xf32>
    %19 = arith.negf %16 : vector<16x128xf32>
    %20 = math.exp %19 : vector<16x128xf32>
    %cst_26 = arith.constant 1.000000e+00 : f32
    %21 = vector.broadcast %cst_26 : f32 to vector<16x128xf32>
    %22 = arith.addf %21, %20 : vector<16x128xf32>
    %23 = arith.divf %21, %22 : vector<16x128xf32>
    %24 = math.tanh %16 : vector<16x128xf32>
    %c96_i32 = arith.constant 96 : i32
    %25 = tpu.dynamic_rotate %23 by %c96_i32 dim 1 : vector<16x128xf32>, i32 -> vector<16x128xf32>
    %c64_i32 = arith.constant 64 : i32
    %26 = tpu.dynamic_rotate %24 by %c64_i32 dim 1 : vector<16x128xf32>, i32 -> vector<16x128xf32>
    %c32_i32 = arith.constant 32 : i32
    %27 = tpu.dynamic_rotate %23 by %c32_i32 dim 1 : vector<16x128xf32>, i32 -> vector<16x128xf32>
    %28 = arith.mulf %25, %18 : vector<16x128xf32>
    %29 = arith.mulf %23, %26 : vector<16x128xf32>
    %30 = arith.addf %28, %29 : vector<16x128xf32>
    %31 = math.tanh %30 : vector<16x128xf32>
    %32 = arith.mulf %27, %31 : vector<16x128xf32>
    %c0_27 = arith.constant 0 : index
    %c0_28 = arith.constant 0 : index
    %c0_29 = arith.constant 0 : index
    %33 = vector.load %arg11[%c0_27, %c0_28, %c0_29] : memref<2x16x128xf32, #tpu.memory_space<vmem>>, vector<1x16x128xf32>
    %34 = vector.shape_cast %33 : vector<1x16x128xf32> to vector<16x128xf32>
    %35 = vector.shape_cast %32 : vector<16x128xf32> to vector<1x16x128xf32>
    tpu.vector_store %arg11[%c0_27, %c0_28, %c0_29], %35 {strides = array<i32>} : memref<2x16x128xf32, #tpu.memory_space<vmem>>, vector<1x16x128xf32>,
    %c0_30 = arith.constant 0 : index
    %c0_31 = arith.constant 0 : index
    %c0_32 = arith.constant 0 : index
    %36 = vector.load %arg12[%c0_30, %c0_31, %c0_32] : memref<2x16x128xf32, #tpu.memory_space<vmem>>, vector<1x16x128xf32>
    %37 = vector.shape_cast %36 : vector<1x16x128xf32> to vector<16x128xf32>
    %38 = vector.shape_cast %30 : vector<16x128xf32> to vector<1x16x128xf32>
    tpu.vector_store %arg12[%c0_30, %c0_31, %c0_32], %38 {strides = array<i32>} : memref<2x16x128xf32, #tpu.memory_space<vmem>>, vector<1x16x128xf32>,
    %c0_33 = arith.constant 0 : index
    %c0_34 = arith.constant 0 : index
    %c0_35 = arith.constant 0 : index
    %39 = vector.load %arg10[%c0_33, %c0_34, %c0_35] : memref<2x128x128xf32, #tpu.memory_space<vmem>>, vector<1x16x128xf32>
    %40 = vector.shape_cast %39 : vector<1x16x128xf32> to vector<16x128xf32>
    %41 = vector.shape_cast %32 : vector<16x128xf32> to vector<1x16x128xf32>
    tpu.vector_store %arg10[%c0_33, %c0_34, %c0_35], %41 {strides = array<i32>} : memref<2x128x128xf32, #tpu.memory_space<vmem>>, vector<1x16x128xf32>,
    %c16 = arith.constant 16 : index
    %c0_36 = arith.constant 0 : index
    %42 = vector.load %arg9[%c16, %c0_36] : memref<128x128xf32, #tpu.memory_space<vmem>>, vector<16x128xf32>
    %c0_37 = arith.constant 0 : index
    %c0_38 = arith.constant 0 : index
    %c0_39 = arith.constant 0 : index
    %43 = vector.load %arg11[%c0_37, %c0_38, %c0_39] : memref<2x16x128xf32, #tpu.memory_space<vmem>>, vector<1x16x128xf32>
    %44 = vector.shape_cast %43 : vector<1x16x128xf32> to vector<16x128xf32>
    %c0_40 = arith.constant 0 : index
    %c0_41 = arith.constant 0 : index
    %45 = vector.load %arg2[%c0_40, %c0_41] : memref<128x128xf32, #tpu.memory_space<vmem>>, vector<128x128xf32>
    %cst_42 = arith.constant dense<0.000000e+00> : vector<16x128xf32>
    %46 = tpu.matmul %44, %45, %cst_42 {dimension_numbers = #tpu.dot_dimension_numbers<[1], [0], [0], [1], [0, 0, 1, 1], [], []>} : vector<16x128xf32>, vector<128x128xf32>, vector<16x128xf32> -> vector<16x128xf32>
    %47 = arith.addf %42, %46 : vector<16x128xf32>
    %c0_43 = arith.constant 0 : index
    %c0_44 = arith.constant 0 : index
    %c0_45 = arith.constant 0 : index
    %48 = vector.load %arg12[%c0_43, %c0_44, %c0_45] : memref<2x16x128xf32, #tpu.memory_space<vmem>>, vector<1x16x128xf32>
    %49 = vector.shape_cast %48 : vector<1x16x128xf32> to vector<16x128xf32>
    %50 = arith.negf %47 : vector<16x128xf32>
    %51 = math.exp %50 : vector<16x128xf32>
    %cst_46 = arith.constant 1.000000e+00 : f32
    %52 = vector.broadcast %cst_46 : f32 to vector<16x128xf32>
    %53 = arith.addf %52, %51 : vector<16x128xf32>
    %54 = arith.divf %52, %53 : vector<16x128xf32>
    %55 = math.tanh %47 : vector<16x128xf32>
    %c96_i32_47 = arith.constant 96 : i32
    %56 = tpu.dynamic_rotate %54 by %c96_i32_47 dim 1 : vector<16x128xf32>, i32 -> vector<16x128xf32>
    %c64_i32_48 = arith.constant 64 : i32
    %57 = tpu.dynamic_rotate %55 by %c64_i32_48 dim 1 : vector<16x128xf32>, i32 -> vector<16x128xf32>
    %c32_i32_49 = arith.constant 32 : i32
    %58 = tpu.dynamic_rotate %54 by %c32_i32_49 dim 1 : vector<16x128xf32>, i32 -> vector<16x128xf32>
    %59 = arith.mulf %56, %49 : vector<16x128xf32>
    %60 = arith.mulf %54, %57 : vector<16x128xf32>
    %61 = arith.addf %59, %60 : vector<16x128xf32>
    %62 = math.tanh %61 : vector<16x128xf32>
    %63 = arith.mulf %58, %62 : vector<16x128xf32>
    %c0_50 = arith.constant 0 : index
    %c0_51 = arith.constant 0 : index
    %c0_52 = arith.constant 0 : index
    %64 = vector.load %arg11[%c0_50, %c0_51, %c0_52] : memref<2x16x128xf32, #tpu.memory_space<vmem>>, vector<1x16x128xf32>
    %65 = vector.shape_cast %64 : vector<1x16x128xf32> to vector<16x128xf32>
    %66 = vector.shape_cast %63 : vector<16x128xf32> to vector<1x16x128xf32>
    tpu.vector_store %arg11[%c0_50, %c0_51, %c0_52], %66 {strides = array<i32>} : memref<2x16x128xf32, #tpu.memory_space<vmem>>, vector<1x16x128xf32>,
    %c0_53 = arith.constant 0 : index
    %c0_54 = arith.constant 0 : index
    %c0_55 = arith.constant 0 : index
    %67 = vector.load %arg12[%c0_53, %c0_54, %c0_55] : memref<2x16x128xf32, #tpu.memory_space<vmem>>, vector<1x16x128xf32>
    %68 = vector.shape_cast %67 : vector<1x16x128xf32> to vector<16x128xf32>
    %69 = vector.shape_cast %61 : vector<16x128xf32> to vector<1x16x128xf32>
    tpu.vector_store %arg12[%c0_53, %c0_54, %c0_55], %69 {strides = array<i32>} : memref<2x16x128xf32, #tpu.memory_space<vmem>>, vector<1x16x128xf32>,
    %c0_56 = arith.constant 0 : index
    %c16_57 = arith.constant 16 : index
    %c0_58 = arith.constant 0 : index
    %70 = vector.load %arg10[%c0_56, %c16_57, %c0_58] : memref<2x128x128xf32, #tpu.memory_space<vmem>>, vector<1x16x128xf32>
    %71 = vector.shape_cast %70 : vector<1x16x128xf32> to vector<16x128xf32>
    %72 = vector.shape_cast %63 : vector<16x128xf32> to vector<1x16x128xf32>
    tpu.vector_store %arg10[%c0_56, %c16_57, %c0_58], %72 {strides = array<i32>} : memref<2x128x128xf32, #tpu.memory_space<vmem>>, vector<1x16x128xf32>,
    %c0_59 = arith.constant 0 : index
    %c0_60 = arith.constant 0 : index
    %c0_61 = arith.constant 0 : index
    %73 = vector.load %arg10[%c0_59, %c0_60, %c0_61] : memref<2x128x128xf32, #tpu.memory_space<vmem>>, vector<1x16x128xf32>
    %74 = vector.shape_cast %73 : vector<1x16x128xf32> to vector<16x128xf32>
    %c1 = arith.constant 1 : index
    %c0_62 = arith.constant 0 : index
    %c0_63 = arith.constant 0 : index
    %75 = vector.load %arg11[%c1, %c0_62, %c0_63] : memref<2x16x128xf32, #tpu.memory_space<vmem>>, vector<1x16x128xf32>
    %76 = vector.shape_cast %75 : vector<1x16x128xf32> to vector<16x128xf32>
    %77 = tpu.concatenate %74, %76 in 1 : vector<16x128xf32>, vector<16x128xf32> -> vector<16x256xf32>
    %c0_64 = arith.constant 0 : index
    %c0_65 = arith.constant 0 : index
    %c0_66 = arith.constant 0 : index
    %78 = vector.load %arg4[%c0_64, %c0_65, %c0_66] : memref<1x256x128xf32, #tpu.memory_space<vmem>>, vector<1x256x128xf32>
    %79 = vector.shape_cast %78 : vector<1x256x128xf32> to vector<256x128xf32>
    %cst_67 = arith.constant dense<0.000000e+00> : vector<16x128xf32>
    %80 = tpu.matmul %77, %79, %cst_67 {dimension_numbers = #tpu.dot_dimension_numbers<[1], [0], [0], [1], [0, 0, 1, 1], [], []>} : vector<16x256xf32>, vector<256x128xf32>, vector<16x128xf32> -> vector<16x128xf32>
    %c0_68 = arith.constant 0 : index
    %c0_69 = arith.constant 0 : index
    %c0_70 = arith.constant 0 : index
    %81 = vector.load %arg5[%c0_68, %c0_69, %c0_70] : memref<1x1x128xf32, #tpu.memory_space<vmem>>, vector<1x1x128xf32>
    %82 = vector.shape_cast %81 : vector<1x1x128xf32> to vector<1x128xf32>
    %83 = vector.broadcast %82 : vector<1x128xf32> to vector<16x128xf32>
    %84 = arith.addf %80, %83 : vector<16x128xf32>
    %c1_71 = arith.constant 1 : index
    %c0_72 = arith.constant 0 : index
    %c0_73 = arith.constant 0 : index
    %85 = vector.load %arg12[%c1_71, %c0_72, %c0_73] : memref<2x16x128xf32, #tpu.memory_space<vmem>>, vector<1x16x128xf32>
    %86 = vector.shape_cast %85 : vector<1x16x128xf32> to vector<16x128xf32>
    %87 = arith.negf %84 : vector<16x128xf32>
    %88 = math.exp %87 : vector<16x128xf32>
    %cst_74 = arith.constant 1.000000e+00 : f32
    %89 = vector.broadcast %cst_74 : f32 to vector<16x128xf32>
    %90 = arith.addf %89, %88 : vector<16x128xf32>
    %91 = arith.divf %89, %90 : vector<16x128xf32>
    %92 = math.tanh %84 : vector<16x128xf32>
    %c96_i32_75 = arith.constant 96 : i32
    %93 = tpu.dynamic_rotate %91 by %c96_i32_75 dim 1 : vector<16x128xf32>, i32 -> vector<16x128xf32>
    %c64_i32_76 = arith.constant 64 : i32
    %94 = tpu.dynamic_rotate %92 by %c64_i32_76 dim 1 : vector<16x128xf32>, i32 -> vector<16x128xf32>
    %c32_i32_77 = arith.constant 32 : i32
    %95 = tpu.dynamic_rotate %91 by %c32_i32_77 dim 1 : vector<16x128xf32>, i32 -> vector<16x128xf32>
    %96 = arith.mulf %93, %86 : vector<16x128xf32>
    %97 = arith.mulf %91, %94 : vector<16x128xf32>
    %98 = arith.addf %96, %97 : vector<16x128xf32>
    %99 = math.tanh %98 : vector<16x128xf32>
    %100 = arith.mulf %95, %99 : vector<16x128xf32>
    %c1_78 = arith.constant 1 : index
    %c0_79 = arith.constant 0 : index
    %c0_80 = arith.constant 0 : index
    %101 = vector.load %arg11[%c1_78, %c0_79, %c0_80] : memref<2x16x128xf32, #tpu.memory_space<vmem>>, vector<1x16x128xf32>
    %102 = vector.shape_cast %101 : vector<1x16x128xf32> to vector<16x128xf32>
    %103 = vector.shape_cast %100 : vector<16x128xf32> to vector<1x16x128xf32>
    tpu.vector_store %arg11[%c1_78, %c0_79, %c0_80], %103 {strides = array<i32>} : memref<2x16x128xf32, #tpu.memory_space<vmem>>, vector<1x16x128xf32>,
    %c1_81 = arith.constant 1 : index
    %c0_82 = arith.constant 0 : index
    %c0_83 = arith.constant 0 : index
    %104 = vector.load %arg12[%c1_81, %c0_82, %c0_83] : memref<2x16x128xf32, #tpu.memory_space<vmem>>, vector<1x16x128xf32>
    %105 = vector.shape_cast %104 : vector<1x16x128xf32> to vector<16x128xf32>
    %106 = vector.shape_cast %98 : vector<16x128xf32> to vector<1x16x128xf32>
    tpu.vector_store %arg12[%c1_81, %c0_82, %c0_83], %106 {strides = array<i32>} : memref<2x16x128xf32, #tpu.memory_space<vmem>>, vector<1x16x128xf32>,
    %c1_84 = arith.constant 1 : index
    %c0_85 = arith.constant 0 : index
    %c0_86 = arith.constant 0 : index
    %107 = vector.load %arg10[%c1_84, %c0_85, %c0_86] : memref<2x128x128xf32, #tpu.memory_space<vmem>>, vector<1x16x128xf32>
    %108 = vector.shape_cast %107 : vector<1x16x128xf32> to vector<16x128xf32>
    %109 = vector.shape_cast %100 : vector<16x128xf32> to vector<1x16x128xf32>
    tpu.vector_store %arg10[%c1_84, %c0_85, %c0_86], %109 {strides = array<i32>} : memref<2x128x128xf32, #tpu.memory_space<vmem>>, vector<1x16x128xf32>,
    %c32 = arith.constant 32 : index
    %c0_87 = arith.constant 0 : index
    %110 = vector.load %arg9[%c32, %c0_87] : memref<128x128xf32, #tpu.memory_space<vmem>>, vector<16x128xf32>
    %c0_88 = arith.constant 0 : index
    %c0_89 = arith.constant 0 : index
    %c0_90 = arith.constant 0 : index
    %111 = vector.load %arg11[%c0_88, %c0_89, %c0_90] : memref<2x16x128xf32, #tpu.memory_space<vmem>>, vector<1x16x128xf32>
    %112 = vector.shape_cast %111 : vector<1x16x128xf32> to vector<16x128xf32>
    %c0_91 = arith.constant 0 : index
    %c0_92 = arith.constant 0 : index
    %113 = vector.load %arg2[%c0_91, %c0_92] : memref<128x128xf32, #tpu.memory_space<vmem>>, vector<128x128xf32>
    %cst_93 = arith.constant dense<0.000000e+00> : vector<16x128xf32>
    %114 = tpu.matmul %112, %113, %cst_93 {dimension_numbers = #tpu.dot_dimension_numbers<[1], [0], [0], [1], [0, 0, 1, 1], [], []>} : vector<16x128xf32>, vector<128x128xf32>, vector<16x128xf32> -> vector<16x128xf32>
    %115 = arith.addf %110, %114 : vector<16x128xf32>
    %c0_94 = arith.constant 0 : index
    %c0_95 = arith.constant 0 : index
    %c0_96 = arith.constant 0 : index
    %116 = vector.load %arg12[%c0_94, %c0_95, %c0_96] : memref<2x16x128xf32, #tpu.memory_space<vmem>>, vector<1x16x128xf32>
    %117 = vector.shape_cast %116 : vector<1x16x128xf32> to vector<16x128xf32>
    %118 = arith.negf %115 : vector<16x128xf32>
    %119 = math.exp %118 : vector<16x128xf32>
    %cst_97 = arith.constant 1.000000e+00 : f32
    %120 = vector.broadcast %cst_97 : f32 to vector<16x128xf32>
    %121 = arith.addf %120, %119 : vector<16x128xf32>
    %122 = arith.divf %120, %121 : vector<16x128xf32>
    %123 = math.tanh %115 : vector<16x128xf32>
    %c96_i32_98 = arith.constant 96 : i32
    %124 = tpu.dynamic_rotate %122 by %c96_i32_98 dim 1 : vector<16x128xf32>, i32 -> vector<16x128xf32>
    %c64_i32_99 = arith.constant 64 : i32
    %125 = tpu.dynamic_rotate %123 by %c64_i32_99 dim 1 : vector<16x128xf32>, i32 -> vector<16x128xf32>
    %c32_i32_100 = arith.constant 32 : i32
    %126 = tpu.dynamic_rotate %122 by %c32_i32_100 dim 1 : vector<16x128xf32>, i32 -> vector<16x128xf32>
    %127 = arith.mulf %124, %117 : vector<16x128xf32>
    %128 = arith.mulf %122, %125 : vector<16x128xf32>
    %129 = arith.addf %127, %128 : vector<16x128xf32>
    %130 = math.tanh %129 : vector<16x128xf32>
    %131 = arith.mulf %126, %130 : vector<16x128xf32>
    %c0_101 = arith.constant 0 : index
    %c0_102 = arith.constant 0 : index
    %c0_103 = arith.constant 0 : index
    %132 = vector.load %arg11[%c0_101, %c0_102, %c0_103] : memref<2x16x128xf32, #tpu.memory_space<vmem>>, vector<1x16x128xf32>
    %133 = vector.shape_cast %132 : vector<1x16x128xf32> to vector<16x128xf32>
    %134 = vector.shape_cast %131 : vector<16x128xf32> to vector<1x16x128xf32>
    tpu.vector_store %arg11[%c0_101, %c0_102, %c0_103], %134 {strides = array<i32>} : memref<2x16x128xf32, #tpu.memory_space<vmem>>, vector<1x16x128xf32>,
    %c0_104 = arith.constant 0 : index
    %c0_105 = arith.constant 0 : index
    %c0_106 = arith.constant 0 : index
    %135 = vector.load %arg12[%c0_104, %c0_105, %c0_106] : memref<2x16x128xf32, #tpu.memory_space<vmem>>, vector<1x16x128xf32>
    %136 = vector.shape_cast %135 : vector<1x16x128xf32> to vector<16x128xf32>
    %137 = vector.shape_cast %129 : vector<16x128xf32> to vector<1x16x128xf32>
    tpu.vector_store %arg12[%c0_104, %c0_105, %c0_106], %137 {strides = array<i32>} : memref<2x16x128xf32, #tpu.memory_space<vmem>>, vector<1x16x128xf32>,
    %c0_107 = arith.constant 0 : index
    %c32_108 = arith.constant 32 : index
    %c0_109 = arith.constant 0 : index
    %138 = vector.load %arg10[%c0_107, %c32_108, %c0_109] : memref<2x128x128xf32, #tpu.memory_space<vmem>>, vector<1x16x128xf32>
    %139 = vector.shape_cast %138 : vector<1x16x128xf32> to vector<16x128xf32>
    %140 = vector.shape_cast %131 : vector<16x128xf32> to vector<1x16x128xf32>
    tpu.vector_store %arg10[%c0_107, %c32_108, %c0_109], %140 {strides = array<i32>} : memref<2x128x128xf32, #tpu.memory_space<vmem>>, vector<1x16x128xf32>,
    %c0_110 = arith.constant 0 : index
    %c16_111 = arith.constant 16 : index
    %c0_112 = arith.constant 0 : index
    %141 = vector.load %arg10[%c0_110, %c16_111, %c0_112] : memref<2x128x128xf32, #tpu.memory_space<vmem>>, vector<1x16x128xf32>
    %142 = vector.shape_cast %141 : vector<1x16x128xf32> to vector<16x128xf32>
    %c1_113 = arith.constant 1 : index
    %c0_114 = arith.constant 0 : index
    %c0_115 = arith.constant 0 : index
    %143 = vector.load %arg11[%c1_113, %c0_114, %c0_115] : memref<2x16x128xf32, #tpu.memory_space<vmem>>, vector<1x16x128xf32>
    %144 = vector.shape_cast %143 : vector<1x16x128xf32> to vector<16x128xf32>
    %145 = tpu.concatenate %142, %144 in 1 : vector<16x128xf32>, vector<16x128xf32> -> vector<16x256xf32>
    %c0_116 = arith.constant 0 : index
    %c0_117 = arith.constant 0 : index
    %c0_118 = arith.constant 0 : index
    %146 = vector.load %arg4[%c0_116, %c0_117, %c0_118] : memref<1x256x128xf32, #tpu.memory_space<vmem>>, vector<1x256x128xf32>
    %147 = vector.shape_cast %146 : vector<1x256x128xf32> to vector<256x128xf32>
    %cst_119 = arith.constant dense<0.000000e+00> : vector<16x128xf32>
    %148 = tpu.matmul %145, %147, %cst_119 {dimension_numbers = #tpu.dot_dimension_numbers<[1], [0], [0], [1], [0, 0, 1, 1], [], []>} : vector<16x256xf32>, vector<256x128xf32>, vector<16x128xf32> -> vector<16x128xf32>
    %c0_120 = arith.constant 0 : index
    %c0_121 = arith.constant 0 : index
    %c0_122 = arith.constant 0 : index
    %149 = vector.load %arg5[%c0_120, %c0_121, %c0_122] : memref<1x1x128xf32, #tpu.memory_space<vmem>>, vector<1x1x128xf32>
    %150 = vector.shape_cast %149 : vector<1x1x128xf32> to vector<1x128xf32>
    %151 = vector.broadcast %150 : vector<1x128xf32> to vector<16x128xf32>
    %152 = arith.addf %148, %151 : vector<16x128xf32>
    %c1_123 = arith.constant 1 : index
    %c0_124 = arith.constant 0 : index
    %c0_125 = arith.constant 0 : index
    %153 = vector.load %arg12[%c1_123, %c0_124, %c0_125] : memref<2x16x128xf32, #tpu.memory_space<vmem>>, vector<1x16x128xf32>
    %154 = vector.shape_cast %153 : vector<1x16x128xf32> to vector<16x128xf32>
    %155 = arith.negf %152 : vector<16x128xf32>
    %156 = math.exp %155 : vector<16x128xf32>
    %cst_126 = arith.constant 1.000000e+00 : f32
    %157 = vector.broadcast %cst_126 : f32 to vector<16x128xf32>
    %158 = arith.addf %157, %156 : vector<16x128xf32>
    %159 = arith.divf %157, %158 : vector<16x128xf32>
    %160 = math.tanh %152 : vector<16x128xf32>
    %c96_i32_127 = arith.constant 96 : i32
    %161 = tpu.dynamic_rotate %159 by %c96_i32_127 dim 1 : vector<16x128xf32>, i32 -> vector<16x128xf32>
    %c64_i32_128 = arith.constant 64 : i32
    %162 = tpu.dynamic_rotate %160 by %c64_i32_128 dim 1 : vector<16x128xf32>, i32 -> vector<16x128xf32>
    %c32_i32_129 = arith.constant 32 : i32
    %163 = tpu.dynamic_rotate %159 by %c32_i32_129 dim 1 : vector<16x128xf32>, i32 -> vector<16x128xf32>
    %164 = arith.mulf %161, %154 : vector<16x128xf32>
    %165 = arith.mulf %159, %162 : vector<16x128xf32>
    %166 = arith.addf %164, %165 : vector<16x128xf32>
    %167 = math.tanh %166 : vector<16x128xf32>
    %168 = arith.mulf %163, %167 : vector<16x128xf32>
    %c1_130 = arith.constant 1 : index
    %c0_131 = arith.constant 0 : index
    %c0_132 = arith.constant 0 : index
    %169 = vector.load %arg11[%c1_130, %c0_131, %c0_132] : memref<2x16x128xf32, #tpu.memory_space<vmem>>, vector<1x16x128xf32>
    %170 = vector.shape_cast %169 : vector<1x16x128xf32> to vector<16x128xf32>
    %171 = vector.shape_cast %168 : vector<16x128xf32> to vector<1x16x128xf32>
    tpu.vector_store %arg11[%c1_130, %c0_131, %c0_132], %171 {strides = array<i32>} : memref<2x16x128xf32, #tpu.memory_space<vmem>>, vector<1x16x128xf32>,
    %c1_133 = arith.constant 1 : index
    %c0_134 = arith.constant 0 : index
    %c0_135 = arith.constant 0 : index
    %172 = vector.load %arg12[%c1_133, %c0_134, %c0_135] : memref<2x16x128xf32, #tpu.memory_space<vmem>>, vector<1x16x128xf32>
    %173 = vector.shape_cast %172 : vector<1x16x128xf32> to vector<16x128xf32>
    %174 = vector.shape_cast %166 : vector<16x128xf32> to vector<1x16x128xf32>
    tpu.vector_store %arg12[%c1_133, %c0_134, %c0_135], %174 {strides = array<i32>} : memref<2x16x128xf32, #tpu.memory_space<vmem>>, vector<1x16x128xf32>,
    %c1_136 = arith.constant 1 : index
    %c16_137 = arith.constant 16 : index
    %c0_138 = arith.constant 0 : index
    %175 = vector.load %arg10[%c1_136, %c16_137, %c0_138] : memref<2x128x128xf32, #tpu.memory_space<vmem>>, vector<1x16x128xf32>
    %176 = vector.shape_cast %175 : vector<1x16x128xf32> to vector<16x128xf32>
    %177 = vector.shape_cast %168 : vector<16x128xf32> to vector<1x16x128xf32>
    tpu.vector_store %arg10[%c1_136, %c16_137, %c0_138], %177 {strides = array<i32>} : memref<2x128x128xf32, #tpu.memory_space<vmem>>, vector<1x16x128xf32>,
    %c48 = arith.constant 48 : index
    %c0_139 = arith.constant 0 : index
    %178 = vector.load %arg9[%c48, %c0_139] : memref<128x128xf32, #tpu.memory_space<vmem>>, vector<16x128xf32>
    %c0_140 = arith.constant 0 : index
    %c0_141 = arith.constant 0 : index
    %c0_142 = arith.constant 0 : index
    %179 = vector.load %arg11[%c0_140, %c0_141, %c0_142] : memref<2x16x128xf32, #tpu.memory_space<vmem>>, vector<1x16x128xf32>
    %180 = vector.shape_cast %179 : vector<1x16x128xf32> to vector<16x128xf32>
    %c0_143 = arith.constant 0 : index
    %c0_144 = arith.constant 0 : index
    %181 = vector.load %arg2[%c0_143, %c0_144] : memref<128x128xf32, #tpu.memory_space<vmem>>, vector<128x128xf32>
    %cst_145 = arith.constant dense<0.000000e+00> : vector<16x128xf32>
    %182 = tpu.matmul %180, %181, %cst_145 {dimension_numbers = #tpu.dot_dimension_numbers<[1], [0], [0], [1], [0, 0, 1, 1], [], []>} : vector<16x128xf32>, vector<128x128xf32>, vector<16x128xf32> -> vector<16x128xf32>
    %183 = arith.addf %178, %182 : vector<16x128xf32>
    %c0_146 = arith.constant 0 : index
    %c0_147 = arith.constant 0 : index
    %c0_148 = arith.constant 0 : index
    %184 = vector.load %arg12[%c0_146, %c0_147, %c0_148] : memref<2x16x128xf32, #tpu.memory_space<vmem>>, vector<1x16x128xf32>
    %185 = vector.shape_cast %184 : vector<1x16x128xf32> to vector<16x128xf32>
    %186 = arith.negf %183 : vector<16x128xf32>
    %187 = math.exp %186 : vector<16x128xf32>
    %cst_149 = arith.constant 1.000000e+00 : f32
    %188 = vector.broadcast %cst_149 : f32 to vector<16x128xf32>
    %189 = arith.addf %188, %187 : vector<16x128xf32>
    %190 = arith.divf %188, %189 : vector<16x128xf32>
    %191 = math.tanh %183 : vector<16x128xf32>
    %c96_i32_150 = arith.constant 96 : i32
    %192 = tpu.dynamic_rotate %190 by %c96_i32_150 dim 1 : vector<16x128xf32>, i32 -> vector<16x128xf32>
    %c64_i32_151 = arith.constant 64 : i32
    %193 = tpu.dynamic_rotate %191 by %c64_i32_151 dim 1 : vector<16x128xf32>, i32 -> vector<16x128xf32>
    %c32_i32_152 = arith.constant 32 : i32
    %194 = tpu.dynamic_rotate %190 by %c32_i32_152 dim 1 : vector<16x128xf32>, i32 -> vector<16x128xf32>
    %195 = arith.mulf %192, %185 : vector<16x128xf32>
    %196 = arith.mulf %190, %193 : vector<16x128xf32>
    %197 = arith.addf %195, %196 : vector<16x128xf32>
    %198 = math.tanh %197 : vector<16x128xf32>
    %199 = arith.mulf %194, %198 : vector<16x128xf32>
    %c0_153 = arith.constant 0 : index
    %c0_154 = arith.constant 0 : index
    %c0_155 = arith.constant 0 : index
    %200 = vector.load %arg11[%c0_153, %c0_154, %c0_155] : memref<2x16x128xf32, #tpu.memory_space<vmem>>, vector<1x16x128xf32>
    %201 = vector.shape_cast %200 : vector<1x16x128xf32> to vector<16x128xf32>
    %202 = vector.shape_cast %199 : vector<16x128xf32> to vector<1x16x128xf32>
    tpu.vector_store %arg11[%c0_153, %c0_154, %c0_155], %202 {strides = array<i32>} : memref<2x16x128xf32, #tpu.memory_space<vmem>>, vector<1x16x128xf32>,
    %c0_156 = arith.constant 0 : index
    %c0_157 = arith.constant 0 : index
    %c0_158 = arith.constant 0 : index
    %203 = vector.load %arg12[%c0_156, %c0_157, %c0_158] : memref<2x16x128xf32, #tpu.memory_space<vmem>>, vector<1x16x128xf32>
    %204 = vector.shape_cast %203 : vector<1x16x128xf32> to vector<16x128xf32>
    %205 = vector.shape_cast %197 : vector<16x128xf32> to vector<1x16x128xf32>
    tpu.vector_store %arg12[%c0_156, %c0_157, %c0_158], %205 {strides = array<i32>} : memref<2x16x128xf32, #tpu.memory_space<vmem>>, vector<1x16x128xf32>,
    %c0_159 = arith.constant 0 : index
    %c48_160 = arith.constant 48 : index
    %c0_161 = arith.constant 0 : index
    %206 = vector.load %arg10[%c0_159, %c48_160, %c0_161] : memref<2x128x128xf32, #tpu.memory_space<vmem>>, vector<1x16x128xf32>
    %207 = vector.shape_cast %206 : vector<1x16x128xf32> to vector<16x128xf32>
    %208 = vector.shape_cast %199 : vector<16x128xf32> to vector<1x16x128xf32>
    tpu.vector_store %arg10[%c0_159, %c48_160, %c0_161], %208 {strides = array<i32>} : memref<2x128x128xf32, #tpu.memory_space<vmem>>, vector<1x16x128xf32>,
    %c0_162 = arith.constant 0 : index
    %c32_163 = arith.constant 32 : index
    %c0_164 = arith.constant 0 : index
    %209 = vector.load %arg10[%c0_162, %c32_163, %c0_164] : memref<2x128x128xf32, #tpu.memory_space<vmem>>, vector<1x16x128xf32>
    %210 = vector.shape_cast %209 : vector<1x16x128xf32> to vector<16x128xf32>
    %c1_165 = arith.constant 1 : index
    %c0_166 = arith.constant 0 : index
    %c0_167 = arith.constant 0 : index
    %211 = vector.load %arg11[%c1_165, %c0_166, %c0_167] : memref<2x16x128xf32, #tpu.memory_space<vmem>>, vector<1x16x128xf32>
    %212 = vector.shape_cast %211 : vector<1x16x128xf32> to vector<16x128xf32>
    %213 = tpu.concatenate %210, %212 in 1 : vector<16x128xf32>, vector<16x128xf32> -> vector<16x256xf32>
    %c0_168 = arith.constant 0 : index
    %c0_169 = arith.constant 0 : index
    %c0_170 = arith.constant 0 : index
    %214 = vector.load %arg4[%c0_168, %c0_169, %c0_170] : memref<1x256x128xf32, #tpu.memory_space<vmem>>, vector<1x256x128xf32>
    %215 = vector.shape_cast %214 : vector<1x256x128xf32> to vector<256x128xf32>
    %cst_171 = arith.constant dense<0.000000e+00> : vector<16x128xf32>
    %216 = tpu.matmul %213, %215, %cst_171 {dimension_numbers = #tpu.dot_dimension_numbers<[1], [0], [0], [1], [0, 0, 1, 1], [], []>} : vector<16x256xf32>, vector<256x128xf32>, vector<16x128xf32> -> vector<16x128xf32>
    %c0_172 = arith.constant 0 : index
    %c0_173 = arith.constant 0 : index
    %c0_174 = arith.constant 0 : index
    %217 = vector.load %arg5[%c0_172, %c0_173, %c0_174] : memref<1x1x128xf32, #tpu.memory_space<vmem>>, vector<1x1x128xf32>
    %218 = vector.shape_cast %217 : vector<1x1x128xf32> to vector<1x128xf32>
    %219 = vector.broadcast %218 : vector<1x128xf32> to vector<16x128xf32>
    %220 = arith.addf %216, %219 : vector<16x128xf32>
    %c1_175 = arith.constant 1 : index
    %c0_176 = arith.constant 0 : index
    %c0_177 = arith.constant 0 : index
    %221 = vector.load %arg12[%c1_175, %c0_176, %c0_177] : memref<2x16x128xf32, #tpu.memory_space<vmem>>, vector<1x16x128xf32>
    %222 = vector.shape_cast %221 : vector<1x16x128xf32> to vector<16x128xf32>
    %223 = arith.negf %220 : vector<16x128xf32>
    %224 = math.exp %223 : vector<16x128xf32>
    %cst_178 = arith.constant 1.000000e+00 : f32
    %225 = vector.broadcast %cst_178 : f32 to vector<16x128xf32>
    %226 = arith.addf %225, %224 : vector<16x128xf32>
    %227 = arith.divf %225, %226 : vector<16x128xf32>
    %228 = math.tanh %220 : vector<16x128xf32>
    %c96_i32_179 = arith.constant 96 : i32
    %229 = tpu.dynamic_rotate %227 by %c96_i32_179 dim 1 : vector<16x128xf32>, i32 -> vector<16x128xf32>
    %c64_i32_180 = arith.constant 64 : i32
    %230 = tpu.dynamic_rotate %228 by %c64_i32_180 dim 1 : vector<16x128xf32>, i32 -> vector<16x128xf32>
    %c32_i32_181 = arith.constant 32 : i32
    %231 = tpu.dynamic_rotate %227 by %c32_i32_181 dim 1 : vector<16x128xf32>, i32 -> vector<16x128xf32>
    %232 = arith.mulf %229, %222 : vector<16x128xf32>
    %233 = arith.mulf %227, %230 : vector<16x128xf32>
    %234 = arith.addf %232, %233 : vector<16x128xf32>
    %235 = math.tanh %234 : vector<16x128xf32>
    %236 = arith.mulf %231, %235 : vector<16x128xf32>
    %c1_182 = arith.constant 1 : index
    %c0_183 = arith.constant 0 : index
    %c0_184 = arith.constant 0 : index
    %237 = vector.load %arg11[%c1_182, %c0_183, %c0_184] : memref<2x16x128xf32, #tpu.memory_space<vmem>>, vector<1x16x128xf32>
    %238 = vector.shape_cast %237 : vector<1x16x128xf32> to vector<16x128xf32>
    %239 = vector.shape_cast %236 : vector<16x128xf32> to vector<1x16x128xf32>
    tpu.vector_store %arg11[%c1_182, %c0_183, %c0_184], %239 {strides = array<i32>} : memref<2x16x128xf32, #tpu.memory_space<vmem>>, vector<1x16x128xf32>,
    %c1_185 = arith.constant 1 : index
    %c0_186 = arith.constant 0 : index
    %c0_187 = arith.constant 0 : index
    %240 = vector.load %arg12[%c1_185, %c0_186, %c0_187] : memref<2x16x128xf32, #tpu.memory_space<vmem>>, vector<1x16x128xf32>
    %241 = vector.shape_cast %240 : vector<1x16x128xf32> to vector<16x128xf32>
    %242 = vector.shape_cast %234 : vector<16x128xf32> to vector<1x16x128xf32>
    tpu.vector_store %arg12[%c1_185, %c0_186, %c0_187], %242 {strides = array<i32>} : memref<2x16x128xf32, #tpu.memory_space<vmem>>, vector<1x16x128xf32>,
    %c1_188 = arith.constant 1 : index
    %c32_189 = arith.constant 32 : index
    %c0_190 = arith.constant 0 : index
    %243 = vector.load %arg10[%c1_188, %c32_189, %c0_190] : memref<2x128x128xf32, #tpu.memory_space<vmem>>, vector<1x16x128xf32>
    %244 = vector.shape_cast %243 : vector<1x16x128xf32> to vector<16x128xf32>
    %245 = vector.shape_cast %236 : vector<16x128xf32> to vector<1x16x128xf32>
    tpu.vector_store %arg10[%c1_188, %c32_189, %c0_190], %245 {strides = array<i32>} : memref<2x128x128xf32, #tpu.memory_space<vmem>>, vector<1x16x128xf32>,
    %c64 = arith.constant 64 : index
    %c0_191 = arith.constant 0 : index
    %246 = vector.load %arg9[%c64, %c0_191] : memref<128x128xf32, #tpu.memory_space<vmem>>, vector<16x128xf32>
    %c0_192 = arith.constant 0 : index
    %c0_193 = arith.constant 0 : index
    %c0_194 = arith.constant 0 : index
    %247 = vector.load %arg11[%c0_192, %c0_193, %c0_194] : memref<2x16x128xf32, #tpu.memory_space<vmem>>, vector<1x16x128xf32>
    %248 = vector.shape_cast %247 : vector<1x16x128xf32> to vector<16x128xf32>
    %c0_195 = arith.constant 0 : index
    %c0_196 = arith.constant 0 : index
    %249 = vector.load %arg2[%c0_195, %c0_196] : memref<128x128xf32, #tpu.memory_space<vmem>>, vector<128x128xf32>
    %cst_197 = arith.constant dense<0.000000e+00> : vector<16x128xf32>
    %250 = tpu.matmul %248, %249, %cst_197 {dimension_numbers = #tpu.dot_dimension_numbers<[1], [0], [0], [1], [0, 0, 1, 1], [], []>} : vector<16x128xf32>, vector<128x128xf32>, vector<16x128xf32> -> vector<16x128xf32>
    %251 = arith.addf %246, %250 : vector<16x128xf32>
    %c0_198 = arith.constant 0 : index
    %c0_199 = arith.constant 0 : index
    %c0_200 = arith.constant 0 : index
    %252 = vector.load %arg12[%c0_198, %c0_199, %c0_200] : memref<2x16x128xf32, #tpu.memory_space<vmem>>, vector<1x16x128xf32>
    %253 = vector.shape_cast %252 : vector<1x16x128xf32> to vector<16x128xf32>
    %254 = arith.negf %251 : vector<16x128xf32>
    %255 = math.exp %254 : vector<16x128xf32>
    %cst_201 = arith.constant 1.000000e+00 : f32
    %256 = vector.broadcast %cst_201 : f32 to vector<16x128xf32>
    %257 = arith.addf %256, %255 : vector<16x128xf32>
    %258 = arith.divf %256, %257 : vector<16x128xf32>
    %259 = math.tanh %251 : vector<16x128xf32>
    %c96_i32_202 = arith.constant 96 : i32
    %260 = tpu.dynamic_rotate %258 by %c96_i32_202 dim 1 : vector<16x128xf32>, i32 -> vector<16x128xf32>
    %c64_i32_203 = arith.constant 64 : i32
    %261 = tpu.dynamic_rotate %259 by %c64_i32_203 dim 1 : vector<16x128xf32>, i32 -> vector<16x128xf32>
    %c32_i32_204 = arith.constant 32 : i32
    %262 = tpu.dynamic_rotate %258 by %c32_i32_204 dim 1 : vector<16x128xf32>, i32 -> vector<16x128xf32>
    %263 = arith.mulf %260, %253 : vector<16x128xf32>
    %264 = arith.mulf %258, %261 : vector<16x128xf32>
    %265 = arith.addf %263, %264 : vector<16x128xf32>
    %266 = math.tanh %265 : vector<16x128xf32>
    %267 = arith.mulf %262, %266 : vector<16x128xf32>
    %c0_205 = arith.constant 0 : index
    %c0_206 = arith.constant 0 : index
    %c0_207 = arith.constant 0 : index
    %268 = vector.load %arg11[%c0_205, %c0_206, %c0_207] : memref<2x16x128xf32, #tpu.memory_space<vmem>>, vector<1x16x128xf32>
    %269 = vector.shape_cast %268 : vector<1x16x128xf32> to vector<16x128xf32>
    %270 = vector.shape_cast %267 : vector<16x128xf32> to vector<1x16x128xf32>
    tpu.vector_store %arg11[%c0_205, %c0_206, %c0_207], %270 {strides = array<i32>} : memref<2x16x128xf32, #tpu.memory_space<vmem>>, vector<1x16x128xf32>,
    %c0_208 = arith.constant 0 : index
    %c0_209 = arith.constant 0 : index
    %c0_210 = arith.constant 0 : index
    %271 = vector.load %arg12[%c0_208, %c0_209, %c0_210] : memref<2x16x128xf32, #tpu.memory_space<vmem>>, vector<1x16x128xf32>
    %272 = vector.shape_cast %271 : vector<1x16x128xf32> to vector<16x128xf32>
    %273 = vector.shape_cast %265 : vector<16x128xf32> to vector<1x16x128xf32>
    tpu.vector_store %arg12[%c0_208, %c0_209, %c0_210], %273 {strides = array<i32>} : memref<2x16x128xf32, #tpu.memory_space<vmem>>, vector<1x16x128xf32>,
    %c0_211 = arith.constant 0 : index
    %c64_212 = arith.constant 64 : index
    %c0_213 = arith.constant 0 : index
    %274 = vector.load %arg10[%c0_211, %c64_212, %c0_213] : memref<2x128x128xf32, #tpu.memory_space<vmem>>, vector<1x16x128xf32>
    %275 = vector.shape_cast %274 : vector<1x16x128xf32> to vector<16x128xf32>
    %276 = vector.shape_cast %267 : vector<16x128xf32> to vector<1x16x128xf32>
    tpu.vector_store %arg10[%c0_211, %c64_212, %c0_213], %276 {strides = array<i32>} : memref<2x128x128xf32, #tpu.memory_space<vmem>>, vector<1x16x128xf32>,
    %c0_214 = arith.constant 0 : index
    %c48_215 = arith.constant 48 : index
    %c0_216 = arith.constant 0 : index
    %277 = vector.load %arg10[%c0_214, %c48_215, %c0_216] : memref<2x128x128xf32, #tpu.memory_space<vmem>>, vector<1x16x128xf32>
    %278 = vector.shape_cast %277 : vector<1x16x128xf32> to vector<16x128xf32>
    %c1_217 = arith.constant 1 : index
    %c0_218 = arith.constant 0 : index
    %c0_219 = arith.constant 0 : index
    %279 = vector.load %arg11[%c1_217, %c0_218, %c0_219] : memref<2x16x128xf32, #tpu.memory_space<vmem>>, vector<1x16x128xf32>
    %280 = vector.shape_cast %279 : vector<1x16x128xf32> to vector<16x128xf32>
    %281 = tpu.concatenate %278, %280 in 1 : vector<16x128xf32>, vector<16x128xf32> -> vector<16x256xf32>
    %c0_220 = arith.constant 0 : index
    %c0_221 = arith.constant 0 : index
    %c0_222 = arith.constant 0 : index
    %282 = vector.load %arg4[%c0_220, %c0_221, %c0_222] : memref<1x256x128xf32, #tpu.memory_space<vmem>>, vector<1x256x128xf32>
    %283 = vector.shape_cast %282 : vector<1x256x128xf32> to vector<256x128xf32>
    %cst_223 = arith.constant dense<0.000000e+00> : vector<16x128xf32>
    %284 = tpu.matmul %281, %283, %cst_223 {dimension_numbers = #tpu.dot_dimension_numbers<[1], [0], [0], [1], [0, 0, 1, 1], [], []>} : vector<16x256xf32>, vector<256x128xf32>, vector<16x128xf32> -> vector<16x128xf32>
    %c0_224 = arith.constant 0 : index
    %c0_225 = arith.constant 0 : index
    %c0_226 = arith.constant 0 : index
    %285 = vector.load %arg5[%c0_224, %c0_225, %c0_226] : memref<1x1x128xf32, #tpu.memory_space<vmem>>, vector<1x1x128xf32>
    %286 = vector.shape_cast %285 : vector<1x1x128xf32> to vector<1x128xf32>
    %287 = vector.broadcast %286 : vector<1x128xf32> to vector<16x128xf32>
    %288 = arith.addf %284, %287 : vector<16x128xf32>
    %c1_227 = arith.constant 1 : index
    %c0_228 = arith.constant 0 : index
    %c0_229 = arith.constant 0 : index
    %289 = vector.load %arg12[%c1_227, %c0_228, %c0_229] : memref<2x16x128xf32, #tpu.memory_space<vmem>>, vector<1x16x128xf32>
    %290 = vector.shape_cast %289 : vector<1x16x128xf32> to vector<16x128xf32>
    %291 = arith.negf %288 : vector<16x128xf32>
    %292 = math.exp %291 : vector<16x128xf32>
    %cst_230 = arith.constant 1.000000e+00 : f32
    %293 = vector.broadcast %cst_230 : f32 to vector<16x128xf32>
    %294 = arith.addf %293, %292 : vector<16x128xf32>
    %295 = arith.divf %293, %294 : vector<16x128xf32>
    %296 = math.tanh %288 : vector<16x128xf32>
    %c96_i32_231 = arith.constant 96 : i32
    %297 = tpu.dynamic_rotate %295 by %c96_i32_231 dim 1 : vector<16x128xf32>, i32 -> vector<16x128xf32>
    %c64_i32_232 = arith.constant 64 : i32
    %298 = tpu.dynamic_rotate %296 by %c64_i32_232 dim 1 : vector<16x128xf32>, i32 -> vector<16x128xf32>
    %c32_i32_233 = arith.constant 32 : i32
    %299 = tpu.dynamic_rotate %295 by %c32_i32_233 dim 1 : vector<16x128xf32>, i32 -> vector<16x128xf32>
    %300 = arith.mulf %297, %290 : vector<16x128xf32>
    %301 = arith.mulf %295, %298 : vector<16x128xf32>
    %302 = arith.addf %300, %301 : vector<16x128xf32>
    %303 = math.tanh %302 : vector<16x128xf32>
    %304 = arith.mulf %299, %303 : vector<16x128xf32>
    %c1_234 = arith.constant 1 : index
    %c0_235 = arith.constant 0 : index
    %c0_236 = arith.constant 0 : index
    %305 = vector.load %arg11[%c1_234, %c0_235, %c0_236] : memref<2x16x128xf32, #tpu.memory_space<vmem>>, vector<1x16x128xf32>
    %306 = vector.shape_cast %305 : vector<1x16x128xf32> to vector<16x128xf32>
    %307 = vector.shape_cast %304 : vector<16x128xf32> to vector<1x16x128xf32>
    tpu.vector_store %arg11[%c1_234, %c0_235, %c0_236], %307 {strides = array<i32>} : memref<2x16x128xf32, #tpu.memory_space<vmem>>, vector<1x16x128xf32>,
    %c1_237 = arith.constant 1 : index
    %c0_238 = arith.constant 0 : index
    %c0_239 = arith.constant 0 : index
    %308 = vector.load %arg12[%c1_237, %c0_238, %c0_239] : memref<2x16x128xf32, #tpu.memory_space<vmem>>, vector<1x16x128xf32>
    %309 = vector.shape_cast %308 : vector<1x16x128xf32> to vector<16x128xf32>
    %310 = vector.shape_cast %302 : vector<16x128xf32> to vector<1x16x128xf32>
    tpu.vector_store %arg12[%c1_237, %c0_238, %c0_239], %310 {strides = array<i32>} : memref<2x16x128xf32, #tpu.memory_space<vmem>>, vector<1x16x128xf32>,
    %c1_240 = arith.constant 1 : index
    %c48_241 = arith.constant 48 : index
    %c0_242 = arith.constant 0 : index
    %311 = vector.load %arg10[%c1_240, %c48_241, %c0_242] : memref<2x128x128xf32, #tpu.memory_space<vmem>>, vector<1x16x128xf32>
    %312 = vector.shape_cast %311 : vector<1x16x128xf32> to vector<16x128xf32>
    %313 = vector.shape_cast %304 : vector<16x128xf32> to vector<1x16x128xf32>
    tpu.vector_store %arg10[%c1_240, %c48_241, %c0_242], %313 {strides = array<i32>} : memref<2x128x128xf32, #tpu.memory_space<vmem>>, vector<1x16x128xf32>,
    %c80 = arith.constant 80 : index
    %c0_243 = arith.constant 0 : index
    %314 = vector.load %arg9[%c80, %c0_243] : memref<128x128xf32, #tpu.memory_space<vmem>>, vector<16x128xf32>
    %c0_244 = arith.constant 0 : index
    %c0_245 = arith.constant 0 : index
    %c0_246 = arith.constant 0 : index
    %315 = vector.load %arg11[%c0_244, %c0_245, %c0_246] : memref<2x16x128xf32, #tpu.memory_space<vmem>>, vector<1x16x128xf32>
    %316 = vector.shape_cast %315 : vector<1x16x128xf32> to vector<16x128xf32>
    %c0_247 = arith.constant 0 : index
    %c0_248 = arith.constant 0 : index
    %317 = vector.load %arg2[%c0_247, %c0_248] : memref<128x128xf32, #tpu.memory_space<vmem>>, vector<128x128xf32>
    %cst_249 = arith.constant dense<0.000000e+00> : vector<16x128xf32>
    %318 = tpu.matmul %316, %317, %cst_249 {dimension_numbers = #tpu.dot_dimension_numbers<[1], [0], [0], [1], [0, 0, 1, 1], [], []>} : vector<16x128xf32>, vector<128x128xf32>, vector<16x128xf32> -> vector<16x128xf32>
    %319 = arith.addf %314, %318 : vector<16x128xf32>
    %c0_250 = arith.constant 0 : index
    %c0_251 = arith.constant 0 : index
    %c0_252 = arith.constant 0 : index
    %320 = vector.load %arg12[%c0_250, %c0_251, %c0_252] : memref<2x16x128xf32, #tpu.memory_space<vmem>>, vector<1x16x128xf32>
    %321 = vector.shape_cast %320 : vector<1x16x128xf32> to vector<16x128xf32>
    %322 = arith.negf %319 : vector<16x128xf32>
    %323 = math.exp %322 : vector<16x128xf32>
    %cst_253 = arith.constant 1.000000e+00 : f32
    %324 = vector.broadcast %cst_253 : f32 to vector<16x128xf32>
    %325 = arith.addf %324, %323 : vector<16x128xf32>
    %326 = arith.divf %324, %325 : vector<16x128xf32>
    %327 = math.tanh %319 : vector<16x128xf32>
    %c96_i32_254 = arith.constant 96 : i32
    %328 = tpu.dynamic_rotate %326 by %c96_i32_254 dim 1 : vector<16x128xf32>, i32 -> vector<16x128xf32>
    %c64_i32_255 = arith.constant 64 : i32
    %329 = tpu.dynamic_rotate %327 by %c64_i32_255 dim 1 : vector<16x128xf32>, i32 -> vector<16x128xf32>
    %c32_i32_256 = arith.constant 32 : i32
    %330 = tpu.dynamic_rotate %326 by %c32_i32_256 dim 1 : vector<16x128xf32>, i32 -> vector<16x128xf32>
    %331 = arith.mulf %328, %321 : vector<16x128xf32>
    %332 = arith.mulf %326, %329 : vector<16x128xf32>
    %333 = arith.addf %331, %332 : vector<16x128xf32>
    %334 = math.tanh %333 : vector<16x128xf32>
    %335 = arith.mulf %330, %334 : vector<16x128xf32>
    %c0_257 = arith.constant 0 : index
    %c0_258 = arith.constant 0 : index
    %c0_259 = arith.constant 0 : index
    %336 = vector.load %arg11[%c0_257, %c0_258, %c0_259] : memref<2x16x128xf32, #tpu.memory_space<vmem>>, vector<1x16x128xf32>
    %337 = vector.shape_cast %336 : vector<1x16x128xf32> to vector<16x128xf32>
    %338 = vector.shape_cast %335 : vector<16x128xf32> to vector<1x16x128xf32>
    tpu.vector_store %arg11[%c0_257, %c0_258, %c0_259], %338 {strides = array<i32>} : memref<2x16x128xf32, #tpu.memory_space<vmem>>, vector<1x16x128xf32>,
    %c0_260 = arith.constant 0 : index
    %c0_261 = arith.constant 0 : index
    %c0_262 = arith.constant 0 : index
    %339 = vector.load %arg12[%c0_260, %c0_261, %c0_262] : memref<2x16x128xf32, #tpu.memory_space<vmem>>, vector<1x16x128xf32>
    %340 = vector.shape_cast %339 : vector<1x16x128xf32> to vector<16x128xf32>
    %341 = vector.shape_cast %333 : vector<16x128xf32> to vector<1x16x128xf32>
    tpu.vector_store %arg12[%c0_260, %c0_261, %c0_262], %341 {strides = array<i32>} : memref<2x16x128xf32, #tpu.memory_space<vmem>>, vector<1x16x128xf32>,
    %c0_263 = arith.constant 0 : index
    %c80_264 = arith.constant 80 : index
    %c0_265 = arith.constant 0 : index
    %342 = vector.load %arg10[%c0_263, %c80_264, %c0_265] : memref<2x128x128xf32, #tpu.memory_space<vmem>>, vector<1x16x128xf32>
    %343 = vector.shape_cast %342 : vector<1x16x128xf32> to vector<16x128xf32>
    %344 = vector.shape_cast %335 : vector<16x128xf32> to vector<1x16x128xf32>
    tpu.vector_store %arg10[%c0_263, %c80_264, %c0_265], %344 {strides = array<i32>} : memref<2x128x128xf32, #tpu.memory_space<vmem>>, vector<1x16x128xf32>,
    %c0_266 = arith.constant 0 : index
    %c64_267 = arith.constant 64 : index
    %c0_268 = arith.constant 0 : index
    %345 = vector.load %arg10[%c0_266, %c64_267, %c0_268] : memref<2x128x128xf32, #tpu.memory_space<vmem>>, vector<1x16x128xf32>
    %346 = vector.shape_cast %345 : vector<1x16x128xf32> to vector<16x128xf32>
    %c1_269 = arith.constant 1 : index
    %c0_270 = arith.constant 0 : index
    %c0_271 = arith.constant 0 : index
    %347 = vector.load %arg11[%c1_269, %c0_270, %c0_271] : memref<2x16x128xf32, #tpu.memory_space<vmem>>, vector<1x16x128xf32>
    %348 = vector.shape_cast %347 : vector<1x16x128xf32> to vector<16x128xf32>
    %349 = tpu.concatenate %346, %348 in 1 : vector<16x128xf32>, vector<16x128xf32> -> vector<16x256xf32>
    %c0_272 = arith.constant 0 : index
    %c0_273 = arith.constant 0 : index
    %c0_274 = arith.constant 0 : index
    %350 = vector.load %arg4[%c0_272, %c0_273, %c0_274] : memref<1x256x128xf32, #tpu.memory_space<vmem>>, vector<1x256x128xf32>
    %351 = vector.shape_cast %350 : vector<1x256x128xf32> to vector<256x128xf32>
    %cst_275 = arith.constant dense<0.000000e+00> : vector<16x128xf32>
    %352 = tpu.matmul %349, %351, %cst_275 {dimension_numbers = #tpu.dot_dimension_numbers<[1], [0], [0], [1], [0, 0, 1, 1], [], []>} : vector<16x256xf32>, vector<256x128xf32>, vector<16x128xf32> -> vector<16x128xf32>
    %c0_276 = arith.constant 0 : index
    %c0_277 = arith.constant 0 : index
    %c0_278 = arith.constant 0 : index
    %353 = vector.load %arg5[%c0_276, %c0_277, %c0_278] : memref<1x1x128xf32, #tpu.memory_space<vmem>>, vector<1x1x128xf32>
    %354 = vector.shape_cast %353 : vector<1x1x128xf32> to vector<1x128xf32>
    %355 = vector.broadcast %354 : vector<1x128xf32> to vector<16x128xf32>
    %356 = arith.addf %352, %355 : vector<16x128xf32>
    %c1_279 = arith.constant 1 : index
    %c0_280 = arith.constant 0 : index
    %c0_281 = arith.constant 0 : index
    %357 = vector.load %arg12[%c1_279, %c0_280, %c0_281] : memref<2x16x128xf32, #tpu.memory_space<vmem>>, vector<1x16x128xf32>
    %358 = vector.shape_cast %357 : vector<1x16x128xf32> to vector<16x128xf32>
    %359 = arith.negf %356 : vector<16x128xf32>
    %360 = math.exp %359 : vector<16x128xf32>
    %cst_282 = arith.constant 1.000000e+00 : f32
    %361 = vector.broadcast %cst_282 : f32 to vector<16x128xf32>
    %362 = arith.addf %361, %360 : vector<16x128xf32>
    %363 = arith.divf %361, %362 : vector<16x128xf32>
    %364 = math.tanh %356 : vector<16x128xf32>
    %c96_i32_283 = arith.constant 96 : i32
    %365 = tpu.dynamic_rotate %363 by %c96_i32_283 dim 1 : vector<16x128xf32>, i32 -> vector<16x128xf32>
    %c64_i32_284 = arith.constant 64 : i32
    %366 = tpu.dynamic_rotate %364 by %c64_i32_284 dim 1 : vector<16x128xf32>, i32 -> vector<16x128xf32>
    %c32_i32_285 = arith.constant 32 : i32
    %367 = tpu.dynamic_rotate %363 by %c32_i32_285 dim 1 : vector<16x128xf32>, i32 -> vector<16x128xf32>
    %368 = arith.mulf %365, %358 : vector<16x128xf32>
    %369 = arith.mulf %363, %366 : vector<16x128xf32>
    %370 = arith.addf %368, %369 : vector<16x128xf32>
    %371 = math.tanh %370 : vector<16x128xf32>
    %372 = arith.mulf %367, %371 : vector<16x128xf32>
    %c1_286 = arith.constant 1 : index
    %c0_287 = arith.constant 0 : index
    %c0_288 = arith.constant 0 : index
    %373 = vector.load %arg11[%c1_286, %c0_287, %c0_288] : memref<2x16x128xf32, #tpu.memory_space<vmem>>, vector<1x16x128xf32>
    %374 = vector.shape_cast %373 : vector<1x16x128xf32> to vector<16x128xf32>
    %375 = vector.shape_cast %372 : vector<16x128xf32> to vector<1x16x128xf32>
    tpu.vector_store %arg11[%c1_286, %c0_287, %c0_288], %375 {strides = array<i32>} : memref<2x16x128xf32, #tpu.memory_space<vmem>>, vector<1x16x128xf32>,
    %c1_289 = arith.constant 1 : index
    %c0_290 = arith.constant 0 : index
    %c0_291 = arith.constant 0 : index
    %376 = vector.load %arg12[%c1_289, %c0_290, %c0_291] : memref<2x16x128xf32, #tpu.memory_space<vmem>>, vector<1x16x128xf32>
    %377 = vector.shape_cast %376 : vector<1x16x128xf32> to vector<16x128xf32>
    %378 = vector.shape_cast %370 : vector<16x128xf32> to vector<1x16x128xf32>
    tpu.vector_store %arg12[%c1_289, %c0_290, %c0_291], %378 {strides = array<i32>} : memref<2x16x128xf32, #tpu.memory_space<vmem>>, vector<1x16x128xf32>,
    %c1_292 = arith.constant 1 : index
    %c64_293 = arith.constant 64 : index
    %c0_294 = arith.constant 0 : index
    %379 = vector.load %arg10[%c1_292, %c64_293, %c0_294] : memref<2x128x128xf32, #tpu.memory_space<vmem>>, vector<1x16x128xf32>
    %380 = vector.shape_cast %379 : vector<1x16x128xf32> to vector<16x128xf32>
    %381 = vector.shape_cast %372 : vector<16x128xf32> to vector<1x16x128xf32>
    tpu.vector_store %arg10[%c1_292, %c64_293, %c0_294], %381 {strides = array<i32>} : memref<2x128x128xf32, #tpu.memory_space<vmem>>, vector<1x16x128xf32>,
    %c96 = arith.constant 96 : index
    %c0_295 = arith.constant 0 : index
    %382 = vector.load %arg9[%c96, %c0_295] : memref<128x128xf32, #tpu.memory_space<vmem>>, vector<16x128xf32>
    %c0_296 = arith.constant 0 : index
    %c0_297 = arith.constant 0 : index
    %c0_298 = arith.constant 0 : index
    %383 = vector.load %arg11[%c0_296, %c0_297, %c0_298] : memref<2x16x128xf32, #tpu.memory_space<vmem>>, vector<1x16x128xf32>
    %384 = vector.shape_cast %383 : vector<1x16x128xf32> to vector<16x128xf32>
    %c0_299 = arith.constant 0 : index
    %c0_300 = arith.constant 0 : index
    %385 = vector.load %arg2[%c0_299, %c0_300] : memref<128x128xf32, #tpu.memory_space<vmem>>, vector<128x128xf32>
    %cst_301 = arith.constant dense<0.000000e+00> : vector<16x128xf32>
    %386 = tpu.matmul %384, %385, %cst_301 {dimension_numbers = #tpu.dot_dimension_numbers<[1], [0], [0], [1], [0, 0, 1, 1], [], []>} : vector<16x128xf32>, vector<128x128xf32>, vector<16x128xf32> -> vector<16x128xf32>
    %387 = arith.addf %382, %386 : vector<16x128xf32>
    %c0_302 = arith.constant 0 : index
    %c0_303 = arith.constant 0 : index
    %c0_304 = arith.constant 0 : index
    %388 = vector.load %arg12[%c0_302, %c0_303, %c0_304] : memref<2x16x128xf32, #tpu.memory_space<vmem>>, vector<1x16x128xf32>
    %389 = vector.shape_cast %388 : vector<1x16x128xf32> to vector<16x128xf32>
    %390 = arith.negf %387 : vector<16x128xf32>
    %391 = math.exp %390 : vector<16x128xf32>
    %cst_305 = arith.constant 1.000000e+00 : f32
    %392 = vector.broadcast %cst_305 : f32 to vector<16x128xf32>
    %393 = arith.addf %392, %391 : vector<16x128xf32>
    %394 = arith.divf %392, %393 : vector<16x128xf32>
    %395 = math.tanh %387 : vector<16x128xf32>
    %c96_i32_306 = arith.constant 96 : i32
    %396 = tpu.dynamic_rotate %394 by %c96_i32_306 dim 1 : vector<16x128xf32>, i32 -> vector<16x128xf32>
    %c64_i32_307 = arith.constant 64 : i32
    %397 = tpu.dynamic_rotate %395 by %c64_i32_307 dim 1 : vector<16x128xf32>, i32 -> vector<16x128xf32>
    %c32_i32_308 = arith.constant 32 : i32
    %398 = tpu.dynamic_rotate %394 by %c32_i32_308 dim 1 : vector<16x128xf32>, i32 -> vector<16x128xf32>
    %399 = arith.mulf %396, %389 : vector<16x128xf32>
    %400 = arith.mulf %394, %397 : vector<16x128xf32>
    %401 = arith.addf %399, %400 : vector<16x128xf32>
    %402 = math.tanh %401 : vector<16x128xf32>
    %403 = arith.mulf %398, %402 : vector<16x128xf32>
    %c0_309 = arith.constant 0 : index
    %c0_310 = arith.constant 0 : index
    %c0_311 = arith.constant 0 : index
    %404 = vector.load %arg11[%c0_309, %c0_310, %c0_311] : memref<2x16x128xf32, #tpu.memory_space<vmem>>, vector<1x16x128xf32>
    %405 = vector.shape_cast %404 : vector<1x16x128xf32> to vector<16x128xf32>
    %406 = vector.shape_cast %403 : vector<16x128xf32> to vector<1x16x128xf32>
    tpu.vector_store %arg11[%c0_309, %c0_310, %c0_311], %406 {strides = array<i32>} : memref<2x16x128xf32, #tpu.memory_space<vmem>>, vector<1x16x128xf32>,
    %c0_312 = arith.constant 0 : index
    %c0_313 = arith.constant 0 : index
    %c0_314 = arith.constant 0 : index
    %407 = vector.load %arg12[%c0_312, %c0_313, %c0_314] : memref<2x16x128xf32, #tpu.memory_space<vmem>>, vector<1x16x128xf32>
    %408 = vector.shape_cast %407 : vector<1x16x128xf32> to vector<16x128xf32>
    %409 = vector.shape_cast %401 : vector<16x128xf32> to vector<1x16x128xf32>
    tpu.vector_store %arg12[%c0_312, %c0_313, %c0_314], %409 {strides = array<i32>} : memref<2x16x128xf32, #tpu.memory_space<vmem>>, vector<1x16x128xf32>,
    %c0_315 = arith.constant 0 : index
    %c96_316 = arith.constant 96 : index
    %c0_317 = arith.constant 0 : index
    %410 = vector.load %arg10[%c0_315, %c96_316, %c0_317] : memref<2x128x128xf32, #tpu.memory_space<vmem>>, vector<1x16x128xf32>
    %411 = vector.shape_cast %410 : vector<1x16x128xf32> to vector<16x128xf32>
    %412 = vector.shape_cast %403 : vector<16x128xf32> to vector<1x16x128xf32>
    tpu.vector_store %arg10[%c0_315, %c96_316, %c0_317], %412 {strides = array<i32>} : memref<2x128x128xf32, #tpu.memory_space<vmem>>, vector<1x16x128xf32>,
    %c0_318 = arith.constant 0 : index
    %c80_319 = arith.constant 80 : index
    %c0_320 = arith.constant 0 : index
    %413 = vector.load %arg10[%c0_318, %c80_319, %c0_320] : memref<2x128x128xf32, #tpu.memory_space<vmem>>, vector<1x16x128xf32>
    %414 = vector.shape_cast %413 : vector<1x16x128xf32> to vector<16x128xf32>
    %c1_321 = arith.constant 1 : index
    %c0_322 = arith.constant 0 : index
    %c0_323 = arith.constant 0 : index
    %415 = vector.load %arg11[%c1_321, %c0_322, %c0_323] : memref<2x16x128xf32, #tpu.memory_space<vmem>>, vector<1x16x128xf32>
    %416 = vector.shape_cast %415 : vector<1x16x128xf32> to vector<16x128xf32>
    %417 = tpu.concatenate %414, %416 in 1 : vector<16x128xf32>, vector<16x128xf32> -> vector<16x256xf32>
    %c0_324 = arith.constant 0 : index
    %c0_325 = arith.constant 0 : index
    %c0_326 = arith.constant 0 : index
    %418 = vector.load %arg4[%c0_324, %c0_325, %c0_326] : memref<1x256x128xf32, #tpu.memory_space<vmem>>, vector<1x256x128xf32>
    %419 = vector.shape_cast %418 : vector<1x256x128xf32> to vector<256x128xf32>
    %cst_327 = arith.constant dense<0.000000e+00> : vector<16x128xf32>
    %420 = tpu.matmul %417, %419, %cst_327 {dimension_numbers = #tpu.dot_dimension_numbers<[1], [0], [0], [1], [0, 0, 1, 1], [], []>} : vector<16x256xf32>, vector<256x128xf32>, vector<16x128xf32> -> vector<16x128xf32>
    %c0_328 = arith.constant 0 : index
    %c0_329 = arith.constant 0 : index
    %c0_330 = arith.constant 0 : index
    %421 = vector.load %arg5[%c0_328, %c0_329, %c0_330] : memref<1x1x128xf32, #tpu.memory_space<vmem>>, vector<1x1x128xf32>
    %422 = vector.shape_cast %421 : vector<1x1x128xf32> to vector<1x128xf32>
    %423 = vector.broadcast %422 : vector<1x128xf32> to vector<16x128xf32>
    %424 = arith.addf %420, %423 : vector<16x128xf32>
    %c1_331 = arith.constant 1 : index
    %c0_332 = arith.constant 0 : index
    %c0_333 = arith.constant 0 : index
    %425 = vector.load %arg12[%c1_331, %c0_332, %c0_333] : memref<2x16x128xf32, #tpu.memory_space<vmem>>, vector<1x16x128xf32>
    %426 = vector.shape_cast %425 : vector<1x16x128xf32> to vector<16x128xf32>
    %427 = arith.negf %424 : vector<16x128xf32>
    %428 = math.exp %427 : vector<16x128xf32>
    %cst_334 = arith.constant 1.000000e+00 : f32
    %429 = vector.broadcast %cst_334 : f32 to vector<16x128xf32>
    %430 = arith.addf %429, %428 : vector<16x128xf32>
    %431 = arith.divf %429, %430 : vector<16x128xf32>
    %432 = math.tanh %424 : vector<16x128xf32>
    %c96_i32_335 = arith.constant 96 : i32
    %433 = tpu.dynamic_rotate %431 by %c96_i32_335 dim 1 : vector<16x128xf32>, i32 -> vector<16x128xf32>
    %c64_i32_336 = arith.constant 64 : i32
    %434 = tpu.dynamic_rotate %432 by %c64_i32_336 dim 1 : vector<16x128xf32>, i32 -> vector<16x128xf32>
    %c32_i32_337 = arith.constant 32 : i32
    %435 = tpu.dynamic_rotate %431 by %c32_i32_337 dim 1 : vector<16x128xf32>, i32 -> vector<16x128xf32>
    %436 = arith.mulf %433, %426 : vector<16x128xf32>
    %437 = arith.mulf %431, %434 : vector<16x128xf32>
    %438 = arith.addf %436, %437 : vector<16x128xf32>
    %439 = math.tanh %438 : vector<16x128xf32>
    %440 = arith.mulf %435, %439 : vector<16x128xf32>
    %c1_338 = arith.constant 1 : index
    %c0_339 = arith.constant 0 : index
    %c0_340 = arith.constant 0 : index
    %441 = vector.load %arg11[%c1_338, %c0_339, %c0_340] : memref<2x16x128xf32, #tpu.memory_space<vmem>>, vector<1x16x128xf32>
    %442 = vector.shape_cast %441 : vector<1x16x128xf32> to vector<16x128xf32>
    %443 = vector.shape_cast %440 : vector<16x128xf32> to vector<1x16x128xf32>
    tpu.vector_store %arg11[%c1_338, %c0_339, %c0_340], %443 {strides = array<i32>} : memref<2x16x128xf32, #tpu.memory_space<vmem>>, vector<1x16x128xf32>,
    %c1_341 = arith.constant 1 : index
    %c0_342 = arith.constant 0 : index
    %c0_343 = arith.constant 0 : index
    %444 = vector.load %arg12[%c1_341, %c0_342, %c0_343] : memref<2x16x128xf32, #tpu.memory_space<vmem>>, vector<1x16x128xf32>
    %445 = vector.shape_cast %444 : vector<1x16x128xf32> to vector<16x128xf32>
    %446 = vector.shape_cast %438 : vector<16x128xf32> to vector<1x16x128xf32>
    tpu.vector_store %arg12[%c1_341, %c0_342, %c0_343], %446 {strides = array<i32>} : memref<2x16x128xf32, #tpu.memory_space<vmem>>, vector<1x16x128xf32>,
    %c1_344 = arith.constant 1 : index
    %c80_345 = arith.constant 80 : index
    %c0_346 = arith.constant 0 : index
    %447 = vector.load %arg10[%c1_344, %c80_345, %c0_346] : memref<2x128x128xf32, #tpu.memory_space<vmem>>, vector<1x16x128xf32>
    %448 = vector.shape_cast %447 : vector<1x16x128xf32> to vector<16x128xf32>
    %449 = vector.shape_cast %440 : vector<16x128xf32> to vector<1x16x128xf32>
    tpu.vector_store %arg10[%c1_344, %c80_345, %c0_346], %449 {strides = array<i32>} : memref<2x128x128xf32, #tpu.memory_space<vmem>>, vector<1x16x128xf32>,
    %c112 = arith.constant 112 : index
    %c0_347 = arith.constant 0 : index
    %450 = vector.load %arg9[%c112, %c0_347] : memref<128x128xf32, #tpu.memory_space<vmem>>, vector<16x128xf32>
    %c0_348 = arith.constant 0 : index
    %c0_349 = arith.constant 0 : index
    %c0_350 = arith.constant 0 : index
    %451 = vector.load %arg11[%c0_348, %c0_349, %c0_350] : memref<2x16x128xf32, #tpu.memory_space<vmem>>, vector<1x16x128xf32>
    %452 = vector.shape_cast %451 : vector<1x16x128xf32> to vector<16x128xf32>
    %c0_351 = arith.constant 0 : index
    %c0_352 = arith.constant 0 : index
    %453 = vector.load %arg2[%c0_351, %c0_352] : memref<128x128xf32, #tpu.memory_space<vmem>>, vector<128x128xf32>
    %cst_353 = arith.constant dense<0.000000e+00> : vector<16x128xf32>
    %454 = tpu.matmul %452, %453, %cst_353 {dimension_numbers = #tpu.dot_dimension_numbers<[1], [0], [0], [1], [0, 0, 1, 1], [], []>} : vector<16x128xf32>, vector<128x128xf32>, vector<16x128xf32> -> vector<16x128xf32>
    %455 = arith.addf %450, %454 : vector<16x128xf32>
    %c0_354 = arith.constant 0 : index
    %c0_355 = arith.constant 0 : index
    %c0_356 = arith.constant 0 : index
    %456 = vector.load %arg12[%c0_354, %c0_355, %c0_356] : memref<2x16x128xf32, #tpu.memory_space<vmem>>, vector<1x16x128xf32>
    %457 = vector.shape_cast %456 : vector<1x16x128xf32> to vector<16x128xf32>
    %458 = arith.negf %455 : vector<16x128xf32>
    %459 = math.exp %458 : vector<16x128xf32>
    %cst_357 = arith.constant 1.000000e+00 : f32
    %460 = vector.broadcast %cst_357 : f32 to vector<16x128xf32>
    %461 = arith.addf %460, %459 : vector<16x128xf32>
    %462 = arith.divf %460, %461 : vector<16x128xf32>
    %463 = math.tanh %455 : vector<16x128xf32>
    %c96_i32_358 = arith.constant 96 : i32
    %464 = tpu.dynamic_rotate %462 by %c96_i32_358 dim 1 : vector<16x128xf32>, i32 -> vector<16x128xf32>
    %c64_i32_359 = arith.constant 64 : i32
    %465 = tpu.dynamic_rotate %463 by %c64_i32_359 dim 1 : vector<16x128xf32>, i32 -> vector<16x128xf32>
    %c32_i32_360 = arith.constant 32 : i32
    %466 = tpu.dynamic_rotate %462 by %c32_i32_360 dim 1 : vector<16x128xf32>, i32 -> vector<16x128xf32>
    %467 = arith.mulf %464, %457 : vector<16x128xf32>
    %468 = arith.mulf %462, %465 : vector<16x128xf32>
    %469 = arith.addf %467, %468 : vector<16x128xf32>
    %470 = math.tanh %469 : vector<16x128xf32>
    %471 = arith.mulf %466, %470 : vector<16x128xf32>
    %c0_361 = arith.constant 0 : index
    %c0_362 = arith.constant 0 : index
    %c0_363 = arith.constant 0 : index
    %472 = vector.load %arg11[%c0_361, %c0_362, %c0_363] : memref<2x16x128xf32, #tpu.memory_space<vmem>>, vector<1x16x128xf32>
    %473 = vector.shape_cast %472 : vector<1x16x128xf32> to vector<16x128xf32>
    %474 = vector.shape_cast %471 : vector<16x128xf32> to vector<1x16x128xf32>
    tpu.vector_store %arg11[%c0_361, %c0_362, %c0_363], %474 {strides = array<i32>} : memref<2x16x128xf32, #tpu.memory_space<vmem>>, vector<1x16x128xf32>,
    %c0_364 = arith.constant 0 : index
    %c0_365 = arith.constant 0 : index
    %c0_366 = arith.constant 0 : index
    %475 = vector.load %arg12[%c0_364, %c0_365, %c0_366] : memref<2x16x128xf32, #tpu.memory_space<vmem>>, vector<1x16x128xf32>
    %476 = vector.shape_cast %475 : vector<1x16x128xf32> to vector<16x128xf32>
    %477 = vector.shape_cast %469 : vector<16x128xf32> to vector<1x16x128xf32>
    tpu.vector_store %arg12[%c0_364, %c0_365, %c0_366], %477 {strides = array<i32>} : memref<2x16x128xf32, #tpu.memory_space<vmem>>, vector<1x16x128xf32>,
    %c0_367 = arith.constant 0 : index
    %c112_368 = arith.constant 112 : index
    %c0_369 = arith.constant 0 : index
    %478 = vector.load %arg10[%c0_367, %c112_368, %c0_369] : memref<2x128x128xf32, #tpu.memory_space<vmem>>, vector<1x16x128xf32>
    %479 = vector.shape_cast %478 : vector<1x16x128xf32> to vector<16x128xf32>
    %480 = vector.shape_cast %471 : vector<16x128xf32> to vector<1x16x128xf32>
    tpu.vector_store %arg10[%c0_367, %c112_368, %c0_369], %480 {strides = array<i32>} : memref<2x128x128xf32, #tpu.memory_space<vmem>>, vector<1x16x128xf32>,
    %c0_370 = arith.constant 0 : index
    %c96_371 = arith.constant 96 : index
    %c0_372 = arith.constant 0 : index
    %481 = vector.load %arg10[%c0_370, %c96_371, %c0_372] : memref<2x128x128xf32, #tpu.memory_space<vmem>>, vector<1x16x128xf32>
    %482 = vector.shape_cast %481 : vector<1x16x128xf32> to vector<16x128xf32>
    %c1_373 = arith.constant 1 : index
    %c0_374 = arith.constant 0 : index
    %c0_375 = arith.constant 0 : index
    %483 = vector.load %arg11[%c1_373, %c0_374, %c0_375] : memref<2x16x128xf32, #tpu.memory_space<vmem>>, vector<1x16x128xf32>
    %484 = vector.shape_cast %483 : vector<1x16x128xf32> to vector<16x128xf32>
    %485 = tpu.concatenate %482, %484 in 1 : vector<16x128xf32>, vector<16x128xf32> -> vector<16x256xf32>
    %c0_376 = arith.constant 0 : index
    %c0_377 = arith.constant 0 : index
    %c0_378 = arith.constant 0 : index
    %486 = vector.load %arg4[%c0_376, %c0_377, %c0_378] : memref<1x256x128xf32, #tpu.memory_space<vmem>>, vector<1x256x128xf32>
    %487 = vector.shape_cast %486 : vector<1x256x128xf32> to vector<256x128xf32>
    %cst_379 = arith.constant dense<0.000000e+00> : vector<16x128xf32>
    %488 = tpu.matmul %485, %487, %cst_379 {dimension_numbers = #tpu.dot_dimension_numbers<[1], [0], [0], [1], [0, 0, 1, 1], [], []>} : vector<16x256xf32>, vector<256x128xf32>, vector<16x128xf32> -> vector<16x128xf32>
    %c0_380 = arith.constant 0 : index
    %c0_381 = arith.constant 0 : index
    %c0_382 = arith.constant 0 : index
    %489 = vector.load %arg5[%c0_380, %c0_381, %c0_382] : memref<1x1x128xf32, #tpu.memory_space<vmem>>, vector<1x1x128xf32>
    %490 = vector.shape_cast %489 : vector<1x1x128xf32> to vector<1x128xf32>
    %491 = vector.broadcast %490 : vector<1x128xf32> to vector<16x128xf32>
    %492 = arith.addf %488, %491 : vector<16x128xf32>
    %c1_383 = arith.constant 1 : index
    %c0_384 = arith.constant 0 : index
    %c0_385 = arith.constant 0 : index
    %493 = vector.load %arg12[%c1_383, %c0_384, %c0_385] : memref<2x16x128xf32, #tpu.memory_space<vmem>>, vector<1x16x128xf32>
    %494 = vector.shape_cast %493 : vector<1x16x128xf32> to vector<16x128xf32>
    %495 = arith.negf %492 : vector<16x128xf32>
    %496 = math.exp %495 : vector<16x128xf32>
    %cst_386 = arith.constant 1.000000e+00 : f32
    %497 = vector.broadcast %cst_386 : f32 to vector<16x128xf32>
    %498 = arith.addf %497, %496 : vector<16x128xf32>
    %499 = arith.divf %497, %498 : vector<16x128xf32>
    %500 = math.tanh %492 : vector<16x128xf32>
    %c96_i32_387 = arith.constant 96 : i32
    %501 = tpu.dynamic_rotate %499 by %c96_i32_387 dim 1 : vector<16x128xf32>, i32 -> vector<16x128xf32>
    %c64_i32_388 = arith.constant 64 : i32
    %502 = tpu.dynamic_rotate %500 by %c64_i32_388 dim 1 : vector<16x128xf32>, i32 -> vector<16x128xf32>
    %c32_i32_389 = arith.constant 32 : i32
    %503 = tpu.dynamic_rotate %499 by %c32_i32_389 dim 1 : vector<16x128xf32>, i32 -> vector<16x128xf32>
    %504 = arith.mulf %501, %494 : vector<16x128xf32>
    %505 = arith.mulf %499, %502 : vector<16x128xf32>
    %506 = arith.addf %504, %505 : vector<16x128xf32>
    %507 = math.tanh %506 : vector<16x128xf32>
    %508 = arith.mulf %503, %507 : vector<16x128xf32>
    %c1_390 = arith.constant 1 : index
    %c0_391 = arith.constant 0 : index
    %c0_392 = arith.constant 0 : index
    %509 = vector.load %arg11[%c1_390, %c0_391, %c0_392] : memref<2x16x128xf32, #tpu.memory_space<vmem>>, vector<1x16x128xf32>
    %510 = vector.shape_cast %509 : vector<1x16x128xf32> to vector<16x128xf32>
    %511 = vector.shape_cast %508 : vector<16x128xf32> to vector<1x16x128xf32>
    tpu.vector_store %arg11[%c1_390, %c0_391, %c0_392], %511 {strides = array<i32>} : memref<2x16x128xf32, #tpu.memory_space<vmem>>, vector<1x16x128xf32>,
    %c1_393 = arith.constant 1 : index
    %c0_394 = arith.constant 0 : index
    %c0_395 = arith.constant 0 : index
    %512 = vector.load %arg12[%c1_393, %c0_394, %c0_395] : memref<2x16x128xf32, #tpu.memory_space<vmem>>, vector<1x16x128xf32>
    %513 = vector.shape_cast %512 : vector<1x16x128xf32> to vector<16x128xf32>
    %514 = vector.shape_cast %506 : vector<16x128xf32> to vector<1x16x128xf32>
    tpu.vector_store %arg12[%c1_393, %c0_394, %c0_395], %514 {strides = array<i32>} : memref<2x16x128xf32, #tpu.memory_space<vmem>>, vector<1x16x128xf32>,
    %c1_396 = arith.constant 1 : index
    %c96_397 = arith.constant 96 : index
    %c0_398 = arith.constant 0 : index
    %515 = vector.load %arg10[%c1_396, %c96_397, %c0_398] : memref<2x128x128xf32, #tpu.memory_space<vmem>>, vector<1x16x128xf32>
    %516 = vector.shape_cast %515 : vector<1x16x128xf32> to vector<16x128xf32>
    %517 = vector.shape_cast %508 : vector<16x128xf32> to vector<1x16x128xf32>
    tpu.vector_store %arg10[%c1_396, %c96_397, %c0_398], %517 {strides = array<i32>} : memref<2x128x128xf32, #tpu.memory_space<vmem>>, vector<1x16x128xf32>,
    %c0_399 = arith.constant 0 : index
    %c112_400 = arith.constant 112 : index
    %c0_401 = arith.constant 0 : index
    %518 = vector.load %arg10[%c0_399, %c112_400, %c0_401] : memref<2x128x128xf32, #tpu.memory_space<vmem>>, vector<1x16x128xf32>
    %519 = vector.shape_cast %518 : vector<1x16x128xf32> to vector<16x128xf32>
    %c1_402 = arith.constant 1 : index
    %c0_403 = arith.constant 0 : index
    %c0_404 = arith.constant 0 : index
    %520 = vector.load %arg11[%c1_402, %c0_403, %c0_404] : memref<2x16x128xf32, #tpu.memory_space<vmem>>, vector<1x16x128xf32>
    %521 = vector.shape_cast %520 : vector<1x16x128xf32> to vector<16x128xf32>
    %522 = tpu.concatenate %519, %521 in 1 : vector<16x128xf32>, vector<16x128xf32> -> vector<16x256xf32>
    %c0_405 = arith.constant 0 : index
    %c0_406 = arith.constant 0 : index
    %c0_407 = arith.constant 0 : index
    %523 = vector.load %arg4[%c0_405, %c0_406, %c0_407] : memref<1x256x128xf32, #tpu.memory_space<vmem>>, vector<1x256x128xf32>
    %524 = vector.shape_cast %523 : vector<1x256x128xf32> to vector<256x128xf32>
    %cst_408 = arith.constant dense<0.000000e+00> : vector<16x128xf32>
    %525 = tpu.matmul %522, %524, %cst_408 {dimension_numbers = #tpu.dot_dimension_numbers<[1], [0], [0], [1], [0, 0, 1, 1], [], []>} : vector<16x256xf32>, vector<256x128xf32>, vector<16x128xf32> -> vector<16x128xf32>
    %c0_409 = arith.constant 0 : index
    %c0_410 = arith.constant 0 : index
    %c0_411 = arith.constant 0 : index
    %526 = vector.load %arg5[%c0_409, %c0_410, %c0_411] : memref<1x1x128xf32, #tpu.memory_space<vmem>>, vector<1x1x128xf32>
    %527 = vector.shape_cast %526 : vector<1x1x128xf32> to vector<1x128xf32>
    %528 = vector.broadcast %527 : vector<1x128xf32> to vector<16x128xf32>
    %529 = arith.addf %525, %528 : vector<16x128xf32>
    %c1_412 = arith.constant 1 : index
    %c0_413 = arith.constant 0 : index
    %c0_414 = arith.constant 0 : index
    %530 = vector.load %arg12[%c1_412, %c0_413, %c0_414] : memref<2x16x128xf32, #tpu.memory_space<vmem>>, vector<1x16x128xf32>
    %531 = vector.shape_cast %530 : vector<1x16x128xf32> to vector<16x128xf32>
    %532 = arith.negf %529 : vector<16x128xf32>
    %533 = math.exp %532 : vector<16x128xf32>
    %cst_415 = arith.constant 1.000000e+00 : f32
    %534 = vector.broadcast %cst_415 : f32 to vector<16x128xf32>
    %535 = arith.addf %534, %533 : vector<16x128xf32>
    %536 = arith.divf %534, %535 : vector<16x128xf32>
    %537 = math.tanh %529 : vector<16x128xf32>
    %c96_i32_416 = arith.constant 96 : i32
    %538 = tpu.dynamic_rotate %536 by %c96_i32_416 dim 1 : vector<16x128xf32>, i32 -> vector<16x128xf32>
    %c64_i32_417 = arith.constant 64 : i32
    %539 = tpu.dynamic_rotate %537 by %c64_i32_417 dim 1 : vector<16x128xf32>, i32 -> vector<16x128xf32>
    %c32_i32_418 = arith.constant 32 : i32
    %540 = tpu.dynamic_rotate %536 by %c32_i32_418 dim 1 : vector<16x128xf32>, i32 -> vector<16x128xf32>
    %541 = arith.mulf %538, %531 : vector<16x128xf32>
    %542 = arith.mulf %536, %539 : vector<16x128xf32>
    %543 = arith.addf %541, %542 : vector<16x128xf32>
    %544 = math.tanh %543 : vector<16x128xf32>
    %545 = arith.mulf %540, %544 : vector<16x128xf32>
    %c1_419 = arith.constant 1 : index
    %c0_420 = arith.constant 0 : index
    %c0_421 = arith.constant 0 : index
    %546 = vector.load %arg11[%c1_419, %c0_420, %c0_421] : memref<2x16x128xf32, #tpu.memory_space<vmem>>, vector<1x16x128xf32>
    %547 = vector.shape_cast %546 : vector<1x16x128xf32> to vector<16x128xf32>
    %548 = vector.shape_cast %545 : vector<16x128xf32> to vector<1x16x128xf32>
    tpu.vector_store %arg11[%c1_419, %c0_420, %c0_421], %548 {strides = array<i32>} : memref<2x16x128xf32, #tpu.memory_space<vmem>>, vector<1x16x128xf32>,
    %c1_422 = arith.constant 1 : index
    %c0_423 = arith.constant 0 : index
    %c0_424 = arith.constant 0 : index
    %549 = vector.load %arg12[%c1_422, %c0_423, %c0_424] : memref<2x16x128xf32, #tpu.memory_space<vmem>>, vector<1x16x128xf32>
    %550 = vector.shape_cast %549 : vector<1x16x128xf32> to vector<16x128xf32>
    %551 = vector.shape_cast %543 : vector<16x128xf32> to vector<1x16x128xf32>
    tpu.vector_store %arg12[%c1_422, %c0_423, %c0_424], %551 {strides = array<i32>} : memref<2x16x128xf32, #tpu.memory_space<vmem>>, vector<1x16x128xf32>,
    %c1_425 = arith.constant 1 : index
    %c112_426 = arith.constant 112 : index
    %c0_427 = arith.constant 0 : index
    %552 = vector.load %arg10[%c1_425, %c112_426, %c0_427] : memref<2x128x128xf32, #tpu.memory_space<vmem>>, vector<1x16x128xf32>
    %553 = vector.shape_cast %552 : vector<1x16x128xf32> to vector<16x128xf32>
    %554 = vector.shape_cast %545 : vector<16x128xf32> to vector<1x16x128xf32>
    tpu.vector_store %arg10[%c1_425, %c112_426, %c0_427], %554 {strides = array<i32>} : memref<2x128x128xf32, #tpu.memory_space<vmem>>, vector<1x16x128xf32>,
    %c1_428 = arith.constant 1 : index
    %c0_429 = arith.constant 0 : index
    %c0_430 = arith.constant 0 : index
    %555 = vector.load %arg10[%c1_428, %c0_429, %c0_430] : memref<2x128x128xf32, #tpu.memory_space<vmem>>, vector<1x128x128xf32>
    %556 = vector.shape_cast %555 : vector<1x128x128xf32> to vector<128x128xf32>
    %c0_431 = arith.constant 0 : index
    %c0_432 = arith.constant 0 : index
    %557 = vector.load %arg6[%c0_431, %c0_432] : memref<128x128xf32, #tpu.memory_space<vmem>>, vector<128x128xf32>
    %cst_433 = arith.constant dense<0.000000e+00> : vector<128x128xf32>
    %558 = tpu.matmul %556, %557, %cst_433 {dimension_numbers = #tpu.dot_dimension_numbers<[1], [0], [0], [1], [0, 0, 1, 1], [], []>} : vector<128x128xf32>, vector<128x128xf32>, vector<128x128xf32> -> vector<128x128xf32>
    %c0_434 = arith.constant 0 : index
    %c0_435 = arith.constant 0 : index
    %559 = vector.load %arg7[%c0_434, %c0_435] : memref<1x128xf32, #tpu.memory_space<vmem>>, vector<1x128xf32>
    %560 = vector.broadcast %559 : vector<1x128xf32> to vector<128x128xf32>
    %561 = arith.addf %558, %560 : vector<128x128xf32>
    %c0_436 = arith.constant 0 : index
    %c0_437 = arith.constant 0 : index
    %562 = vector.load %arg8[%c0_436, %c0_437] : memref<128x128xf32, #tpu.memory_space<vmem>>, vector<128x128xf32>
    tpu.vector_store %arg8[%c0_436, %c0_437], %561 {strides = array<i32>} : memref<128x128xf32, #tpu.memory_space<vmem>>, vector<128x128xf32>,
    return
  }
}

</mosaic_0001>

<bundles_post_ra>
// kernel: _decoder_forward_jit.1
= control target key start
LH: loop header
LB: loop body
LE: loop exit
PB: predicated region body
PF: predicated region fallthrough
CT: control target
= control target key end

     0   :  { %v4683_v3 = vmov 0.0   ;;  %s4684_s19 = smov 96   ;;  %s4685_s27 = smov 64   ;;  %s6062_s1 = inlined_call_operand.vmem [shape: f32[128,128], index: 1, kind: input, shape index: {}]   ;;  %s6063_s0 = inlined_call_operand.vmem [shape: f32[128,128], index: 0, kind: input, shape index: {}]   ;;  %s6064_s2 = inlined_call_operand.vmem [shape: f32[128,128], index: 2, kind: input, shape index: {}]   ;;  %s6065_s4 = inlined_call_operand.vmem [shape: f32[1,256,128], index: 4, kind: input, shape index: {}]   ;;  %s6066_s3 = inlined_call_operand.vmem [shape: f32[1,128], index: 3, kind: input, shape index: {}]   ;;  %s6067_s5 = inlined_call_operand.vmem [shape: f32[1,1,128], index: 5, kind: input, shape index: {}]   ;;  %s6068_s6 = inlined_call_operand.vmem [shape: f32[128,128], index: 6, kind: input, shape index: {}]   ;;  %s6069_s7 = inlined_call_operand.vmem [shape: f32[1,128], index: 7, kind: input, shape index: {}]   ;;  %s6070_s8 = inlined_call_operand.vmem [shape: f32[128,128], index: 8, kind: output, shape index: {}]  }
   0x1   :  { %v45_v0 = vld [vmem:[%s6062_s1] sm:$0xff]  ;;  %v46_v1 = vld [vmem:[%s6062_s1 + $0x8] sm:$0xff]  ;;  %v47_v2 = vld [vmem:[%s6062_s1 + $0x10] sm:$0xff]  ;;  %627 = vmatprep.mubr.f32.mxu1 %v4683_v3  ;;  %s4686_s28 = smov 32  }
   0x2   :  { %v3814_v4 = vpack.c.bf16 %v46_v1, %v45_v0  ;;  %v48_v5 = vld [vmem:[%s6062_s1 + $0x18] sm:$0xff]  ;;  %v49_v7 = vld [vmem:[%s6062_s1 + $0x20] sm:$0xff]  ;;  %v50_v8 = vld [vmem:[%s6062_s1 + $0x28] sm:$0xff] }
   0x3   :  { %v3818_v6 = vpack.c.bf16 %v48_v5, %v47_v2  ;;  %v3822_v9 = vpack.c.bf16 %v50_v8, %v49_v7  ;;  %v29_v10 = vld [vmem:[%s6063_s0] sm:$0xff]  ;;  %v51_v11 = vld [vmem:[%s6062_s1 + $0x30] sm:$0xff]  ;;  %v52_v12 = vld [vmem:[%s6062_s1 + $0x38] sm:$0xff] }
   0x4   :  { %3815 = vmatprep.subr.bf16.mxu0 %v3814_v4  ;;  %3454 = vmatprep.mubr.f32.mxu0 %v29_v10  ;;  %v3826_v13 = vpack.c.bf16 %v52_v12, %v51_v11  ;;  %v53_v14 = vld [vmem:[%s6062_s1 + $0x40] sm:$0xff]  ;;  %v54_v15 = vld [vmem:[%s6062_s1 + $0x48] sm:$0xff]  ;;  %v55_v17 = vld [vmem:[%s6062_s1 + $0x50] sm:$0xff] }
   0x5   :  { %3817 = vmatpush3.bf16.msra.mxu0 %v3814_v4  ;;  %v3830_v16 = vpack.c.bf16 %v54_v15, %v53_v14  ;;  %v56_v18 = vld [vmem:[%s6062_s1 + $0x58] sm:$0xff]  ;;  %v57_v20 = vld [vmem:[%s6062_s1 + $0x60] sm:$0xff]  ;;  %v58_v21 = vld [vmem:[%s6062_s1 + $0x68] sm:$0xff] }
   0x6   :  { %3819 = vmatprep.subr.bf16.mxu0 %v3818_v6  ;;  %v3834_v19 = vpack.c.bf16 %v56_v18, %v55_v17  ;;  %v3838_v22 = vpack.c.bf16 %v58_v21, %v57_v20  ;;  %v59_v23 = vld [vmem:[%s6062_s1 + $0x70] sm:$0xff]  ;;  %v60_v24 = vld [vmem:[%s6062_s1 + $0x78] sm:$0xff]  ;;  %v241_v26 = vld [vmem:[%s6064_s2] sm:$0xff] }
   0x7   :  { %v3842_v25 = vpack.c.bf16 %v60_v24, %v59_v23  ;;  %v242_v27 = vld [vmem:[%s6064_s2 + $0x8] sm:$0xff]  ;;  %v243_v29 = vld [vmem:[%s6064_s2 + $0x10] sm:$0xff]  ;;  %v244_v30 = vld [vmem:[%s6064_s2 + $0x18] sm:$0xff] }
   0x8   :  { %v4790_v28 = vpack.c.bf16 %v242_v27, %v241_v26  ;;  %v30_v31 = vld [vmem:[%s6063_s0 + $0x8] sm:$0xff]  ;;  %v31_v32 = vld [vmem:[%s6063_s0 + $0x10] sm:$0xff]  ;;  %v4805_v33 = vpack.c.bf16 %v244_v30, %v243_v29  ;;  %v245_v34 = vld [vmem:[%s6064_s2 + $0x20] sm:$0xff] }
   0x9   :  { %3821 = vmatpush3.bf16.msra.mxu0 %v3818_v6  ;;  %v246_v35 = vld [vmem:[%s6064_s2 + $0x28] sm:$0xff]  ;;  %v32_v36 = vld [vmem:[%s6063_s0 + $0x18] sm:$0xff]  ;;  %v33_v37 = vld [vmem:[%s6063_s0 + $0x20] sm:$0xff] }
   0xa   :  { %3823 = vmatprep.subr.bf16.mxu0 %v3822_v9  ;;  %v4821_v38 = vpack.c.bf16 %v246_v35, %v245_v34  ;;  %v247_v39 = vld [vmem:[%s6064_s2 + $0x30] sm:$0xff]  ;;  %v248_v40 = vld [vmem:[%s6064_s2 + $0x38] sm:$0xff]  ;;  %v34_v41 = vld [vmem:[%s6063_s0 + $0x28] sm:$0xff] }
   0xb   :  { %v35_v42 = vld [vmem:[%s6063_s0 + $0x30] sm:$0xff]  ;;  %v4837_v43 = vpack.c.bf16 %v248_v40, %v247_v39  ;;  %v249_v44 = vld [vmem:[%s6064_s2 + $0x40] sm:$0xff]  ;;  %v250_v45 = vld [vmem:[%s6064_s2 + $0x48] sm:$0xff] }
   0xc   :  { %v36_v46 = vld [vmem:[%s6063_s0 + $0x38] sm:$0xff]  ;;  %v37_v47 = vld [vmem:[%s6063_s0 + $0x40] sm:$0xff]  ;;  %v4853_v48 = vpack.c.bf16 %v250_v45, %v249_v44  ;;  %v251_v49 = vld [vmem:[%s6064_s2 + $0x50] sm:$0xff] }
   0xd   :  { %3825 = vmatpush3.bf16.msra.mxu0 %v3822_v9  ;;  %v252_v50 = vld [vmem:[%s6064_s2 + $0x58] sm:$0xff]  ;;  %v38_v51 = vld [vmem:[%s6063_s0 + $0x48] sm:$0xff]  ;;  %v39_v52 = vld [vmem:[%s6063_s0 + $0x50] sm:$0xff] }
   0xe   :  { %3827 = vmatprep.subr.bf16.mxu0 %v3826_v13  ;;  %v4869_v53 = vpack.c.bf16 %v252_v50, %v251_v49  ;;  %v253_v54 = vld [vmem:[%s6064_s2 + $0x60] sm:$0xff]  ;;  %v254_v55 = vld [vmem:[%s6064_s2 + $0x68] sm:$0xff]  ;;  %v40_v56 = vld [vmem:[%s6063_s0 + $0x58] sm:$0xff] }
   0xf   :  { %v41_v57 = vld [vmem:[%s6063_s0 + $0x60] sm:$0xff]  ;;  %v4885_v58 = vpack.c.bf16 %v254_v55, %v253_v54  ;;  %v255_v59 = vld [vmem:[%s6064_s2 + $0x70] sm:$0xff]  ;;  %v256_v60 = vld [vmem:[%s6064_s2 + $0x78] sm:$0xff] }
  0x10   :  { %v42_v61 = vld [vmem:[%s6063_s0 + $0x68] sm:$0xff]  ;;  %v43_v62 = vld [vmem:[%s6063_s0 + $0x70] sm:$0xff]  ;;  %v4901_v63 = vpack.c.bf16 %v256_v60, %v255_v59  ;;  %v44_v0 = vld [vmem:[%s6063_s0 + $0x78] sm:$0xff] }
  0x11   :  { %3829 = vmatpush3.bf16.msra.mxu0 %v3826_v13  ;;  %v540_v1 = vld [vmem:[%s6065_s4 + $0x80] sm:$0xff]  ;;  %v541_v2 = vld [vmem:[%s6065_s4 + $0x88] sm:$0xff]  ;;  %v542_v7 = vld [vmem:[%s6065_s4 + $0x90] sm:$0xff] }
  0x12   :  { %3831 = vmatprep.subr.bf16.mxu0 %v3830_v16  ;;  %v524_v4 = vld [vmem:[%s6065_s4] sm:$0xff]  ;;  %v4937_v5 = vpack.c.bf16 %v541_v2, %v540_v1  ;;  %v525_v6 = vld [vmem:[%s6065_s4 + $0x8] sm:$0xff]  ;;  %v543_v8 = vld [vmem:[%s6065_s4 + $0x98] sm:$0xff] }
  0x13   :  { %v4948_v9 = vpack.c.bf16 %v525_v6, %v524_v4  ;;  %v4950_v10 = vpack.c.bf16 %v543_v8, %v542_v7  ;;  %v526_v11 = vld [vmem:[%s6065_s4 + $0x10] sm:$0xff]  ;;  %v527_v12 = vld [vmem:[%s6065_s4 + $0x18] sm:$0xff]  ;;  %v544_v13 = vld [vmem:[%s6065_s4 + $0xa0] sm:$0xff] }
  0x14   :  { %3911 = vmatprep.subr.bf16.mxu1 %v4937_v5  ;;  %v545_v14 = vld [vmem:[%s6065_s4 + $0xa8] sm:$0xff]  ;;  %v4966_v15 = vpack.c.bf16 %v527_v12, %v526_v11  ;;  %v528_v17 = vld [vmem:[%s6065_s4 + $0x20] sm:$0xff]  ;;  %v546_v29 = vld [vmem:[%s6065_s4 + $0xb0] sm:$0xff] }
  0x15   :  { %3833 = vmatpush3.bf16.msra.mxu0 %v3830_v16  ;;  %3913 = vmatpush3.bf16.msra.mxu1 %v4948_v9  ;;  %v4969_v16 = vpack.c.bf16 %v545_v14, %v544_v13  ;;  %v529_v18 = vld [vmem:[%s6065_s4 + $0x28] sm:$0xff]  ;;  %v4985_v20 = vld [vmem:[%s6066_s3] ss:$0 sm:$0xff]  ;;  %v547_v30 = vld [vmem:[%s6065_s4 + $0xb8] sm:$0xff] }
  0x16   :  { %3835 = vmatprep.subr.bf16.mxu0 %v3834_v19  ;;  %3915 = vmatprep.subr.bf16.mxu1 %v4950_v10  ;;  %v4995_v34 = vpack.c.bf16 %v547_v30, %v546_v29  ;;  %v530_v35 = vld [vmem:[%s6065_s4 + $0x30] sm:$0xff]  ;;  %v548_v40 = vld [vmem:[%s6065_s4 + $0xc0] sm:$0xff]  ;;  %v533_v45 = vld [vmem:[%s6065_s4 + $0x48] sm:$0xff] }
  0x17   :  { %v532_v44 = vld [vmem:[%s6065_s4 + $0x40] sm:$0xff]  ;;  %v551_v49 = vld [vmem:[%s6065_s4 + $0xd8] sm:$0xff]  ;;  %v554_v1 = vld [vmem:[%s6065_s4 + $0xf0] sm:$0xff] }
  0x18   :  { %v552_v55 = vld [vmem:[%s6065_s4 + $0xe0] sm:$0xff]  ;;  %v555_v2 = vld [vmem:[%s6065_s4 + $0xf8] sm:$0xff]  ;;  %v538_v7 = vld [vmem:[%s6065_s4 + $0x70] sm:$0xff] }
  0x19   :  { %3837 = vmatpush3.bf16.msra.mxu0 %v3834_v19  ;;  %3917 = vmatpush3.bf16.msra.mxu1 %v4966_v15  ;;  %v4978_v19 = vpack.c.bf16 %v529_v18, %v528_v17  ;;  %v536_v60 = vld [vmem:[%s6065_s4 + $0x60] sm:$0xff]  ;;  %v5069_v6 = vpack.c.bf16 %v555_v2, %v554_v1  ;;  %v539_v8 = vld [vmem:[%s6065_s4 + $0x78] sm:$0xff] }
  0x1a   :  { %3839 = vmatprep.subr.bf16.mxu0 %v3838_v22  ;;  %3919 = vmatprep.subr.bf16.mxu1 %v4969_v16  ;;  %v5078_v12 = vpack.c.bf16 %v539_v8, %v538_v7 }
  0x1d   :  { %3841 = vmatpush3.bf16.msra.mxu0 %v3838_v22  ;;  %3921 = vmatpush3.bf16.msra.mxu1 %v4978_v19 }
  0x1e   :  { %3843 = vmatprep.subr.bf16.mxu0 %v3842_v25  ;;  %3923 = vmatprep.subr.bf16.mxu1 %v4995_v34 }
  0x21   :  { %3845 = vmatpush3.bf16.msra.mxu0 %v3842_v25 }
  0x22   :  { %3847 = vmatprep.subr.bf16.mxu0 %v4790_v28 }
  0x24   :  { %3455 = vmatmul.mubr.f32.vlgmr.msra.gmra.mrb[0].mxu0 %v30_v31 }
  0x25   :  { %3849 = vmatpush3.bf16.msra.mxu0 %v4790_v28  ;;  %3457 = vmatprep.mubr.f32.mxu0 %v31_v32 }
  0x26   :  { %3851 = vmatprep.subr.bf16.mxu0 %v4805_v33 }
  0x28   :  { %3458 = vmatmul.mubr.f32.gmra.mrb[2].mxu0 %v32_v36  ;;  %v531_v36 = vld [vmem:[%s6065_s4 + $0x38] sm:$0xff] }
  0x29   :  { %3853 = vmatpush3.bf16.msra.mxu0 %v4805_v33  ;;  %3460 = vmatprep.mubr.f32.mxu0 %v33_v37  ;;  %v5003_v39 = vpack.c.bf16 %v531_v36, %v530_v35 }
  0x2a   :  { %3855 = vmatprep.subr.bf16.mxu0 %v4821_v38 }
  0x2b   :  { %3925 = vmatpush3.bf16.msra.mxu1 %v5003_v39 }
  0x2c   :  { %3461 = vmatmul.mubr.f32.gmra.mrb[4].mxu0 %v34_v41  ;;  %v549_v41 = vld [vmem:[%s6065_s4 + $0xc8] sm:$0xff] }
  0x2d   :  { %3857 = vmatpush3.bf16.msra.mxu0 %v4821_v38  ;;  %3463 = vmatprep.mubr.f32.mxu0 %v35_v42  ;;  %v5013_v42 = vpack.c.bf16 %v549_v41, %v548_v40 }
  0x2e   :  { %3859 = vmatprep.subr.bf16.mxu0 %v4837_v43 }
  0x2f   :  { %3927 = vmatprep.subr.bf16.mxu1 %v5013_v42 }
  0x30   :  { %3464 = vmatmul.mubr.f32.gmra.mrb[6].mxu0 %v36_v46  ;;  %v5021_v46 = vpack.c.bf16 %v533_v45, %v532_v44 }
  0x31   :  { %3861 = vmatpush3.bf16.msra.mxu0 %v4837_v43  ;;  %3466 = vmatprep.mubr.f32.mxu0 %v37_v47  ;;  %v550_v47 = vld [vmem:[%s6065_s4 + $0xd0] sm:$0xff] }
  0x32   :  { %3863 = vmatprep.subr.bf16.mxu0 %v4853_v48  ;;  %3929 = vmatpush3.bf16.msra.mxu1 %v5021_v46  ;;  %v5031_v50 = vpack.c.bf16 %v551_v49, %v550_v47 }
  0x34   :  { %3467 = vmatmul.mubr.f32.gmra.mrb[8].mxu0 %v38_v51  ;;  %v534_v51 = vld [vmem:[%s6065_s4 + $0x50] sm:$0xff]  ;;  %3931 = vmatprep.subr.bf16.mxu1 %v5031_v50 }
  0x35   :  { %3865 = vmatpush3.bf16.msra.mxu0 %v4853_v48  ;;  %3469 = vmatprep.mubr.f32.mxu0 %v39_v52  ;;  %v535_v52 = vld [vmem:[%s6065_s4 + $0x58] sm:$0xff] }
  0x36   :  { %3867 = vmatprep.subr.bf16.mxu0 %v4869_v53  ;;  %v5039_v54 = vpack.c.bf16 %v535_v52, %v534_v51 }
  0x38   :  { %3470 = vmatmul.mubr.f32.gmra.mrb[10].mxu0 %v40_v56  ;;  %3933 = vmatpush3.bf16.msra.mxu1 %v5039_v54  ;;  %v553_v56 = vld [vmem:[%s6065_s4 + $0xe8] sm:$0xff] }
  0x39   :  { %3869 = vmatpush3.bf16.msra.mxu0 %v4869_v53  ;;  %3472 = vmatprep.mubr.f32.mxu0 %v41_v57  ;;  %v5049_v59 = vpack.c.bf16 %v553_v56, %v552_v55 }
  0x3a   :  { %3871 = vmatprep.subr.bf16.mxu0 %v4885_v58 }
  0x3b   :  { %3935 = vmatprep.subr.bf16.mxu1 %v5049_v59 }
  0x3c   :  { %3473 = vmatmul.mubr.f32.gmra.mrb[12].mxu0 %v42_v61  ;;  %v537_v61 = vld [vmem:[%s6065_s4 + $0x68] sm:$0xff] }
  0x3d   :  { %3873 = vmatpush3.bf16.msra.mxu0 %v4885_v58  ;;  %3475 = vmatprep.mubr.f32.mxu0 %v43_v62 }
  0x3e   :  { %3875 = vmatprep.subr.bf16.mxu0 %v4901_v63 }
  0x40   :  { %3476 = vmatmul.mubr.f32.gmra.mrb[14].mxu0 %v44_v0  ;;  %v5058_v0 = vpack.c.bf16 %v537_v61, %v536_v60 }
  0x41   :  { %3877 = vmatpush3.bf16.msra.mxu0 %v4901_v63  ;;  %3510 = vmatprep.mubr.f32.mxu0 %v4683_v3 }
  0x42   :  { %3879 = vmatprep.subr.bf16.mxu0 %v4790_v28  ;;  %3937 = vmatpush3.bf16.msra.mxu1 %v5058_v0 }
  0x43   :  { %3939 = vmatprep.subr.bf16.mxu1 %v5069_v6 }
  0x44   :  { %3511 = vmatmul.mubr.f32.vlgmr.msra.gmra.mrb[0].mxu0 %v4683_v3 }
  0x45   :  { %3881 = vmatpush3.bf16.msra.mxu0 %v4790_v28 }
  0x46   :  { %3883 = vmatprep.subr.bf16.mxu0 %v4805_v33  ;;  %3941 = vmatpush3.bf16.msra.mxu1 %v5078_v12 }
  0x47   :  { %3975 = vmatprep.subr.bf16.mxu1 %v4937_v5 }
  0x49   :  { %3885 = vmatpush3.bf16.msra.mxu0 %v4805_v33 }
  0x4a   :  { %3887 = vmatprep.subr.bf16.mxu0 %v4821_v38 }
  0x4d   :  { %3889 = vmatpush3.bf16.msra.mxu0 %v4821_v38 }
  0x4e   :  { %3891 = vmatprep.subr.bf16.mxu0 %v4837_v43 }
  0x51   :  { %3893 = vmatpush3.bf16.msra.mxu0 %v4837_v43 }
  0x52   :  { %3895 = vmatprep.subr.bf16.mxu0 %v4853_v48 }
  0x55   :  { %3897 = vmatpush3.bf16.msra.mxu0 %v4853_v48 }
  0x56   :  { %3899 = vmatprep.subr.bf16.mxu0 %v4869_v53 }
  0x59   :  { %3901 = vmatpush3.bf16.msra.mxu0 %v4869_v53 }
  0x5a   :  { %3903 = vmatprep.subr.bf16.mxu0 %v4885_v58 }
  0x5d   :  { %3905 = vmatpush3.bf16.msra.mxu0 %v4885_v58 }
  0x5e   :  { %3907 = vmatprep.subr.bf16.mxu0 %v4901_v63 }
  0x61   :  { %3909 = vmatpush3.bf16.msra.mxu0 %v4901_v63 }
  0x62   :  { %3943 = vmatprep.subr.bf16.mxu0 %v4790_v28 }
 0x117   :  { %v3512_v21 = vpop.f32.mrb[0].mxu0 }
 0x118   :  { %v4390_v22 = vadd.f32 %v3512_v21, %v4985_v20  ;;  %v323_v23 = vpop.f32.mrb[1].mxu0 }
 0x119   :  { %v4391_v24 = vadd.f32 %v4985_v20, %v323_v23 }
 0x11a   :  { %v2870_v25 = vmul.f32 -1.442695, %v4390_v22 }
 0x11b   :  { %v2869_v26 = vmul.f32 -1.442695, %v4391_v24 }
 0x11c   :  { %4426 = vpow2.f32 %v2870_v25 }
 0x11d   :  { %4428 = vpow2.f32 %v2869_v26 }
 0x126   :  { %v4427_v27 = vpop.eup %4426 }
 0x127   :  { %v4429_v31 = vpop.eup %4428  ;;  %v343_v32 = vadd.f32 1.0, %v4427_v27 }
 0x128   :  { %v342_v37 = vadd.f32 1.0, %v4429_v31 }
 0x129   :  { %4430 = vrcp.f32 %v343_v32 }
 0x12a   :  { %4432 = vrcp.f32 %v342_v37  ;;  %v5128_v37 = vld [vmem:[%s6067_s5] ss:$0 sm:$0xff] }
 0x12b   :  { %4434 = vtanh.f32 %v4390_v22 }
 0x12c   :  { %4436 = vtanh.f32 %v4391_v24 }
 0x133   :  { %v4431_v57 = vpop.eup %4430 }
 0x134   :  { %v4433_v62 = vpop.eup %4432  ;;  %352 = vrot.lane.b32.xlu1 %v4431_v57, %s4684_s19 }
 0x135   :  { %350 = vrot.lane.b32.xlu0 %v4433_v62, %s4684_s19  ;;  %v4435_v4 = vpop.eup %4434 }
 0x136   :  { %v4437_v11 = vpop.eup %4436 }
 0x138   :  { %356 = vrot.lane.b32.xlu1 %v4435_v4, %s4685_s27 }
 0x139   :  { %354 = vrot.lane.b32.xlu0 %v4437_v11, %s4685_s27 }
 0x13c   :  { %360 = vrot.lane.b32.xlu1 %v4431_v57, %s4686_s28 }
 0x13d   :  { %358 = vrot.lane.b32.xlu0 %v4433_v62, %s4686_s28 }
 0x1a6   :  { %v353_v13 = vpop.permute.xlu1 %352 }
 0x1a7   :  { %v351_v14 = vpop.permute.xlu0 %350  ;;  %v363_v18 = vmul.f32 0.0, %v353_v13 }
 0x1a8   :  { %v362_v23 = vmul.f32 0.0, %v351_v14 }
 0x1aa   :  { %v357_v17 = vpop.permute.xlu1 %356 }
 0x1ab   :  { %v365_v21 = vmul.f32 %v4431_v57, %v357_v17  ;;  %v355_v22 = vpop.permute.xlu0 %354 }
 0x1ac   :  { %v364_v24 = vmul.f32 %v4433_v62, %v355_v22 }
 0x1ad   :  { %v5086_v25 = vadd.f32 %v365_v21, %v363_v18 }
 0x1ae   :  { %v5088_v26 = vadd.f32 %v364_v24, %v362_v23  ;;  %v361_v31 = vpop.permute.xlu1 %360 }
 0x1af   :  { %4438 = vtanh.f32 %v5086_v25  ;;  %v359_v30 = vpop.permute.xlu0 %358 }
 0x1b0   :  { %4440 = vtanh.f32 %v5088_v26 }
 0x1b9   :  { %v4439_v27 = vpop.eup %4438 }
 0x1ba   :  { %v4441_v29 = vpop.eup %4440  ;;  %v371_v35 = vmul.f32 %v4439_v27, %v361_v31 }
 0x1bb   :  { %v370_v32 = vmul.f32 %v4441_v29, %v359_v30 }
 0x1bd   :  { %3545 = vmatprep.mubr.f32.mxu0 %v370_v32  ;;  %628 = vmatmul.mubr.f32.vlgmr.msra.gmra.mrb[0].mxu1 %v370_v32 }
 0x1be   :  { %3546 = vmatmul.mubr.f32.vlgmr.msra.gmra.mrb[2].mxu0 %v371_v35  ;;  %632 = vmatprep.mubr.f32.mxu1 %v4683_v3 }
 0x1bf   :  { %3945 = vmatpush3.bf16.msra.mxu0 %v4790_v28  ;;  %3977 = vmatpush3.bf16.msra.mxu1 %v4948_v9 }
 0x1c0   :  { %3947 = vmatprep.subr.bf16.mxu0 %v4805_v33  ;;  %3979 = vmatprep.subr.bf16.mxu1 %v4950_v10 }
 0x1c1   :  { %633 = vmatmul.mubr.f32.gmra.mrb[2].mxu1 %v371_v35 }
 0x1c3   :  { %3949 = vmatpush3.bf16.msra.mxu0 %v4805_v33  ;;  %3981 = vmatpush3.bf16.msra.mxu1 %v4966_v15 }
 0x1c4   :  { %3951 = vmatprep.subr.bf16.mxu0 %v4821_v38  ;;  %3983 = vmatprep.subr.bf16.mxu1 %v4969_v16 }
 0x1c7   :  { %3953 = vmatpush3.bf16.msra.mxu0 %v4821_v38  ;;  %3985 = vmatpush3.bf16.msra.mxu1 %v4978_v19 }
 0x1c8   :  { %3955 = vmatprep.subr.bf16.mxu0 %v4837_v43  ;;  %3987 = vmatprep.subr.bf16.mxu1 %v4995_v34 }
 0x1cb   :  { %3957 = vmatpush3.bf16.msra.mxu0 %v4837_v43  ;;  %3989 = vmatpush3.bf16.msra.mxu1 %v5003_v39 }
 0x1cc   :  { %3959 = vmatprep.subr.bf16.mxu0 %v4853_v48  ;;  %3991 = vmatprep.subr.bf16.mxu1 %v5013_v42 }
 0x1cf   :  { %3961 = vmatpush3.bf16.msra.mxu0 %v4853_v48  ;;  %3993 = vmatpush3.bf16.msra.mxu1 %v5021_v46 }
 0x1d0   :  { %3963 = vmatprep.subr.bf16.mxu0 %v4869_v53  ;;  %3995 = vmatprep.subr.bf16.mxu1 %v5031_v50 }
 0x1d3   :  { %3965 = vmatpush3.bf16.msra.mxu0 %v4869_v53  ;;  %3997 = vmatpush3.bf16.msra.mxu1 %v5039_v54 }
 0x1d4   :  { %3967 = vmatprep.subr.bf16.mxu0 %v4885_v58  ;;  %3999 = vmatprep.subr.bf16.mxu1 %v5049_v59 }
 0x1d7   :  { %3969 = vmatpush3.bf16.msra.mxu0 %v4885_v58  ;;  %4001 = vmatpush3.bf16.msra.mxu1 %v5058_v0 }
 0x1d8   :  { %3971 = vmatprep.subr.bf16.mxu0 %v4901_v63  ;;  %4003 = vmatprep.subr.bf16.mxu1 %v5069_v6 }
 0x1db   :  { %3973 = vmatpush3.bf16.msra.mxu0 %v4901_v63  ;;  %4005 = vmatpush3.bf16.msra.mxu1 %v5078_v12 }
 0x1dc   :  { %4007 = vmatprep.subr.bf16.mxu0 %v4790_v28  ;;  %4039 = vmatprep.subr.bf16.mxu1 %v4937_v5 }
 0x290   :  { %v3010_v3 = vpop.f32.mrb[0].mxu1 }
 0x291   :  { %v3547_v36 = vpop.f32.mrb[2].mxu0  ;;  %v3011_v40 = vpop.f32.mrb[1].mxu1 }
 0x292   :  { %v4392_v41 = vadd.f32 %v3547_v36, %v4985_v20  ;;  %v3012_v44 = vadd.f32 %v3011_v40, %v3010_v3  ;;  %v464_v45 = vpop.f32.mrb[3].mxu0 }
 0x293   :  { %v4393_v47 = vadd.f32 %v4985_v20, %v464_v45 }
 0x294   :  { %v2872_v49 = vmul.f32 -1.442695, %v4392_v41  ;;  %4442 = vtanh.f32 %v4392_v41  ;;  %v630_v51 = vadd.f32 %v3012_v44, %v5128_v37  ;;  %v3013_v52 = vpop.f32.mrb[2].mxu1 }
 0x295   :  { %v2871_v5 = vmul.f32 -1.442695, %v4393_v47  ;;  %v3014_v55 = vpop.f32.mrb[3].mxu1 }
 0x296   :  { %4444 = vpow2.f32 %v2872_v49  ;;  %v2874_v56 = vmul.f32 -1.442695, %v630_v51  ;;  %v3015_v57 = vadd.f32 %v3014_v55, %v3013_v52 }
 0x297   :  { %4446 = vtanh.f32 %v4393_v47 }
 0x298   :  { %v635_v60 = vadd.f32 %v3015_v57, %v5128_v37  ;;  %4448 = vpow2.f32 %v2871_v5 }
 0x299   :  { %4450 = vpow2.f32 %v2874_v56 }
 0x29a   :  { %v2875_v61 = vmul.f32 -1.442695, %v635_v60  ;;  %4452 = vtanh.f32 %v630_v51 }
 0x29c   :  { %4454 = vpow2.f32 %v2875_v61 }
 0x29d   :  { %4456 = vtanh.f32 %v635_v60 }
 0x29e   :  { %v4443_v62 = vpop.eup %4442 }
 0x29f   :  { %497 = vrot.lane.b32.xlu1 %v4443_v62, %s4685_s27 }
 0x2a0   :  { %v4445_v1 = vpop.eup %4444 }
 0x2a1   :  { %v484_v2 = vadd.f32 1.0, %v4445_v1  ;;  %v4447_v4 = vpop.eup %4446 }
 0x2a2   :  { %v4449_v7 = vpop.eup %4448 }
 0x2a3   :  { %4458 = vrcp.f32 %v484_v2  ;;  %495 = vrot.lane.b32.xlu1 %v4447_v4, %s4685_s27  ;;  %v4451_v8 = vpop.eup %4450  ;;  %v483_v11 = vadd.f32 1.0, %v4449_v7 }
 0x2a4   :  { %v4453_v13 = vpop.eup %4452  ;;  %v647_v17 = vadd.f32 1.0, %v4451_v8 }
 0x2a5   :  { %4460 = vrcp.f32 %v483_v11 }
 0x2a6   :  { %v4455_v14 = vpop.eup %4454 }
 0x2a7   :  { %v648_v18 = vadd.f32 1.0, %v4455_v14  ;;  %659 = vrot.lane.b32.xlu1 %v4453_v13, %s4685_s27  ;;  %v4457_v21 = vpop.eup %4456 }
 0x2a9   :  { %4462 = vrcp.f32 %v648_v18 }
 0x2aa   :  { %4464 = vrcp.f32 %v647_v17 }
 0x2ab   :  { %661 = vrot.lane.b32.xlu1 %v4457_v21, %s4685_s27 }
 0x2ad   :  { %v4459_v22 = vpop.eup %4458 }
 0x2ae   :  { %493 = vrot.lane.b32.xlu0 %v4459_v22, %s4684_s19 }
 0x2af   :  { %v4461_v23 = vpop.eup %4460 }
 0x2b0   :  { %499 = vrot.lane.b32.xlu1 %v4461_v23, %s4686_s28 }
 0x2b2   :  { %491 = vrot.lane.b32.xlu0 %v4461_v23, %s4684_s19 }
 0x2b3   :  { %v4463_v24 = vpop.eup %4462 }
 0x2b4   :  { %v4465_v27 = vpop.eup %4464  ;;  %665 = vrot.lane.b32.xlu1 %v4463_v24, %s4686_s28 }
 0x2b6   :  { %655 = vrot.lane.b32.xlu0 %v4465_v27, %s4684_s19 }
 0x2ba   :  { %657 = vrot.lane.b32.xlu0 %v4463_v24, %s4684_s19 }
 0x2be   :  { %663 = vrot.lane.b32.xlu0 %v4465_v27, %s4686_s28 }
 0x2c2   :  { %501 = vrot.lane.b32.xlu0 %v4459_v22, %s4686_s28 }
 0x311   :  { %v498_v29 = vpop.permute.xlu1 %497 }
 0x312   :  { %v506_v35 = vmul.f32 %v4459_v22, %v498_v29 }
 0x315   :  { %v496_v30 = vpop.permute.xlu1 %495 }
 0x316   :  { %v505_v40 = vmul.f32 %v4461_v23, %v496_v30 }
 0x319   :  { %v660_v3 = vpop.permute.xlu1 %659 }
 0x31a   :  { %v669_v49 = vmul.f32 %v4465_v27, %v660_v3 }
 0x31d   :  { %v662_v52 = vpop.permute.xlu1 %661 }
 0x31e   :  { %v670_v55 = vmul.f32 %v4463_v24, %v662_v52 }
 0x320   :  { %v494_v31 = vpop.permute.xlu0 %493 }
 0x321   :  { %v504_v32 = vmul.f32 %v494_v31, %v5086_v25 }
 0x322   :  { %v500_v61 = vpop.permute.xlu1 %499 }
 0x323   :  { %v5148_v44 = vadd.f32 %v506_v35, %v504_v32 }
 0x324   :  { %v492_v36 = vpop.permute.xlu0 %491 }
 0x325   :  { %v503_v41 = vmul.f32 %v492_v36, %v5088_v26 }
 0x326   :  { %v666_v13 = vpop.permute.xlu1 %665 }
 0x327   :  { %v5150_v45 = vadd.f32 %v505_v40, %v503_v41 }
 0x328   :  { %v656_v47 = vpop.permute.xlu0 %655 }
 0x329   :  { %4466 = vtanh.f32 %v5150_v45  ;;  %v667_v51 = vmul.f32 0.0, %v656_v47 }
 0x32a   :  { %4468 = vtanh.f32 %v5148_v44 }
 0x32b   :  { %v5154_v5 = vadd.f32 %v669_v49, %v667_v51 }
 0x32c   :  { %v658_v25 = vpop.permute.xlu0 %657 }
 0x32d   :  { %4470 = vtanh.f32 %v5154_v5  ;;  %v668_v56 = vmul.f32 0.0, %v658_v25 }
 0x32f   :  { %v5157_v26 = vadd.f32 %v670_v55, %v668_v56 }
 0x330   :  { %v664_v57 = vpop.permute.xlu0 %663 }
 0x331   :  { %4472 = vtanh.f32 %v5157_v26 }
 0x333   :  { %v4467_v60 = vpop.eup %4466 }
 0x334   :  { %v4469_v62 = vpop.eup %4468  ;;  %v502_v1 = vpop.permute.xlu0 %501  ;;  %v511_v2 = vmul.f32 %v4467_v60, %v500_v61 }
 0x335   :  { %v512_v4 = vmul.f32 %v4469_v62, %v502_v1 }
 0x336   :  { %3580 = vmatprep.mubr.f32.mxu0 %v511_v2 }
 0x337   :  { %v4471_v7 = vpop.eup %4470  ;;  %3581 = vmatmul.mubr.f32.vlgmr.msra.gmra.mrb[4].mxu0 %v512_v4 }
 0x338   :  { %v5160_v8 = vmul.f32 %v4471_v7, %v664_v57  ;;  %4009 = vmatpush3.bf16.msra.mxu0 %v4790_v28 }
 0x339   :  { %4011 = vmatprep.subr.bf16.mxu0 %v4805_v33 }
 0x33a   :  { %932 = vmatprep.mubr.f32.mxu1 %v5160_v8 }
 0x33b   :  { %v4473_v11 = vpop.eup %4472  ;;  %933 = vmatmul.mubr.f32.vlgmr.msra.gmra.mrb[4].mxu1 %v511_v2 }
 0x33c   :  { %v5165_v14 = vmul.f32 %v4473_v11, %v666_v13  ;;  %4013 = vmatpush3.bf16.msra.mxu0 %v4805_v33  ;;  %4041 = vmatpush3.bf16.msra.mxu1 %v4948_v9 }
 0x33d   :  { %4015 = vmatprep.subr.bf16.mxu0 %v4821_v38  ;;  %4043 = vmatprep.subr.bf16.mxu1 %v4950_v10 }
 0x33e   :  { %937 = vmatprep.mubr.f32.mxu1 %v5165_v14 }
 0x33f   :  { %938 = vmatmul.mubr.f32.gmra.mrb[6].mxu1 %v512_v4 }
 0x340   :  { %4017 = vmatpush3.bf16.msra.mxu0 %v4821_v38  ;;  %4045 = vmatpush3.bf16.msra.mxu1 %v4966_v15 }
 0x341   :  { %4019 = vmatprep.subr.bf16.mxu0 %v4837_v43  ;;  %4047 = vmatprep.subr.bf16.mxu1 %v4969_v16 }
 0x344   :  { %4021 = vmatpush3.bf16.msra.mxu0 %v4837_v43  ;;  %4049 = vmatpush3.bf16.msra.mxu1 %v4978_v19 }
 0x345   :  { %4023 = vmatprep.subr.bf16.mxu0 %v4853_v48  ;;  %4051 = vmatprep.subr.bf16.mxu1 %v4995_v34 }
 0x348   :  { %4025 = vmatpush3.bf16.msra.mxu0 %v4853_v48  ;;  %4053 = vmatpush3.bf16.msra.mxu1 %v5003_v39 }
 0x349   :  { %4027 = vmatprep.subr.bf16.mxu0 %v4869_v53  ;;  %4055 = vmatprep.subr.bf16.mxu1 %v5013_v42 }
 0x34c   :  { %4029 = vmatpush3.bf16.msra.mxu0 %v4869_v53  ;;  %4057 = vmatpush3.bf16.msra.mxu1 %v5021_v46 }
 0x34d   :  { %4031 = vmatprep.subr.bf16.mxu0 %v4885_v58  ;;  %4059 = vmatprep.subr.bf16.mxu1 %v5031_v50 }
 0x350   :  { %4033 = vmatpush3.bf16.msra.mxu0 %v4885_v58  ;;  %4061 = vmatpush3.bf16.msra.mxu1 %v5039_v54 }
 0x351   :  { %4035 = vmatprep.subr.bf16.mxu0 %v4901_v63  ;;  %4063 = vmatprep.subr.bf16.mxu1 %v5049_v59 }
 0x354   :  { %4037 = vmatpush3.bf16.msra.mxu0 %v4901_v63  ;;  %4065 = vmatpush3.bf16.msra.mxu1 %v5058_v0 }
 0x355   :  { %4067 = vmatprep.subr.bf16.mxu1 %v5069_v6 }
 0x358   :  { %4069 = vmatpush3.bf16.msra.mxu1 %v5078_v12 }
 0x40a   :  { %v3582_v28 = vpop.f32.mrb[4].mxu0 }
 0x40b   :  { %v4394_v33 = vadd.f32 %v3582_v28, %v4985_v20  ;;  %v770_v38 = vpop.f32.mrb[5].mxu0 }
 0x40c   :  { %v4395_v43 = vadd.f32 %v4985_v20, %v770_v38 }
 0x40d   :  { %v2877_v48 = vmul.f32 -1.442695, %v4394_v33  ;;  %4474 = vtanh.f32 %v4394_v33 }
 0x40e   :  { %v2876_v53 = vmul.f32 -1.442695, %v4395_v43  ;;  %v3066_v58 = vpop.f32.mrb[4].mxu1 }
 0x40f   :  { %4476 = vpow2.f32 %v2877_v48  ;;  %v3067_v9 = vpop.f32.mrb[5].mxu1 }
 0x410   :  { %4478 = vpow2.f32 %v2876_v53  ;;  %v3068_v63 = vadd.f32 %v3067_v9, %v3066_v58 }
 0x411   :  { %4480 = vtanh.f32 %v4395_v43 }
 0x412   :  { %v935_v10 = vadd.f32 %v3068_v63, %v5128_v37  ;;  %v3069_v15 = vpop.f32.mrb[6].mxu1 }
 0x413   :  { %v3070_v16 = vpop.f32.mrb[7].mxu1 }
 0x414   :  { %v2879_v19 = vmul.f32 -1.442695, %v935_v10  ;;  %4482 = vtanh.f32 %v935_v10  ;;  %v3071_v34 = vadd.f32 %v3070_v16, %v3069_v15 }
 0x416   :  { %4484 = vpow2.f32 %v2879_v19  ;;  %v940_v39 = vadd.f32 %v3071_v34, %v5128_v37  ;;  %v1294_v19 = vld [vmem:[%s6064_s2] sm:$0xff]  ;;  %v1295_v34 = vld [vmem:[%s6064_s2 + $0x8] sm:$0xff] }
 0x417   :  { %v4475_v42 = vpop.eup %4474 }
 0x418   :  { %v2880_v46 = vmul.f32 -1.442695, %v940_v39  ;;  %4486 = vtanh.f32 %v940_v39  ;;  %803 = vrot.lane.b32.xlu1 %v4475_v42, %s4685_s27  ;;  %v5242_v42 = vpack.c.bf16 %v1295_v34, %v1294_v19  ;;  %v1304_v34 = vld [vmem:[%s6064_s2 + $0x50] sm:$0xff] }
 0x419   :  { %v4477_v50 = vpop.eup %4476 }
 0x41a   :  { %v4479_v54 = vpop.eup %4478  ;;  %v790_v59 = vadd.f32 1.0, %v4477_v50  ;;  %4488 = vpow2.f32 %v2880_v46  ;;  %4071 = vmatprep.subr.bf16.mxu0 %v5242_v42 }
 0x41b   :  { %v4481_v0 = vpop.eup %4480  ;;  %v789_v6 = vadd.f32 1.0, %v4479_v54  ;;  %v1296_v54 = vld [vmem:[%s6064_s2 + $0x10] sm:$0xff] }
 0x41c   :  { %4490 = vrcp.f32 %v790_v59  ;;  %801 = vrot.lane.b32.xlu1 %v4481_v0, %s4685_s27  ;;  %v1297_v59 = vld [vmem:[%s6064_s2 + $0x18] sm:$0xff]  ;;  %v1451_v0 = vld [vmem:[%s6065_s4 + $0x80] sm:$0xff] }
 0x41d   :  { %4492 = vrcp.f32 %v789_v6 }
 0x41e   :  { %v4483_v12 = vpop.eup %4482 }
 0x420   :  { %v4485_v17 = vpop.eup %4484  ;;  %963 = vrot.lane.b32.xlu1 %v4483_v12, %s4685_s27 }
 0x421   :  { %v951_v18 = vadd.f32 1.0, %v4485_v17  ;;  %v5256_v17 = vpack.c.bf16 %v1297_v59, %v1296_v54  ;;  %v1460_v54 = vld [vmem:[%s6065_s4 + $0xc8] sm:$0xff]  ;;  %v1443_v59 = vld [vmem:[%s6065_s4 + $0x40] sm:$0xff] }
 0x422   :  { %v4487_v21 = vpop.eup %4486 }
 0x423   :  { %4494 = vrcp.f32 %v951_v18  ;;  %v1452_v18 = vld [vmem:[%s6065_s4 + $0x88] sm:$0xff] }
 0x424   :  { %v4489_v22 = vpop.eup %4488  ;;  %965 = vrot.lane.b32.xlu1 %v4487_v21, %s4685_s27  ;;  %v1435_v21 = vld [vmem:[%s6065_s4] sm:$0xff] }
 0x425   :  { %v952_v23 = vadd.f32 1.0, %v4489_v22  ;;  %v1436_v22 = vld [vmem:[%s6065_s4 + $0x8] sm:$0xff] }
 0x426   :  { %v4491_v24 = vpop.eup %4490 }
 0x427   :  { %v4493_v27 = vpop.eup %4492  ;;  %4496 = vrcp.f32 %v952_v23  ;;  %799 = vrot.lane.b32.xlu0 %v4491_v24, %s4684_s19  ;;  %v5267_v23 = vpack.c.bf16 %v1452_v18, %v1451_v0  ;;  %v1444_v0 = vld [vmem:[%s6065_s4 + $0x48] sm:$0xff] }
 0x428   :  { %805 = vrot.lane.b32.xlu1 %v4493_v27, %s4686_s28  ;;  %v5386_v18 = vpack.c.bf16 %v1444_v0, %v1443_v59 }
 0x429   :  { %4103 = vmatprep.subr.bf16.mxu1 %v5267_v23 }
 0x42b   :  { %797 = vrot.lane.b32.xlu0 %v4493_v27, %s4684_s19 }
 0x42d   :  { %v4495_v29 = vpop.eup %4494 }
 0x42f   :  { %959 = vrot.lane.b32.xlu0 %v4495_v29, %s4684_s19 }
 0x431   :  { %v4497_v30 = vpop.eup %4496 }
 0x432   :  { %969 = vrot.lane.b32.xlu1 %v4497_v30, %s4686_s28 }
 0x433   :  { %961 = vrot.lane.b32.xlu0 %v4497_v30, %s4684_s19 }
 0x437   :  { %967 = vrot.lane.b32.xlu0 %v4495_v29, %s4686_s28 }
 0x43b   :  { %807 = vrot.lane.b32.xlu0 %v4491_v24, %s4686_s28 }
 0x48a   :  { %v804_v31 = vpop.permute.xlu1 %803 }
 0x48b   :  { %v812_v36 = vmul.f32 %v4491_v24, %v804_v31  ;;  %v5269_v24 = vpack.c.bf16 %v1436_v22, %v1435_v21  ;;  %v1299_v31 = vld [vmem:[%s6064_s2 + $0x28] sm:$0xff] }
 0x48e   :  { %v802_v32 = vpop.permute.xlu1 %801 }
 0x48f   :  { %v811_v47 = vmul.f32 %v4493_v27, %v802_v32  ;;  %v1453_v32 = vld [vmem:[%s6065_s4 + $0x90] sm:$0xff] }
 0x492   :  { %v964_v40 = vpop.permute.xlu1 %963 }
 0x493   :  { %v973_v55 = vmul.f32 %v4495_v29, %v964_v40  ;;  %v1438_v40 = vld [vmem:[%s6065_s4 + $0x18] sm:$0xff] }
 0x496   :  { %v966_v57 = vpop.permute.xlu1 %965 }
 0x497   :  { %v974_v61 = vmul.f32 %v4497_v30, %v966_v57  ;;  %v1298_v30 = vld [vmem:[%s6064_s2 + $0x20] sm:$0xff] }
 0x499   :  { %v800_v35 = vpop.permute.xlu0 %799 }
 0x49a   :  { %v810_v3 = vmul.f32 %v800_v35, %v5148_v44  ;;  %v806_v4 = vpop.permute.xlu1 %805  ;;  %v5286_v35 = vpack.c.bf16 %v1299_v31, %v1298_v30  ;;  %v1461_v30 = vld [vmem:[%s6065_s4 + $0xd0] sm:$0xff] }
 0x49c   :  { %v5214_v51 = vadd.f32 %v812_v36, %v810_v3  ;;  %v1454_v3 = vld [vmem:[%s6065_s4 + $0x98] sm:$0xff]  ;;  %v1437_v36 = vld [vmem:[%s6065_s4 + $0x10] sm:$0xff] }
 0x49d   :  { %v798_v41 = vpop.permute.xlu0 %797 }
 0x49e   :  { %v809_v49 = vmul.f32 %v798_v41, %v5150_v45 }
 0x4a0   :  { %v5216_v52 = vadd.f32 %v811_v47, %v809_v49  ;;  %v5297_v47 = vpack.c.bf16 %v1454_v3, %v1453_v32  ;;  %v5299_v49 = vpack.c.bf16 %v1438_v40, %v1437_v36  ;;  %v1462_v32 = vld [vmem:[%s6065_s4 + $0xd8] sm:$0xff] }
 0x4a1   :  { %v960_v25 = vpop.permute.xlu0 %959  ;;  %v1446_v3 = vld [vmem:[%s6065_s4 + $0x58] sm:$0xff]  ;;  %v5414_v36 = vpack.c.bf16 %v1462_v32, %v1461_v30 }
 0x4a2   :  { %4498 = vtanh.f32 %v5216_v52  ;;  %v971_v56 = vmul.f32 %v960_v25, %v5154_v5 }
 0x4a3   :  { %4500 = vtanh.f32 %v5214_v51 }
 0x4a4   :  { %v5221_v44 = vadd.f32 %v973_v55, %v971_v56 }
 0x4a5   :  { %v962_v60 = vpop.permute.xlu0 %961 }
 0x4a6   :  { %4502 = vtanh.f32 %v5221_v44  ;;  %v972_v45 = vmul.f32 %v962_v60, %v5157_v26  ;;  %v970_v26 = vpop.permute.xlu1 %969  ;;  %v1300_v60 = vld [vmem:[%s6064_s2 + $0x30] sm:$0xff] }
 0x4a8   :  { %v5225_v62 = vadd.f32 %v974_v61, %v972_v45  ;;  %v1301_v61 = vld [vmem:[%s6064_s2 + $0x38] sm:$0xff]  ;;  %v1455_v45 = vld [vmem:[%s6065_s4 + $0xa0] sm:$0xff] }
 0x4a9   :  { %v968_v1 = vpop.permute.xlu0 %967 }
 0x4aa   :  { %4504 = vtanh.f32 %v5225_v62 }
 0x4ac   :  { %v4499_v2 = vpop.eup %4498 }
 0x4ad   :  { %v4501_v7 = vpop.eup %4500  ;;  %v808_v5 = vpop.permute.xlu0 %807  ;;  %v817_v11 = vmul.f32 %v4499_v2, %v806_v4  ;;  %v1456_v2 = vld [vmem:[%s6065_s4 + $0xa8] sm:$0xff]  ;;  %v1439_v4 = vld [vmem:[%s6065_s4 + $0x20] sm:$0xff] }
 0x4ae   :  { %v818_v13 = vmul.f32 %v4501_v7, %v808_v5  ;;  %v1440_v7 = vld [vmem:[%s6065_s4 + $0x28] sm:$0xff]  ;;  %v5326_v5 = vpack.c.bf16 %v1456_v2, %v1455_v45 }
 0x4af   :  { %3615 = vmatprep.mubr.f32.mxu0 %v817_v11 }
 0x4b0   :  { %v4503_v28 = vpop.eup %4502  ;;  %3616 = vmatmul.mubr.f32.vlgmr.msra.gmra.mrb[6].mxu0 %v818_v13 }
 0x4b1   :  { %v5228_v33 = vmul.f32 %v4503_v28, %v968_v1  ;;  %4073 = vmatpush3.bf16.msra.mxu0 %v5242_v42  ;;  %v5315_v1 = vpack.c.bf16 %v1301_v61, %v1300_v60  ;;  %v1302_v28 = vld [vmem:[%s6064_s2 + $0x40] sm:$0xff]  ;;  %v1448_v61 = vld [vmem:[%s6065_s4 + $0x68] sm:$0xff] }
 0x4b2   :  { %4075 = vmatprep.subr.bf16.mxu0 %v5256_v17  ;;  %v1447_v60 = vld [vmem:[%s6065_s4 + $0x60] sm:$0xff] }
 0x4b3   :  { %1235 = vmatprep.mubr.f32.mxu1 %v5228_v33 }
 0x4b4   :  { %v4505_v38 = vpop.eup %4504  ;;  %1236 = vmatmul.mubr.f32.vlgmr.msra.gmra.mrb[8].mxu1 %v817_v11  ;;  %v5328_v11 = vpack.c.bf16 %v1440_v7, %v1439_v4  ;;  %v5445_v4 = vpack.c.bf16 %v1448_v61, %v1447_v60  ;;  %v1465_v7 = vld [vmem:[%s6065_s4 + $0xf0] sm:$0xff] }
 0x4b5   :  { %v5231_v43 = vmul.f32 %v4505_v38, %v970_v26  ;;  %4077 = vmatpush3.bf16.msra.mxu0 %v5256_v17  ;;  %4105 = vmatpush3.bf16.msra.mxu1 %v5269_v24  ;;  %v1303_v38 = vld [vmem:[%s6064_s2 + $0x48] sm:$0xff]  ;;  %v1457_v26 = vld [vmem:[%s6065_s4 + $0xb0] sm:$0xff] }
 0x4b6   :  { %4079 = vmatprep.subr.bf16.mxu0 %v5286_v35  ;;  %4107 = vmatprep.subr.bf16.mxu1 %v5297_v47 }
 0x4b7   :  { %1240 = vmatprep.mubr.f32.mxu1 %v5231_v43 }
 0x4b8   :  { %1241 = vmatmul.mubr.f32.gmra.mrb[10].mxu1 %v818_v13 }
 0x4b9   :  { %4081 = vmatpush3.bf16.msra.mxu0 %v5286_v35  ;;  %4109 = vmatpush3.bf16.msra.mxu1 %v5299_v49 }
 0x4ba   :  { %4083 = vmatprep.subr.bf16.mxu0 %v5315_v1  ;;  %4111 = vmatprep.subr.bf16.mxu1 %v5326_v5 }
 0x4bd   :  { %4085 = vmatpush3.bf16.msra.mxu0 %v5315_v1  ;;  %4113 = vmatpush3.bf16.msra.mxu1 %v5328_v11 }
 0x583   :  { %v3617_v48 = vpop.f32.mrb[6].mxu0 }
 0x584   :  { %v4396_v53 = vadd.f32 %v3617_v48, %v4985_v20  ;;  %v1073_v58 = vpop.f32.mrb[7].mxu0 }
 0x585   :  { %v4397_v9 = vadd.f32 %v4985_v20, %v1073_v58  ;;  %v1458_v58 = vld [vmem:[%s6065_s4 + $0xb8] sm:$0xff] }
 0x586   :  { %v2882_v63 = vmul.f32 -1.442695, %v4396_v53  ;;  %4506 = vtanh.f32 %v4396_v53  ;;  %v5344_v53 = vpack.c.bf16 %v1303_v38, %v1302_v28  ;;  %v1449_v38 = vld [vmem:[%s6065_s4 + $0x70] sm:$0xff] }
 0x587   :  { %v2881_v10 = vmul.f32 -1.442695, %v4397_v9  ;;  %v3122_v15 = vpop.f32.mrb[8].mxu1 }
 0x588   :  { %4508 = vpow2.f32 %v2882_v63  ;;  %v3123_v16 = vpop.f32.mrb[9].mxu1  ;;  %v1442_v63 = vld [vmem:[%s6065_s4 + $0x38] sm:$0xff]  ;;  %4087 = vmatprep.subr.bf16.mxu0 %v5344_v53 }
 0x589   :  { %4510 = vpow2.f32 %v2881_v10  ;;  %v3124_v39 = vadd.f32 %v3123_v16, %v3122_v15  ;;  %v5355_v15 = vpack.c.bf16 %v1458_v58, %v1457_v26  ;;  %4089 = vmatpush3.bf16.msra.mxu0 %v5344_v53  ;;  %v1450_v26 = vld [vmem:[%s6065_s4 + $0x78] sm:$0xff] }
 0x58a   :  { %4512 = vtanh.f32 %v4397_v9  ;;  %v1441_v9 = vld [vmem:[%s6065_s4 + $0x30] sm:$0xff]  ;;  %v5466_v58 = vpack.c.bf16 %v1450_v26, %v1449_v38  ;;  %v5533_v38 = vld [vmem:[%s6066_s3] ss:$0 sm:$0xff] }
 0x58b   :  { %v1238_v20 = vadd.f32 %v3124_v39, %v5128_v37  ;;  %v3125_v46 = vpop.f32.mrb[10].mxu1  ;;  %v5357_v16 = vpack.c.bf16 %v1442_v63, %v1441_v9  ;;  %4115 = vmatprep.subr.bf16.mxu1 %v5355_v15  ;;  %v1305_v39 = vld [vmem:[%s6064_s2 + $0x58] sm:$0xff] }
 0x58c   :  { %v3126_v50 = vpop.f32.mrb[11].mxu1 }
 0x58d   :  { %v2884_v6 = vmul.f32 -1.442695, %v1238_v20  ;;  %4514 = vtanh.f32 %v1238_v20  ;;  %v3127_v12 = vadd.f32 %v3126_v50, %v3125_v46  ;;  %v1459_v20 = vld [vmem:[%s6065_s4 + $0xc0] sm:$0xff]  ;;  %4117 = vmatpush3.bf16.msra.mxu1 %v5357_v16  ;;  %v5373_v50 = vpack.c.bf16 %v1305_v39, %v1304_v34 }
 0x58f   :  { %4516 = vpow2.f32 %v2884_v6  ;;  %v1243_v27 = vadd.f32 %v3127_v12, %v5128_v37  ;;  %v5384_v12 = vpack.c.bf16 %v1460_v54, %v1459_v20  ;;  %4091 = vmatprep.subr.bf16.mxu0 %v5373_v50 }
 0x590   :  { %v4507_v29 = vpop.eup %4506  ;;  %4093 = vmatpush3.bf16.msra.mxu0 %v5373_v50 }
 0x591   :  { %v2885_v37 = vmul.f32 -1.442695, %v1243_v27  ;;  %4518 = vtanh.f32 %v1243_v27  ;;  %1106 = vrot.lane.b32.xlu1 %v4507_v29, %s4685_s27  ;;  %4119 = vmatprep.subr.bf16.mxu1 %v5384_v12  ;;  %v1306_v27 = vld [vmem:[%s6064_s2 + $0x60] sm:$0xff]  ;;  %v1307_v29 = vld [vmem:[%s6064_s2 + $0x68] sm:$0xff] }
 0x592   :  { %v4509_v41 = vpop.eup %4508  ;;  %v5402_v31 = vpack.c.bf16 %v1307_v29, %v1306_v27  ;;  %4121 = vmatpush3.bf16.msra.mxu1 %v5386_v18 }
 0x593   :  { %v4511_v25 = vpop.eup %4510  ;;  %v1093_v55 = vadd.f32 1.0, %v4509_v41  ;;  %4520 = vpow2.f32 %v2885_v37  ;;  %v1445_v37 = vld [vmem:[%s6065_s4 + $0x50] sm:$0xff]  ;;  %4123 = vmatprep.subr.bf16.mxu1 %v5414_v36 }
 0x594   :  { %v4513_v56 = vpop.eup %4512  ;;  %v1092_v57 = vadd.f32 1.0, %v4511_v25  ;;  %v5416_v40 = vpack.c.bf16 %v1446_v3, %v1445_v37  ;;  %4095 = vmatprep.subr.bf16.mxu0 %v5402_v31  ;;  %v1308_v41 = vld [vmem:[%s6064_s2 + $0x70] sm:$0xff]  ;;  %v1309_v25 = vld [vmem:[%s6064_s2 + $0x78] sm:$0xff] }
 0x595   :  { %4522 = vrcp.f32 %v1093_v55  ;;  %1104 = vrot.lane.b32.xlu1 %v4513_v56, %s4685_s27  ;;  %v1463_v55 = vld [vmem:[%s6065_s4 + $0xe0] sm:$0xff]  ;;  %4097 = vmatpush3.bf16.msra.mxu0 %v5402_v31  ;;  %v5431_v56 = vpack.c.bf16 %v1309_v25, %v1308_v41 }
 0x596   :  { %4524 = vrcp.f32 %v1092_v57  ;;  %v1464_v57 = vld [vmem:[%s6065_s4 + $0xe8] sm:$0xff]  ;;  %4125 = vmatpush3.bf16.msra.mxu1 %v5416_v40 }
 0x597   :  { %v4515_v13 = vpop.eup %4514  ;;  %v5443_v2 = vpack.c.bf16 %v1464_v57, %v1463_v55  ;;  %4099 = vmatprep.subr.bf16.mxu0 %v5431_v56 }
 0x599   :  { %v4517_v48 = vpop.eup %4516  ;;  %1266 = vrot.lane.b32.xlu1 %v4515_v13, %s4685_s27  ;;  %4127 = vmatprep.subr.bf16.mxu1 %v5443_v2  ;;  %v1466_v13 = vld [vmem:[%s6065_s4 + $0xf8] sm:$0xff] }
 0x59a   :  { %v1254_v10 = vadd.f32 1.0, %v4517_v48  ;;  %4101 = vmatpush3.bf16.msra.mxu0 %v5431_v56  ;;  %v5457_v28 = vpack.c.bf16 %v1466_v13, %v1465_v7  ;;  %4129 = vmatpush3.bf16.msra.mxu1 %v5445_v4 }
 0x59b   :  { %v4519_v19 = vpop.eup %4518  ;;  %4135 = vmatprep.subr.bf16.mxu0 %v5242_v42 }
 0x59c   :  { %4526 = vrcp.f32 %v1254_v10  ;;  %4131 = vmatprep.subr.bf16.mxu1 %v5457_v28 }
 0x59d   :  { %v4521_v46 = vpop.eup %4520  ;;  %1268 = vrot.lane.b32.xlu1 %v4519_v19, %s4685_s27 }
 0x59e   :  { %v1255_v6 = vadd.f32 1.0, %v4521_v46  ;;  %4133 = vmatpush3.bf16.msra.mxu1 %v5466_v58 }
 0x59f   :  { %v4523_v21 = vpop.eup %4522  ;;  %4167 = vmatprep.subr.bf16.mxu1 %v5267_v23 }
 0x5a0   :  { %v4525_v22 = vpop.eup %4524  ;;  %4528 = vrcp.f32 %v1255_v6  ;;  %1102 = vrot.lane.b32.xlu0 %v4523_v21, %s4684_s19 }
 0x5a1   :  { %1108 = vrot.lane.b32.xlu1 %v4525_v22, %s4686_s28 }
 0x5a4   :  { %1100 = vrot.lane.b32.xlu0 %v4525_v22, %s4684_s19 }
 0x5a6   :  { %v4527_v45 = vpop.eup %4526 }
 0x5a8   :  { %1262 = vrot.lane.b32.xlu0 %v4527_v45, %s4684_s19 }
 0x5aa   :  { %v4529_v48 = vpop.eup %4528 }
 0x5ab   :  { %1272 = vrot.lane.b32.xlu1 %v4529_v48, %s4686_s28 }
 0x5ac   :  { %1264 = vrot.lane.b32.xlu0 %v4529_v48, %s4684_s19 }
 0x5b0   :  { %1270 = vrot.lane.b32.xlu0 %v4527_v45, %s4686_s28 }
 0x5b4   :  { %1110 = vrot.lane.b32.xlu0 %v4523_v21, %s4686_s28 }
 0x603   :  { %v1107_v9 = vpop.permute.xlu1 %1106 }
 0x604   :  { %v1115_v34 = vmul.f32 %v4523_v21, %v1107_v9 }
 0x607   :  { %v1105_v63 = vpop.permute.xlu1 %1104 }
 0x608   :  { %v1114_v46 = vmul.f32 %v4525_v22, %v1105_v63 }
 0x60b   :  { %v1267_v39 = vpop.permute.xlu1 %1266 }
 0x60c   :  { %v1276_v27 = vmul.f32 %v4527_v45, %v1267_v39 }
 0x60f   :  { %v1269_v30 = vpop.permute.xlu1 %1268 }
 0x610   :  { %v1277_v32 = vmul.f32 %v4529_v48, %v1269_v30 }
 0x612   :  { %v1103_v10 = vpop.permute.xlu0 %1102 }
 0x613   :  { %v1113_v19 = vmul.f32 %v1103_v10, %v5214_v51  ;;  %v1109_v41 = vpop.permute.xlu1 %1108 }
 0x615   :  { %v5478_v59 = vadd.f32 %v1115_v34, %v1113_v19 }
 0x616   :  { %v1101_v20 = vpop.permute.xlu0 %1100 }
 0x617   :  { %v1112_v54 = vmul.f32 %v1101_v20, %v5216_v52 }
 0x619   :  { %v5480_v0 = vadd.f32 %v1114_v46, %v1112_v54 }
 0x61a   :  { %v1263_v6 = vpop.permute.xlu0 %1262 }
 0x61b   :  { %4530 = vtanh.f32 %v5480_v0  ;;  %v1274_v29 = vmul.f32 %v1263_v6, %v5221_v44 }
 0x61c   :  { %4532 = vtanh.f32 %v5478_v59 }
 0x61d   :  { %v5485_v51 = vadd.f32 %v1276_v27, %v1274_v29  ;;  %v1273_v45 = vpop.permute.xlu1 %1272 }
 0x61e   :  { %v1265_v21 = vpop.permute.xlu0 %1264 }
 0x61f   :  { %4534 = vtanh.f32 %v5485_v51  ;;  %v1275_v52 = vmul.f32 %v1265_v21, %v5225_v62 }
 0x621   :  { %v5489_v22 = vadd.f32 %v1277_v32, %v1275_v52 }
 0x622   :  { %v1271_v37 = vpop.permute.xlu0 %1270 }
 0x623   :  { %4536 = vtanh.f32 %v5489_v22 }
 0x625   :  { %v4531_v3 = vpop.eup %4530 }
 0x626   :  { %v4533_v25 = vpop.eup %4532  ;;  %v1111_v44 = vpop.permute.xlu0 %1110  ;;  %v1120_v55 = vmul.f32 %v4531_v3, %v1109_v41 }
 0x627   :  { %v1121_v57 = vmul.f32 %v4533_v25, %v1111_v44 }
 0x628   :  { %3650 = vmatprep.mubr.f32.mxu0 %v1120_v55 }
 0x629   :  { %v4535_v60 = vpop.eup %4534  ;;  %3651 = vmatmul.mubr.f32.vlgmr.msra.gmra.mrb[8].mxu0 %v1121_v57 }
 0x62a   :  { %v5492_v61 = vmul.f32 %v4535_v60, %v1271_v37  ;;  %4137 = vmatpush3.bf16.msra.mxu0 %v5242_v42 }
 0x62b   :  { %4139 = vmatprep.subr.bf16.mxu0 %v5256_v17 }
 0x62c   :  { %1538 = vmatprep.mubr.f32.mxu1 %v5492_v61 }
 0x62d   :  { %v4537_v62 = vpop.eup %4536  ;;  %1539 = vmatmul.mubr.f32.vlgmr.msra.gmra.mrb[12].mxu1 %v1120_v55 }
 0x62e   :  { %v5497_v7 = vmul.f32 %v4537_v62, %v1273_v45  ;;  %4141 = vmatpush3.bf16.msra.mxu0 %v5256_v17  ;;  %4169 = vmatpush3.bf16.msra.mxu1 %v5269_v24 }
 0x62f   :  { %4143 = vmatprep.subr.bf16.mxu0 %v5286_v35  ;;  %4171 = vmatprep.subr.bf16.mxu1 %v5297_v47 }
 0x630   :  { %1543 = vmatprep.mubr.f32.mxu1 %v5497_v7 }
 0x631   :  { %1544 = vmatmul.mubr.f32.gmra.mrb[14].mxu1 %v1121_v57 }
 0x632   :  { %4145 = vmatpush3.bf16.msra.mxu0 %v5286_v35  ;;  %4173 = vmatpush3.bf16.msra.mxu1 %v5299_v49 }
 0x633   :  { %4147 = vmatprep.subr.bf16.mxu0 %v5315_v1  ;;  %4175 = vmatprep.subr.bf16.mxu1 %v5326_v5 }
 0x636   :  { %4149 = vmatpush3.bf16.msra.mxu0 %v5315_v1  ;;  %4177 = vmatpush3.bf16.msra.mxu1 %v5328_v11 }
 0x637   :  { %4151 = vmatprep.subr.bf16.mxu0 %v5344_v53  ;;  %4179 = vmatprep.subr.bf16.mxu1 %v5355_v15 }
 0x63a   :  { %4153 = vmatpush3.bf16.msra.mxu0 %v5344_v53  ;;  %4181 = vmatpush3.bf16.msra.mxu1 %v5357_v16 }
 0x63b   :  { %4155 = vmatprep.subr.bf16.mxu0 %v5373_v50  ;;  %4183 = vmatprep.subr.bf16.mxu1 %v5384_v12 }
 0x63e   :  { %4157 = vmatpush3.bf16.msra.mxu0 %v5373_v50  ;;  %4185 = vmatpush3.bf16.msra.mxu1 %v5386_v18 }
 0x63f   :  { %4159 = vmatprep.subr.bf16.mxu0 %v5402_v31  ;;  %4187 = vmatprep.subr.bf16.mxu1 %v5414_v36 }
 0x642   :  { %4161 = vmatpush3.bf16.msra.mxu0 %v5402_v31  ;;  %4189 = vmatpush3.bf16.msra.mxu1 %v5416_v40 }
 0x643   :  { %4163 = vmatprep.subr.bf16.mxu0 %v5431_v56  ;;  %4191 = vmatprep.subr.bf16.mxu1 %v5443_v2 }
 0x646   :  { %4165 = vmatpush3.bf16.msra.mxu0 %v5431_v56  ;;  %4193 = vmatpush3.bf16.msra.mxu1 %v5445_v4 }
 0x647   :  { %4195 = vmatprep.subr.bf16.mxu1 %v5457_v28  ;;  %4199 = vmatprep.subr.bf16.mxu0 %v5242_v42 }
 0x64a   :  { %4197 = vmatpush3.bf16.msra.mxu1 %v5466_v58 }
 0x64b   :  { %4231 = vmatprep.subr.bf16.mxu1 %v5267_v23  ;;  %v5540_v23 = vld [vmem:[%s6067_s5] ss:$0 sm:$0xff] }
 0x6fc   :  { %v3652_v13 = vpop.f32.mrb[8].mxu0 }
 0x6fd   :  { %v4398_v26 = vadd.f32 %v5533_v38, %v3652_v13  ;;  %v1376_v48 = vpop.f32.mrb[9].mxu0 }
 0x6fe   :  { %v4399_v9 = vadd.f32 %v5533_v38, %v1376_v48 }
 0x6ff   :  { %v2887_v63 = vmul.f32 -1.442695, %v4398_v26  ;;  %4538 = vtanh.f32 %v4398_v26 }
 0x700   :  { %v2886_v10 = vmul.f32 -1.442695, %v4399_v9  ;;  %v3178_v19 = vpop.f32.mrb[12].mxu1 }
 0x701   :  { %4540 = vpow2.f32 %v2887_v63  ;;  %v3179_v34 = vpop.f32.mrb[13].mxu1 }
 0x702   :  { %4542 = vpow2.f32 %v2886_v10  ;;  %v3180_v39 = vadd.f32 %v3179_v34, %v3178_v19 }
 0x703   :  { %4544 = vtanh.f32 %v4399_v9 }
 0x704   :  { %v1541_v20 = vadd.f32 %v3180_v39, %v5540_v23  ;;  %v3181_v46 = vpop.f32.mrb[14].mxu1 }
 0x705   :  { %v3182_v54 = vpop.f32.mrb[15].mxu1 }
 0x706   :  { %v2889_v6 = vmul.f32 -1.442695, %v1541_v20  ;;  %4546 = vtanh.f32 %v1541_v20  ;;  %v3183_v27 = vadd.f32 %v3182_v54, %v3181_v46 }
 0x708   :  { %4548 = vpow2.f32 %v2889_v6  ;;  %v1546_v29 = vadd.f32 %v3183_v27, %v5540_v23 }
 0x709   :  { %v4539_v30 = vpop.eup %4538 }
 0x70a   :  { %v2890_v21 = vmul.f32 -1.442695, %v1546_v29  ;;  %4550 = vtanh.f32 %v1546_v29  ;;  %1409 = vrot.lane.b32.xlu1 %v4539_v30, %s4685_s27 }
 0x70b   :  { %v4541_v32 = vpop.eup %4540 }
 0x70c   :  { %v4543_v52 = vpop.eup %4542  ;;  %v1396_v37 = vadd.f32 1.0, %v4541_v32  ;;  %4552 = vpow2.f32 %v2890_v21 }
 0x70d   :  { %v4545_v3 = vpop.eup %4544  ;;  %v1395_v41 = vadd.f32 1.0, %v4543_v52 }
 0x70e   :  { %4554 = vrcp.f32 %v1396_v37  ;;  %1407 = vrot.lane.b32.xlu1 %v4545_v3, %s4685_s27 }
 0x70f   :  { %4556 = vrcp.f32 %v1395_v41 }
 0x710   :  { %v4547_v25 = vpop.eup %4546 }
 0x712   :  { %v4549_v44 = vpop.eup %4548  ;;  %1569 = vrot.lane.b32.xlu1 %v4547_v25, %s4685_s27 }
 0x713   :  { %v1557_v55 = vadd.f32 1.0, %v4549_v44 }
 0x714   :  { %v4551_v57 = vpop.eup %4550 }
 0x715   :  { %4558 = vrcp.f32 %v1557_v55 }
 0x716   :  { %v4553_v60 = vpop.eup %4552  ;;  %1571 = vrot.lane.b32.xlu1 %v4551_v57, %s4685_s27 }
 0x717   :  { %v1558_v62 = vadd.f32 1.0, %v4553_v60 }
 0x718   :  { %v4555_v45 = vpop.eup %4554 }
 0x719   :  { %v4557_v13 = vpop.eup %4556  ;;  %4560 = vrcp.f32 %v1558_v62  ;;  %1405 = vrot.lane.b32.xlu0 %v4555_v45, %s4684_s19 }
 0x71a   :  { %1411 = vrot.lane.b32.xlu1 %v4557_v13, %s4686_s28 }
 0x71d   :  { %1403 = vrot.lane.b32.xlu0 %v4557_v13, %s4684_s19 }
 0x71f   :  { %v4559_v26 = vpop.eup %4558 }
 0x721   :  { %1565 = vrot.lane.b32.xlu0 %v4559_v26, %s4684_s19 }
 0x723   :  { %v4561_v48 = vpop.eup %4560 }
 0x724   :  { %1575 = vrot.lane.b32.xlu1 %v4561_v48, %s4686_s28 }
 0x725   :  { %1567 = vrot.lane.b32.xlu0 %v4561_v48, %s4684_s19 }
 0x729   :  { %1573 = vrot.lane.b32.xlu0 %v4559_v26, %s4686_s28 }
 0x72d   :  { %1413 = vrot.lane.b32.xlu0 %v4555_v45, %s4686_s28 }
 0x77c   :  { %v1410_v9 = vpop.permute.xlu1 %1409 }
 0x77d   :  { %v1418_v34 = vmul.f32 %v4555_v45, %v1410_v9 }
 0x780   :  { %v1408_v63 = vpop.permute.xlu1 %1407 }
 0x781   :  { %v1417_v46 = vmul.f32 %v4557_v13, %v1408_v63 }
 0x784   :  { %v1570_v39 = vpop.permute.xlu1 %1569 }
 0x785   :  { %v1579_v30 = vmul.f32 %v4559_v26, %v1570_v39 }
 0x788   :  { %v1572_v32 = vpop.permute.xlu1 %1571 }
 0x789   :  { %v1580_v37 = vmul.f32 %v4561_v48, %v1572_v32 }
 0x78b   :  { %v1406_v10 = vpop.permute.xlu0 %1405 }
 0x78c   :  { %v1416_v19 = vmul.f32 %v1406_v10, %v5478_v59  ;;  %v1412_v44 = vpop.permute.xlu1 %1411 }
 0x78e   :  { %v5558_v6 = vadd.f32 %v1418_v34, %v1416_v19 }
 0x78f   :  { %v1404_v20 = vpop.permute.xlu0 %1403 }
 0x790   :  { %v1415_v54 = vmul.f32 %v1404_v20, %v5480_v0 }
 0x792   :  { %v5560_v27 = vadd.f32 %v1417_v46, %v1415_v54 }
 0x793   :  { %v1566_v29 = vpop.permute.xlu0 %1565 }
 0x794   :  { %4562 = vtanh.f32 %v5560_v27  ;;  %v1577_v21 = vmul.f32 %v1566_v29, %v5485_v51 }
 0x795   :  { %4564 = vtanh.f32 %v5558_v6 }
 0x796   :  { %v5565_v59 = vadd.f32 %v1579_v30, %v1577_v21  ;;  %v1576_v13 = vpop.permute.xlu1 %1575 }
 0x797   :  { %v1568_v52 = vpop.permute.xlu0 %1567 }
 0x798   :  { %4566 = vtanh.f32 %v5565_v59  ;;  %v1578_v0 = vmul.f32 %v1568_v52, %v5489_v22 }
 0x79a   :  { %v5569_v3 = vadd.f32 %v1580_v37, %v1578_v0 }
 0x79b   :  { %v1574_v41 = vpop.permute.xlu0 %1573 }
 0x79c   :  { %4568 = vtanh.f32 %v5569_v3 }
 0x79e   :  { %v4563_v25 = vpop.eup %4562 }
 0x79f   :  { %v4565_v55 = vpop.eup %4564  ;;  %v1414_v51 = vpop.permute.xlu0 %1413  ;;  %v1423_v57 = vmul.f32 %v4563_v25, %v1412_v44 }
 0x7a0   :  { %v1424_v60 = vmul.f32 %v4565_v55, %v1414_v51 }
 0x7a1   :  { %3685 = vmatprep.mubr.f32.mxu0 %v1423_v57 }
 0x7a2   :  { %v4567_v62 = vpop.eup %4566  ;;  %3686 = vmatmul.mubr.f32.vlgmr.msra.gmra.mrb[10].mxu0 %v1424_v60 }
 0x7a3   :  { %v5572_v45 = vmul.f32 %v4567_v62, %v1574_v41  ;;  %4201 = vmatpush3.bf16.msra.mxu0 %v5242_v42 }
 0x7a4   :  { %4203 = vmatprep.subr.bf16.mxu0 %v5256_v17 }
 0x7a5   :  { %1841 = vmatprep.mubr.f32.mxu1 %v5572_v45 }
 0x7a6   :  { %v4569_v22 = vpop.eup %4568  ;;  %1842 = vmatmul.mubr.f32.vlgmr.msra.gmra.mrb[16].mxu1 %v1423_v57 }
 0x7a7   :  { %v5577_v26 = vmul.f32 %v4569_v22, %v1576_v13  ;;  %4205 = vmatpush3.bf16.msra.mxu0 %v5256_v17  ;;  %4233 = vmatpush3.bf16.msra.mxu1 %v5269_v24 }
 0x7a8   :  { %4207 = vmatprep.subr.bf16.mxu0 %v5286_v35  ;;  %4235 = vmatprep.subr.bf16.mxu1 %v5297_v47 }
 0x7a9   :  { %1846 = vmatprep.mubr.f32.mxu1 %v5577_v26 }
 0x7aa   :  { %1847 = vmatmul.mubr.f32.gmra.mrb[18].mxu1 %v1424_v60 }
 0x7ab   :  { %4209 = vmatpush3.bf16.msra.mxu0 %v5286_v35  ;;  %4237 = vmatpush3.bf16.msra.mxu1 %v5299_v49 }
 0x7ac   :  { %4211 = vmatprep.subr.bf16.mxu0 %v5315_v1  ;;  %4239 = vmatprep.subr.bf16.mxu1 %v5326_v5 }
 0x7af   :  { %4213 = vmatpush3.bf16.msra.mxu0 %v5315_v1  ;;  %4241 = vmatpush3.bf16.msra.mxu1 %v5328_v11 }
 0x7b0   :  { %4215 = vmatprep.subr.bf16.mxu0 %v5344_v53  ;;  %4243 = vmatprep.subr.bf16.mxu1 %v5355_v15 }
 0x7b3   :  { %4217 = vmatpush3.bf16.msra.mxu0 %v5344_v53  ;;  %4245 = vmatpush3.bf16.msra.mxu1 %v5357_v16 }
 0x7b4   :  { %4219 = vmatprep.subr.bf16.mxu0 %v5373_v50  ;;  %4247 = vmatprep.subr.bf16.mxu1 %v5384_v12 }
 0x7b7   :  { %4221 = vmatpush3.bf16.msra.mxu0 %v5373_v50  ;;  %4249 = vmatpush3.bf16.msra.mxu1 %v5386_v18 }
 0x7b8   :  { %4223 = vmatprep.subr.bf16.mxu0 %v5402_v31  ;;  %4251 = vmatprep.subr.bf16.mxu1 %v5414_v36 }
 0x7bb   :  { %4225 = vmatpush3.bf16.msra.mxu0 %v5402_v31  ;;  %4253 = vmatpush3.bf16.msra.mxu1 %v5416_v40 }
 0x7bc   :  { %4227 = vmatprep.subr.bf16.mxu0 %v5431_v56  ;;  %4255 = vmatprep.subr.bf16.mxu1 %v5443_v2 }
 0x7bf   :  { %4229 = vmatpush3.bf16.msra.mxu0 %v5431_v56  ;;  %4257 = vmatpush3.bf16.msra.mxu1 %v5445_v4 }
 0x7c0   :  { %4259 = vmatprep.subr.bf16.mxu1 %v5457_v28 }
 0x7c3   :  { %4261 = vmatpush3.bf16.msra.mxu1 %v5466_v58 }
 0x875   :  { %v3687_v42 = vpop.f32.mrb[10].mxu0 }
 0x876   :  { %v4400_v17 = vadd.f32 %v5533_v38, %v3687_v42  ;;  %v1679_v24 = vpop.f32.mrb[11].mxu0 }
 0x877   :  { %v4401_v35 = vadd.f32 %v5533_v38, %v1679_v24 }
 0x878   :  { %v2892_v47 = vmul.f32 -1.442695, %v4400_v17  ;;  %4570 = vtanh.f32 %v4400_v17 }
 0x879   :  { %v2891_v49 = vmul.f32 -1.442695, %v4401_v35  ;;  %v3234_v1 = vpop.f32.mrb[16].mxu1 }
 0x87a   :  { %4572 = vpow2.f32 %v2892_v47  ;;  %v3235_v5 = vpop.f32.mrb[17].mxu1 }
 0x87b   :  { %4574 = vpow2.f32 %v2891_v49  ;;  %v3236_v11 = vadd.f32 %v3235_v5, %v3234_v1 }
 0x87c   :  { %4576 = vtanh.f32 %v4401_v35 }
 0x87d   :  { %v1844_v53 = vadd.f32 %v3236_v11, %v5540_v23  ;;  %v3237_v15 = vpop.f32.mrb[18].mxu1 }
 0x87e   :  { %v3238_v16 = vpop.f32.mrb[19].mxu1 }
 0x87f   :  { %v2894_v50 = vmul.f32 -1.442695, %v1844_v53  ;;  %4578 = vtanh.f32 %v1844_v53  ;;  %v3239_v12 = vadd.f32 %v3238_v16, %v3237_v15 }
 0x881   :  { %4580 = vpow2.f32 %v2894_v50  ;;  %v1849_v18 = vadd.f32 %v3239_v12, %v5540_v23 }
 0x882   :  { %v4571_v31 = vpop.eup %4570 }
 0x883   :  { %v2895_v36 = vmul.f32 -1.442695, %v1849_v18  ;;  %4582 = vtanh.f32 %v1849_v18  ;;  %1712 = vrot.lane.b32.xlu1 %v4571_v31, %s4685_s27 }
 0x884   :  { %v4573_v40 = vpop.eup %4572 }
 0x885   :  { %v4575_v56 = vpop.eup %4574  ;;  %v1699_v2 = vadd.f32 1.0, %v4573_v40  ;;  %4584 = vpow2.f32 %v2895_v36 }
 0x886   :  { %v4577_v4 = vpop.eup %4576  ;;  %v1698_v28 = vadd.f32 1.0, %v4575_v56  ;;  %v2203_v56 = vld [vmem:[%s6064_s2] sm:$0xff] }
 0x887   :  { %4586 = vrcp.f32 %v1699_v2  ;;  %1710 = vrot.lane.b32.xlu1 %v4577_v4, %s4685_s27  ;;  %v2204_v2 = vld [vmem:[%s6064_s2 + $0x8] sm:$0xff] }
 0x888   :  { %4588 = vrcp.f32 %v1698_v28  ;;  %v4262_v28 = vpack.c.bf16 %v2204_v2, %v2203_v56  ;;  %v2367_v2 = vld [vmem:[%s6065_s4 + $0xb8] sm:$0xff] }
 0x889   :  { %v4579_v58 = vpop.eup %4578 }
 0x88a   :  { %4263 = vmatprep.subr.bf16.mxu0 %v4262_v28 }
 0x88b   :  { %v4581_v48 = vpop.eup %4580  ;;  %1872 = vrot.lane.b32.xlu1 %v4579_v58, %s4685_s27 }
 0x88c   :  { %v1860_v9 = vadd.f32 1.0, %v4581_v48 }
 0x88d   :  { %v4583_v63 = vpop.eup %4582 }
 0x88e   :  { %4590 = vrcp.f32 %v1860_v9 }
 0x88f   :  { %v4585_v10 = vpop.eup %4584  ;;  %1874 = vrot.lane.b32.xlu1 %v4583_v63, %s4685_s27  ;;  %v2205_v63 = vld [vmem:[%s6064_s2 + $0x10] sm:$0xff] }
 0x890   :  { %v1861_v19 = vadd.f32 1.0, %v4585_v10  ;;  %v2206_v10 = vld [vmem:[%s6064_s2 + $0x18] sm:$0xff] }
 0x891   :  { %v4587_v34 = vpop.eup %4586 }
 0x892   :  { %v4589_v39 = vpop.eup %4588  ;;  %4592 = vrcp.f32 %v1861_v19  ;;  %1708 = vrot.lane.b32.xlu0 %v4587_v34, %s4684_s19  ;;  %v2360_v19 = vld [vmem:[%s6065_s4 + $0x80] sm:$0xff] }
 0x893   :  { %1714 = vrot.lane.b32.xlu1 %v4589_v39, %s4686_s28 }
 0x896   :  { %1706 = vrot.lane.b32.xlu0 %v4589_v39, %s4684_s19 }
 0x898   :  { %v4591_v20 = vpop.eup %4590 }
 0x89a   :  { %1868 = vrot.lane.b32.xlu0 %v4591_v20, %s4684_s19 }
 0x89c   :  { %v4593_v46 = vpop.eup %4592 }
 0x89d   :  { %1878 = vrot.lane.b32.xlu1 %v4593_v46, %s4686_s28 }
 0x89e   :  { %1870 = vrot.lane.b32.xlu0 %v4593_v46, %s4684_s19 }
 0x8a2   :  { %1876 = vrot.lane.b32.xlu0 %v4591_v20, %s4686_s28 }
 0x8a6   :  { %1716 = vrot.lane.b32.xlu0 %v4587_v34, %s4686_s28 }
 0x8f5   :  { %v1713_v54 = vpop.permute.xlu1 %1712 }
 0x8f6   :  { %v1721_v32 = vmul.f32 %v4587_v34, %v1713_v54  ;;  %v2344_v54 = vld [vmem:[%s6065_s4] sm:$0xff] }
 0x8f9   :  { %v1711_v29 = vpop.permute.xlu1 %1710 }
 0x8fa   :  { %v1720_v0 = vmul.f32 %v4589_v39, %v1711_v29  ;;  %v2345_v29 = vld [vmem:[%s6065_s4 + $0x8] sm:$0xff] }
 0x8fd   :  { %v1873_v52 = vpop.permute.xlu1 %1872 }
 0x8fe   :  { %v1882_v51 = vmul.f32 %v4591_v20, %v1873_v52  ;;  %v4266_v20 = vpack.c.bf16 %v2206_v10, %v2205_v63  ;;  %v2213_v10 = vld [vmem:[%s6064_s2 + $0x50] sm:$0xff] }
 0x901   :  { %v1875_v60 = vpop.permute.xlu1 %1874 }
 0x902   :  { %v1883_v22 = vmul.f32 %v4593_v46, %v1875_v60  ;;  %v2361_v46 = vld [vmem:[%s6065_s4 + $0x88] sm:$0xff]  ;;  %v2347_v60 = vld [vmem:[%s6065_s4 + $0x18] sm:$0xff] }
 0x904   :  { %v1709_v30 = vpop.permute.xlu0 %1708 }
 0x905   :  { %v1719_v21 = vmul.f32 %v1709_v30, %v5558_v6  ;;  %v1715_v24 = vpop.permute.xlu1 %1714  ;;  %v5673_v30 = vpack.c.bf16 %v2361_v46, %v2360_v19  ;;  %v2214_v19 = vld [vmem:[%s6064_s2 + $0x58] sm:$0xff]  ;;  %v2369_v46 = vld [vmem:[%s6065_s4 + $0xc8] sm:$0xff] }
 0x907   :  { %v5626_v25 = vadd.f32 %v1721_v32, %v1719_v21  ;;  %v5675_v21 = vpack.c.bf16 %v2345_v29, %v2344_v54  ;;  %4295 = vmatprep.subr.bf16.mxu1 %v5673_v30  ;;  %v2352_v54 = vld [vmem:[%s6065_s4 + $0x40] sm:$0xff]  ;;  %v2353_v29 = vld [vmem:[%s6065_s4 + $0x48] sm:$0xff] }
 0x908   :  { %v1707_v37 = vpop.permute.xlu0 %1706 }
 0x909   :  { %v1718_v41 = vmul.f32 %v1707_v37, %v5560_v27  ;;  %v2207_v37 = vld [vmem:[%s6064_s2 + $0x20] sm:$0xff] }
 0x90b   :  { %v5628_v44 = vadd.f32 %v1720_v0, %v1718_v41  ;;  %v2208_v0 = vld [vmem:[%s6064_s2 + $0x28] sm:$0xff]  ;;  %v2362_v41 = vld [vmem:[%s6065_s4 + $0x90] sm:$0xff] }
 0x90c   :  { %v1869_v55 = vpop.permute.xlu0 %1868 }
 0x90d   :  { %4594 = vtanh.f32 %v5628_v44  ;;  %v1880_v57 = vmul.f32 %v1869_v55, %v5565_v59 }
 0x90e   :  { %4596 = vtanh.f32 %v5626_v25 }
 0x90f   :  { %v5633_v6 = vadd.f32 %v1882_v51, %v1880_v57  ;;  %v2363_v51 = vld [vmem:[%s6065_s4 + $0x98] sm:$0xff]  ;;  %v2346_v57 = vld [vmem:[%s6065_s4 + $0x10] sm:$0xff] }
 0x910   :  { %v1871_v62 = vpop.permute.xlu0 %1870 }
 0x911   :  { %4598 = vtanh.f32 %v5633_v6  ;;  %v1881_v27 = vmul.f32 %v1871_v62, %v5569_v3  ;;  %v1879_v3 = vpop.permute.xlu1 %1878 }
 0x913   :  { %v5637_v13 = vadd.f32 %v1883_v22, %v1881_v27  ;;  %v5699_v22 = vpack.c.bf16 %v2363_v51, %v2362_v41  ;;  %v5701_v27 = vpack.c.bf16 %v2347_v60, %v2346_v57  ;;  %v2370_v51 = vld [vmem:[%s6065_s4 + $0xd0] sm:$0xff]  ;;  %v2371_v60 = vld [vmem:[%s6065_s4 + $0xd8] sm:$0xff] }
 0x914   :  { %v1877_v42 = vpop.permute.xlu0 %1876 }
 0x915   :  { %4600 = vtanh.f32 %v5637_v13 }
 0x917   :  { %v4595_v17 = vpop.eup %4594 }
 0x918   :  { %v4597_v35 = vpop.eup %4596  ;;  %v1717_v59 = vpop.permute.xlu0 %1716  ;;  %v1726_v47 = vmul.f32 %v4595_v17, %v1715_v24 }
 0x919   :  { %v1727_v49 = vmul.f32 %v4597_v35, %v1717_v59  ;;  %v2209_v59 = vld [vmem:[%s6064_s2 + $0x30] sm:$0xff] }
 0x91a   :  { %3720 = vmatprep.mubr.f32.mxu0 %v1726_v47 }
 0x91b   :  { %v4599_v1 = vpop.eup %4598  ;;  %3721 = vmatmul.mubr.f32.vlgmr.msra.gmra.mrb[12].mxu0 %v1727_v49 }
 0x91c   :  { %v5640_v5 = vmul.f32 %v4599_v1, %v1877_v42  ;;  %4265 = vmatpush3.bf16.msra.mxu0 %v4262_v28  ;;  %v2351_v28 = vld [vmem:[%s6065_s4 + $0x38] sm:$0xff] }
 0x91d   :  { %4267 = vmatprep.subr.bf16.mxu0 %v4266_v20 }
 0x91e   :  { %2144 = vmatprep.mubr.f32.mxu1 %v5640_v5 }
 0x91f   :  { %v4601_v11 = vpop.eup %4600  ;;  %2145 = vmatmul.mubr.f32.vlgmr.msra.gmra.mrb[20].mxu1 %v1726_v47  ;;  %v2210_v47 = vld [vmem:[%s6064_s2 + $0x38] sm:$0xff] }
 0x920   :  { %v5643_v53 = vmul.f32 %v4601_v11, %v1879_v3  ;;  %4269 = vmatpush3.bf16.msra.mxu0 %v4266_v20  ;;  %4297 = vmatpush3.bf16.msra.mxu1 %v5675_v21  ;;  %v4274_v1 = vpack.c.bf16 %v2210_v47, %v2209_v59  ;;  %v2365_v11 = vld [vmem:[%s6065_s4 + $0xa8] sm:$0xff]  ;;  %v2348_v3 = vld [vmem:[%s6065_s4 + $0x20] sm:$0xff]  ;;  %v4282_v20 = vpack.c.bf16 %v2214_v19, %v2213_v10  ;;  %v2218_v59 = vld [vmem:[%s6064_s2 + $0x78] sm:$0xff] }
 0x921   :  { %4299 = vmatprep.subr.bf16.mxu1 %v5699_v22  ;;  %v2372_v47 = vld [vmem:[%s6065_s4 + $0xe0] sm:$0xff] }
 0x922   :  { %2149 = vmatprep.mubr.f32.mxu1 %v5643_v53 }
 0x923   :  { %2150 = vmatmul.mubr.f32.gmra.mrb[22].mxu1 %v1727_v49  ;;  %v2364_v49 = vld [vmem:[%s6065_s4 + $0xa0] sm:$0xff] }
 0x924   :  { %4301 = vmatpush3.bf16.msra.mxu1 %v5701_v27 }
 0x9ee   :  { %v3722_v15 = vpop.f32.mrb[12].mxu0 }
 0x9ef   :  { %v4402_v16 = vadd.f32 %v5533_v38, %v3722_v15  ;;  %v1982_v50 = vpop.f32.mrb[13].mxu0  ;;  %v2349_v15 = vld [vmem:[%s6065_s4 + $0x28] sm:$0xff] }
 0x9f0   :  { %v4403_v12 = vadd.f32 %v5533_v38, %v1982_v50  ;;  %v5726_v50 = vpack.c.bf16 %v2349_v15, %v2348_v3  ;;  %v2357_v3 = vld [vmem:[%s6065_s4 + $0x68] sm:$0xff] }
 0x9f1   :  { %v2897_v18 = vmul.f32 -1.442695, %v4402_v16  ;;  %4602 = vtanh.f32 %v4402_v16  ;;  %v5724_v16 = vpack.c.bf16 %v2365_v11, %v2364_v49  ;;  %v2356_v11 = vld [vmem:[%s6065_s4 + $0x60] sm:$0xff] }
 0x9f2   :  { %v2896_v31 = vmul.f32 -1.442695, %v4403_v12  ;;  %v3290_v36 = vpop.f32.mrb[20].mxu1 }
 0x9f3   :  { %4604 = vpow2.f32 %v2897_v18  ;;  %v3291_v40 = vpop.f32.mrb[21].mxu1  ;;  %4303 = vmatprep.subr.bf16.mxu1 %v5724_v16  ;;  %v2211_v18 = vld [vmem:[%s6064_s2 + $0x40] sm:$0xff] }
 0x9f4   :  { %4606 = vpow2.f32 %v2896_v31  ;;  %v3292_v4 = vadd.f32 %v3291_v40, %v3290_v36  ;;  %v2212_v31 = vld [vmem:[%s6064_s2 + $0x48] sm:$0xff]  ;;  %v2366_v36 = vld [vmem:[%s6065_s4 + $0xb0] sm:$0xff]  ;;  %4305 = vmatpush3.bf16.msra.mxu1 %v5726_v50 }
 0x9f5   :  { %4608 = vtanh.f32 %v4403_v12  ;;  %v4278_v56 = vpack.c.bf16 %v2212_v31, %v2211_v18  ;;  %v5827_v18 = vpack.c.bf16 %v2357_v3, %v2356_v11  ;;  %v2374_v31 = vld [vmem:[%s6065_s4 + $0xf0] sm:$0xff] }
 0x9f6   :  { %v2147_v58 = vadd.f32 %v3292_v4, %v5540_v23  ;;  %v3293_v48 = vpop.f32.mrb[22].mxu1  ;;  %v2350_v4 = vld [vmem:[%s6065_s4 + $0x30] sm:$0xff] }
 0x9f7   :  { %v3294_v9 = vpop.f32.mrb[23].mxu1 }
 0x9f8   :  { %v2899_v34 = vmul.f32 -1.442695, %v2147_v58  ;;  %4610 = vtanh.f32 %v2147_v58  ;;  %v3295_v39 = vadd.f32 %v3294_v9, %v3293_v48  ;;  %v5749_v48 = vpack.c.bf16 %v2367_v2, %v2366_v36  ;;  %v2375_v36 = vld [vmem:[%s6065_s4 + $0xf8] sm:$0xff] }
 0x9f9   :  { %v5751_v9 = vpack.c.bf16 %v2351_v28, %v2350_v4  ;;  %v2359_v2 = vld [vmem:[%s6065_s4 + $0x78] sm:$0xff] }
 0x9fa   :  { %4612 = vpow2.f32 %v2899_v34  ;;  %v2152_v32 = vadd.f32 %v3295_v39, %v5540_v23  ;;  %v4270_v23 = vpack.c.bf16 %v2208_v0, %v2207_v37  ;;  %4307 = vmatprep.subr.bf16.mxu1 %v5749_v48  ;;  %v2368_v34 = vld [vmem:[%s6065_s4 + $0xc0] sm:$0xff]  ;;  %v5776_v37 = vpack.c.bf16 %v2353_v29, %v2352_v54 }
 0x9fb   :  { %v4603_v52 = vpop.eup %4602  ;;  %4309 = vmatpush3.bf16.msra.mxu1 %v5751_v9 }
 0x9fc   :  { %v2900_v55 = vmul.f32 -1.442695, %v2152_v32  ;;  %4614 = vtanh.f32 %v2152_v32  ;;  %2015 = vrot.lane.b32.xlu1 %v4603_v52, %s4685_s27  ;;  %4271 = vmatprep.subr.bf16.mxu0 %v4270_v23  ;;  %v5774_v52 = vpack.c.bf16 %v2369_v46, %v2368_v34 }
 0x9fd   :  { %v4605_v62 = vpop.eup %4604  ;;  %4273 = vmatpush3.bf16.msra.mxu0 %v4270_v23  ;;  %v2216_v23 = vld [vmem:[%s6064_s2 + $0x68] sm:$0xff] }
 0x9fe   :  { %v4607_v42 = vpop.eup %4606  ;;  %v2002_v17 = vadd.f32 1.0, %v4605_v62  ;;  %4616 = vpow2.f32 %v2900_v55  ;;  %4275 = vmatprep.subr.bf16.mxu0 %v4274_v1  ;;  %4311 = vmatprep.subr.bf16.mxu1 %v5774_v52  ;;  %v2215_v55 = vld [vmem:[%s6064_s2 + $0x60] sm:$0xff]  ;;  %v2354_v62 = vld [vmem:[%s6065_s4 + $0x50] sm:$0xff] }
 0x9ff   :  { %v4609_v24 = vpop.eup %4608  ;;  %v2001_v35 = vadd.f32 1.0, %v4607_v42  ;;  %v4286_v57 = vpack.c.bf16 %v2216_v23, %v2215_v55  ;;  %v2355_v42 = vld [vmem:[%s6065_s4 + $0x58] sm:$0xff]  ;;  %4313 = vmatpush3.bf16.msra.mxu1 %v5776_v37 }
 0xa00   :  { %4618 = vrcp.f32 %v2002_v17  ;;  %2013 = vrot.lane.b32.xlu1 %v4609_v24, %s4685_s27  ;;  %v5800_v17 = vpack.c.bf16 %v2371_v60, %v2370_v51  ;;  %v5802_v24 = vpack.c.bf16 %v2355_v42, %v2354_v62 }
 0xa01   :  { %4620 = vrcp.f32 %v2001_v35  ;;  %4277 = vmatpush3.bf16.msra.mxu0 %v4274_v1  ;;  %v2217_v35 = vld [vmem:[%s6064_s2 + $0x70] sm:$0xff]  ;;  %v2373_v1 = vld [vmem:[%s6065_s4 + $0xe8] sm:$0xff] }
 0xa02   :  { %v4611_v12 = vpop.eup %4610  ;;  %4279 = vmatprep.subr.bf16.mxu0 %v4278_v56  ;;  %4315 = vmatprep.subr.bf16.mxu1 %v5800_v17  ;;  %v4290_v49 = vpack.c.bf16 %v2218_v59, %v2217_v35 }
 0xa03   :  { %4317 = vmatpush3.bf16.msra.mxu1 %v5802_v24 }
 0xa04   :  { %v4613_v40 = vpop.eup %4612  ;;  %2175 = vrot.lane.b32.xlu1 %v4611_v12, %s4685_s27  ;;  %v5825_v12 = vpack.c.bf16 %v2373_v1, %v2372_v47 }
 0xa05   :  { %v2163_v58 = vadd.f32 1.0, %v4613_v40  ;;  %4281 = vmatpush3.bf16.msra.mxu0 %v4278_v56  ;;  %v5837_v40 = vpack.c.bf16 %v2375_v36, %v2374_v31  ;;  %v2358_v56 = vld [vmem:[%s6065_s4 + $0x70] sm:$0xff] }
 0xa06   :  { %v4615_v63 = vpop.eup %4614  ;;  %4283 = vmatprep.subr.bf16.mxu0 %v4282_v20  ;;  %4319 = vmatprep.subr.bf16.mxu1 %v5825_v12  ;;  %v5846_v28 = vpack.c.bf16 %v2359_v2, %v2358_v56 }
 0xa07   :  { %4622 = vrcp.f32 %v2163_v58  ;;  %4321 = vmatpush3.bf16.msra.mxu1 %v5827_v18 }
 0xa08   :  { %v4617_v39 = vpop.eup %4616  ;;  %2177 = vrot.lane.b32.xlu1 %v4615_v63, %s4685_s27  ;;  %4323 = vmatprep.subr.bf16.mxu1 %v5837_v40 }
 0xa09   :  { %v2164_v32 = vadd.f32 1.0, %v4617_v39  ;;  %4285 = vmatpush3.bf16.msra.mxu0 %v4282_v20 }
 0xa0a   :  { %v4619_v0 = vpop.eup %4618  ;;  %4287 = vmatprep.subr.bf16.mxu0 %v4286_v57 }
 0xa0b   :  { %v4621_v41 = vpop.eup %4620  ;;  %4624 = vrcp.f32 %v2164_v32  ;;  %2011 = vrot.lane.b32.xlu0 %v4619_v0, %s4684_s19  ;;  %4325 = vmatpush3.bf16.msra.mxu1 %v5846_v28 }
 0xa0c   :  { %2017 = vrot.lane.b32.xlu1 %v4621_v41, %s4686_s28  ;;  %4327 = vmatprep.subr.bf16.mxu1 %v5673_v30 }
 0xa0d   :  { %4289 = vmatpush3.bf16.msra.mxu0 %v4286_v57 }
 0xa0e   :  { %4291 = vmatprep.subr.bf16.mxu0 %v4290_v49 }
 0xa0f   :  { %2009 = vrot.lane.b32.xlu0 %v4621_v41, %s4684_s19 }
 0xa11   :  { %v4623_v15 = vpop.eup %4622  ;;  %4293 = vmatpush3.bf16.msra.mxu0 %v4290_v49 }
 0xa13   :  { %2171 = vrot.lane.b32.xlu0 %v4623_v15, %s4684_s19 }
 0xa15   :  { %v4625_v4 = vpop.eup %4624 }
 0xa16   :  { %2181 = vrot.lane.b32.xlu1 %v4625_v4, %s4686_s28 }
 0xa17   :  { %2173 = vrot.lane.b32.xlu0 %v4625_v4, %s4684_s19 }
 0xa1b   :  { %2179 = vrot.lane.b32.xlu0 %v4623_v15, %s4686_s28 }
 0xa1f   :  { %2019 = vrot.lane.b32.xlu0 %v4619_v0, %s4686_s28 }
 0xa6e   :  { %v2016_v58 = vpop.permute.xlu1 %2015 }
 0xa6f   :  { %v2024_v34 = vmul.f32 %v4619_v0, %v2016_v58 }
 0xa72   :  { %v2014_v63 = vpop.permute.xlu1 %2013 }
 0xa73   :  { %v2023_v46 = vmul.f32 %v4621_v41, %v2014_v63 }
 0xa76   :  { %v2176_v39 = vpop.permute.xlu1 %2175 }
 0xa77   :  { %v2185_v55 = vmul.f32 %v4623_v15, %v2176_v39 }
 0xa7a   :  { %v2178_v51 = vpop.permute.xlu1 %2177 }
 0xa7b   :  { %v2186_v57 = vmul.f32 %v4625_v4, %v2178_v51  ;;  %v2681_v51 = vld [vmem:[%s6068_s6 + $0x8] sm:$0xff] }
 0xa7d   :  { %v2012_v10 = vpop.permute.xlu0 %2011 }
 0xa7e   :  { %v2022_v19 = vmul.f32 %v2012_v10, %v5626_v25  ;;  %v2018_v42 = vpop.permute.xlu1 %2017 }
 0xa80   :  { %v5857_v29 = vadd.f32 %v2024_v34, %v2022_v19 }
 0xa81   :  { %v2010_v20 = vpop.permute.xlu0 %2009 }
 0xa82   :  { %v2021_v54 = vmul.f32 %v2010_v20, %v5628_v44 }
 0xa84   :  { %v5859_v32 = vadd.f32 %v2023_v46, %v2021_v54 }
 0xa85   :  { %v2172_v30 = vpop.permute.xlu0 %2171 }
 0xa86   :  { %4626 = vtanh.f32 %v5859_v32  ;;  %v2183_v23 = vmul.f32 %v2172_v30, %v5633_v6 }
 0xa87   :  { %4628 = vtanh.f32 %v5857_v29 }
 0xa88   :  { %v5864_v25 = vadd.f32 %v2185_v55, %v2183_v23  ;;  %v2680_v23 = vld [vmem:[%s6068_s6] sm:$0xff] }
 0xa89   :  { %v2174_v0 = vpop.permute.xlu0 %2173 }
 0xa8a   :  { %4630 = vtanh.f32 %v5864_v25  ;;  %v2184_v44 = vmul.f32 %v2174_v0, %v5637_v13  ;;  %v2182_v13 = vpop.permute.xlu1 %2181  ;;  %v4358_v0 = vpack.c.bf16 %v2681_v51, %v2680_v23  ;;  %v2694_v51 = vld [vmem:[%s6068_s6 + $0x70] sm:$0xff] }
 0xa8c   :  { %v5868_v41 = vadd.f32 %v2186_v57, %v2184_v44 }
 0xa8d   :  { %v2180_v60 = vpop.permute.xlu0 %2179 }
 0xa8e   :  { %4632 = vtanh.f32 %v5868_v41 }
 0xa90   :  { %v4627_v62 = vpop.eup %4626 }
 0xa91   :  { %v4629_v35 = vpop.eup %4628  ;;  %v2020_v6 = vpop.permute.xlu0 %2019  ;;  %v2029_v59 = vmul.f32 %v4627_v62, %v2018_v42 }
 0xa92   :  { %v2030_v47 = vmul.f32 %v4629_v35, %v2020_v6 }
 0xa93   :  { %3755 = vmatprep.mubr.f32.mxu0 %v2029_v59 }
 0xa94   :  { %v4631_v49 = vpop.eup %4630  ;;  %3756 = vmatmul.mubr.f32.vlgmr.msra.gmra.mrb[14].mxu0 %v2030_v47 }
 0xa95   :  { %v5871_v1 = vmul.f32 %v4631_v49, %v2180_v60 }
 0xa97   :  { %2447 = vmatprep.mubr.f32.mxu1 %v5871_v1 }
 0xa98   :  { %v4633_v11 = vpop.eup %4632  ;;  %2448 = vmatmul.mubr.f32.vlgmr.msra.gmra.mrb[24].mxu1 %v2029_v59 }
 0xa99   :  { %v5874_v3 = vmul.f32 %v4633_v11, %v2182_v13  ;;  %4329 = vmatpush3.bf16.msra.mxu1 %v5675_v21 }
 0xa9a   :  { %4331 = vmatprep.subr.bf16.mxu1 %v5699_v22 }
 0xa9b   :  { %2452 = vmatprep.mubr.f32.mxu1 %v5874_v3 }
 0xa9c   :  { %2453 = vmatmul.mubr.f32.gmra.mrb[26].mxu1 %v2030_v47 }
 0xa9d   :  { %4333 = vmatpush3.bf16.msra.mxu1 %v5701_v27 }
 0xa9e   :  { %4335 = vmatprep.subr.bf16.mxu1 %v5724_v16 }
 0xaa1   :  { %4337 = vmatpush3.bf16.msra.mxu1 %v5726_v50 }
 0xaa2   :  { %4339 = vmatprep.subr.bf16.mxu1 %v5749_v48 }
 0xaa5   :  { %4341 = vmatpush3.bf16.msra.mxu1 %v5751_v9 }
 0xaa6   :  { %4343 = vmatprep.subr.bf16.mxu1 %v5774_v52  ;;  %v5897_v52 = vld [vmem:[%s6067_s5] ss:$0 sm:$0xff] }
 0xaa9   :  { %4345 = vmatpush3.bf16.msra.mxu1 %v5776_v37 }
 0xaaa   :  { %4347 = vmatprep.subr.bf16.mxu1 %v5800_v17 }
 0xaad   :  { %4349 = vmatpush3.bf16.msra.mxu1 %v5802_v24 }
 0xaae   :  { %4351 = vmatprep.subr.bf16.mxu1 %v5825_v12 }
 0xab1   :  { %4353 = vmatpush3.bf16.msra.mxu1 %v5827_v18 }
 0xab2   :  { %4355 = vmatprep.subr.bf16.mxu1 %v5837_v40 }
 0xab5   :  { %4357 = vmatpush3.bf16.msra.mxu1 %v5846_v28 }
 0xab6   :  { %4359 = vmatprep.subr.bf16.mxu1 %v4358_v0 }
 0xb67   :  { %v3757_v21 = vpop.f32.mrb[14].mxu0 }
 0xb68   :  { %v4404_v22 = vadd.f32 %v5533_v38, %v3757_v21  ;;  %v2285_v27 = vpop.f32.mrb[15].mxu0 }
 0xb69   :  { %v4405_v16 = vadd.f32 %v5533_v38, %v2285_v27 }
 0xb6a   :  { %v2902_v9 = vmul.f32 -1.442695, %v4404_v22 }
 0xb6b   :  { %v2901_v50 = vmul.f32 -1.442695, %v4405_v16  ;;  %4634 = vtanh.f32 %v4405_v16  ;;  %v3346_v48 = vpop.f32.mrb[24].mxu1 }
 0xb6c   :  { %v3347_v37 = vpop.f32.mrb[25].mxu1 }
 0xb6d   :  { %4636 = vpow2.f32 %v2901_v50  ;;  %v3348_v17 = vadd.f32 %v3347_v37, %v3346_v48 }
 0xb6e   :  { %4638 = vpow2.f32 %v2902_v9 }
 0xb6f   :  { %v2450_v24 = vadd.f32 %v3348_v17, %v5897_v52  ;;  %v3349_v15 = vpop.f32.mrb[26].mxu1  ;;  %v2682_v17 = vld [vmem:[%s6068_s6 + $0x10] sm:$0xff] }
 0xb70   :  { %v3350_v12 = vpop.f32.mrb[27].mxu1 }
 0xb71   :  { %v2904_v18 = vmul.f32 -1.442695, %v2450_v24  ;;  %4640 = vtanh.f32 %v2450_v24  ;;  %v3351_v38 = vadd.f32 %v3350_v12, %v3349_v15 }
 0xb73   :  { %4642 = vpow2.f32 %v2904_v18  ;;  %v2455_v31 = vadd.f32 %v3351_v38, %v5897_v52 }
 0xb75   :  { %v4635_v36 = vpop.eup %4634  ;;  %v2905_v40 = vmul.f32 -1.442695, %v2455_v31  ;;  %4644 = vtanh.f32 %v2455_v31  ;;  %v2685_v31 = vld [vmem:[%s6068_s6 + $0x28] sm:$0xff] }
 0xb76   :  { %2316 = vrot.lane.b32.xlu1 %v4635_v36, %s4685_s27 }
 0xb77   :  { %v4637_v56 = vpop.eup %4636  ;;  %4646 = vpow2.f32 %v2905_v40 }
 0xb78   :  { %v2304_v2 = vadd.f32 1.0, %v4637_v56  ;;  %4648 = vtanh.f32 %v4404_v22  ;;  %v4639_v4 = vpop.eup %4638 }
 0xb79   :  { %v2305_v63 = vadd.f32 1.0, %v4639_v4  ;;  %v2686_v4 = vld [vmem:[%s6068_s6 + $0x30] sm:$0xff] }
 0xb7a   :  { %4650 = vrcp.f32 %v2304_v2 }
 0xb7b   :  { %v4641_v28 = vpop.eup %4640 }
 0xb7c   :  { %2478 = vrot.lane.b32.xlu1 %v4641_v28, %s4685_s27  ;;  %v2687_v28 = vld [vmem:[%s6068_s6 + $0x38] sm:$0xff] }
 0xb7d   :  { %v4643_v58 = vpop.eup %4642 }
 0xb7e   :  { %v2466_v10 = vadd.f32 1.0, %v4643_v58 }
 0xb7f   :  { %v4645_v19 = vpop.eup %4644 }
 0xb80   :  { %4652 = vrcp.f32 %v2466_v10  ;;  %2480 = vrot.lane.b32.xlu1 %v4645_v19, %s4685_s27  ;;  %v4370_v19 = vpack.c.bf16 %v2687_v28, %v2686_v4 }
 0xb81   :  { %v4647_v34 = vpop.eup %4646  ;;  %4654 = vrcp.f32 %v2305_v63 }
 0xb82   :  { %v2467_v39 = vadd.f32 1.0, %v4647_v34  ;;  %v4649_v20 = vpop.eup %4648  ;;  %v2688_v34 = vld [vmem:[%s6068_s6 + $0x40] sm:$0xff] }
 0xb84   :  { %v4651_v46 = vpop.eup %4650  ;;  %4656 = vrcp.f32 %v2467_v39  ;;  %2318 = vrot.lane.b32.xlu1 %v4649_v20, %s4685_s27  ;;  %v2689_v39 = vld [vmem:[%s6068_s6 + $0x48] sm:$0xff] }
 0xb85   :  { %2312 = vrot.lane.b32.xlu0 %v4651_v46, %s4684_s19  ;;  %v4374_v20 = vpack.c.bf16 %v2689_v39, %v2688_v34 }
 0xb88   :  { %2320 = vrot.lane.b32.xlu1 %v4651_v46, %s4686_s28 }
 0xb8a   :  { %v4653_v54 = vpop.eup %4652 }
 0xb8b   :  { %v4655_v30 = vpop.eup %4654  ;;  %2474 = vrot.lane.b32.xlu0 %v4653_v54, %s4684_s19 }
 0xb8c   :  { %2322 = vrot.lane.b32.xlu1 %v4655_v30, %s4686_s28 }
 0xb8e   :  { %v4657_v55 = vpop.eup %4656 }
 0xb8f   :  { %2476 = vrot.lane.b32.xlu0 %v4657_v55, %s4684_s19 }
 0xb93   :  { %2314 = vrot.lane.b32.xlu0 %v4655_v30, %s4684_s19 }
 0xb97   :  { %2482 = vrot.lane.b32.xlu0 %v4653_v54, %s4686_s28 }
 0xb9b   :  { %2484 = vrot.lane.b32.xlu0 %v4657_v55, %s4686_s28 }
 0xbe8   :  { %v2317_v57 = vpop.permute.xlu1 %2316 }
 0xbe9   :  { %v2326_v42 = vmul.f32 %v4651_v46, %v2317_v57  ;;  %v2690_v46 = vld [vmem:[%s6068_s6 + $0x50] sm:$0xff] }
 0xbee   :  { %v2479_v44 = vpop.permute.xlu1 %2478 }
 0xbef   :  { %v2488_v47 = vmul.f32 %v4653_v54, %v2479_v44  ;;  %v2691_v54 = vld [vmem:[%s6068_s6 + $0x58] sm:$0xff] }
 0xbf2   :  { %v2481_v35 = vpop.permute.xlu1 %2480 }
 0xbf3   :  { %v2489_v21 = vmul.f32 %v4657_v55, %v2481_v35  ;;  %v2692_v55 = vld [vmem:[%s6068_s6 + $0x60] sm:$0xff] }
 0xbf6   :  { %v2319_v27 = vpop.permute.xlu1 %2318 }
 0xbf7   :  { %v2313_v60 = vpop.permute.xlu0 %2312  ;;  %v2327_v50 = vmul.f32 %v4655_v30, %v2319_v27  ;;  %v4378_v30 = vpack.c.bf16 %v2691_v54, %v2690_v46 }
 0xbf8   :  { %v2324_v62 = vmul.f32 %v2313_v60, %v5859_v32 }
 0xbfa   :  { %v2328_v6 = vadd.f32 %v2326_v42, %v2324_v62  ;;  %v2321_v15 = vpop.permute.xlu1 %2320 }
 0xbfc   :  { %4658 = vtanh.f32 %v2328_v6  ;;  %v5990_v6 = vld [vmem:[%s6069_s7] ss:$0 sm:$0xff] }
 0xbfd   :  { %v2475_v59 = vpop.permute.xlu0 %2474 }
 0xbfe   :  { %v2486_v49 = vmul.f32 %v2475_v59, %v5864_v25  ;;  %v2323_v63 = vpop.permute.xlu1 %2322 }
 0xc00   :  { %v5921_v11 = vadd.f32 %v2488_v47, %v2486_v49 }
 0xc01   :  { %v2477_v13 = vpop.permute.xlu0 %2476 }
 0xc02   :  { %4660 = vtanh.f32 %v5921_v11  ;;  %v2487_v22 = vmul.f32 %v2477_v13, %v5868_v41  ;;  %v2683_v41 = vld [vmem:[%s6068_s6 + $0x18] sm:$0xff] }
 0xc03   :  { %v4362_v38 = vpack.c.bf16 %v2683_v41, %v2682_v17 }
 0xc04   :  { %v5925_v16 = vadd.f32 %v2489_v21, %v2487_v22 }
 0xc05   :  { %v2315_v32 = vpop.permute.xlu0 %2314 }
 0xc06   :  { %4662 = vtanh.f32 %v5925_v16  ;;  %v2325_v48 = vmul.f32 %v2315_v32, %v5857_v29  ;;  %v4659_v37 = vpop.eup %4658  ;;  %v2684_v29 = vld [vmem:[%s6068_s6 + $0x20] sm:$0xff] }
 0xc07   :  { %v2332_v18 = vmul.f32 %v4659_v37, %v2321_v15  ;;  %v4366_v2 = vpack.c.bf16 %v2685_v31, %v2684_v29 }
 0xc08   :  { %v2329_v9 = vadd.f32 %v2327_v50, %v2325_v48 }
 0xc09   :  { %v2483_v25 = vpop.permute.xlu0 %2482 }
 0xc0a   :  { %4664 = vtanh.f32 %v2329_v9 }
 0xc0c   :  { %v4661_v24 = vpop.eup %4660 }
 0xc0d   :  { %v2494_v12 = vmul.f32 %v4661_v24, %v2483_v25  ;;  %v2485_v40 = vpop.permute.xlu0 %2484 }
 0xc0f   :  { %2609 = vmatprep.mubr.f32.mxu1 %v2494_v12 }
 0xc10   :  { %v4663_v36 = vpop.eup %4662  ;;  %2610 = vmatmul.mubr.f32.vlgmr.msra.gmra.mrb[28].mxu1 %v2332_v18 }
 0xc11   :  { %v2495_v56 = vmul.f32 %v4663_v36, %v2485_v40  ;;  %4361 = vmatpush3.bf16.msra.mxu1 %v4358_v0  ;;  %v2695_v0 = vld [vmem:[%s6068_s6 + $0x78] sm:$0xff] }
 0xc12   :  { %4363 = vmatprep.subr.bf16.mxu1 %v4362_v38  ;;  %v4386_v57 = vpack.c.bf16 %v2695_v0, %v2694_v51 }
 0xc13   :  { %2614 = vmatprep.mubr.f32.mxu1 %v2495_v56 }
 0xc14   :  { %v4665_v58 = vpop.eup %4664 }
 0xc15   :  { %4365 = vmatpush3.bf16.msra.mxu1 %v4362_v38  ;;  %v2333_v10 = vmul.f32 %v4665_v58, %v2323_v63 }
 0xc16   :  { %4367 = vmatprep.subr.bf16.mxu1 %v4366_v2 }
 0xc17   :  { %2615 = vmatmul.mubr.f32.gmra.mrb[30].mxu1 %v2333_v10 }
 0xc18   :  { %3790 = vmatprep.mubr.f32.mxu1 %v5160_v8  ;;  %v2693_v8 = vld [vmem:[%s6068_s6 + $0x68] sm:$0xff] }
 0xc19   :  { %4369 = vmatpush3.bf16.msra.mxu1 %v4366_v2  ;;  %v4382_v23 = vpack.c.bf16 %v2693_v8, %v2692_v55 }
 0xc1a   :  { %4371 = vmatprep.subr.bf16.mxu1 %v4370_v19 }
 0xc1d   :  { %4373 = vmatpush3.bf16.msra.mxu1 %v4370_v19 }
 0xc1e   :  { %4375 = vmatprep.subr.bf16.mxu1 %v4374_v20 }
 0xc21   :  { %4377 = vmatpush3.bf16.msra.mxu1 %v4374_v20 }
 0xc22   :  { %4379 = vmatprep.subr.bf16.mxu1 %v4378_v30 }
 0xc25   :  { %4381 = vmatpush3.bf16.msra.mxu1 %v4378_v30 }
 0xc26   :  { %4383 = vmatprep.subr.bf16.mxu1 %v4382_v23 }
 0xc29   :  { %4385 = vmatpush3.bf16.msra.mxu1 %v4382_v23 }
 0xc2a   :  { %4387 = vmatprep.subr.bf16.mxu1 %v4386_v57 }
 0xc2d   :  { %4389 = vmatpush3.bf16.msra.mxu1 %v4386_v57 }
 0xc30   :  { %3791 = vmatmul.mubr.f32.vlgmr.msra.gmra.mrb[32].mxu1 %v5165_v14 }
 0xc31   :  { %3793 = vmatprep.mubr.f32.mxu1 %v5228_v33 }
 0xc34   :  { %3794 = vmatmul.mubr.f32.gmra.mrb[34].mxu1 %v5231_v43 }
 0xc35   :  { %3796 = vmatprep.mubr.f32.mxu1 %v5492_v61 }
 0xc38   :  { %3797 = vmatmul.mubr.f32.gmra.mrb[36].mxu1 %v5497_v7 }
 0xc39   :  { %3799 = vmatprep.mubr.f32.mxu1 %v5572_v45 }
 0xc3c   :  { %3800 = vmatmul.mubr.f32.gmra.mrb[38].mxu1 %v5577_v26 }
 0xc3d   :  { %3802 = vmatprep.mubr.f32.mxu1 %v5640_v5 }
 0xc40   :  { %3803 = vmatmul.mubr.f32.gmra.mrb[40].mxu1 %v5643_v53 }
 0xc41   :  { %3805 = vmatprep.mubr.f32.mxu1 %v5871_v1 }
 0xc44   :  { %3806 = vmatmul.mubr.f32.gmra.mrb[42].mxu1 %v5874_v3 }
 0xc45   :  { %3808 = vmatprep.mubr.f32.mxu1 %v2494_v12 }
 0xc48   :  { %3809 = vmatmul.mubr.f32.gmra.mrb[44].mxu1 %v2495_v56 }
 0xce3   :  { %v3384_v14 = vpop.f32.mrb[28].mxu1 }
 0xce4   :  { %v3385_v33 = vpop.f32.mrb[29].mxu1 }
 0xce5   :  { %v3386_v43 = vadd.f32 %v3385_v33, %v3384_v14 }
 0xce7   :  { %v2612_v61 = vadd.f32 %v3386_v43, %v5897_v52 }
 0xce9   :  { %v2907_v7 = vmul.f32 -1.442695, %v2612_v61  ;;  %4666 = vtanh.f32 %v2612_v61 }
 0xcea   :  { %v3387_v45 = vpop.f32.mrb[30].mxu1 }
 0xceb   :  { %4668 = vpow2.f32 %v2907_v7  ;;  %v3388_v26 = vpop.f32.mrb[31].mxu1 }
 0xcec   :  { %v3389_v44 = vadd.f32 %v3388_v26, %v3387_v45 }
 0xcee   :  { %v2617_v5 = vadd.f32 %v3389_v44, %v5897_v52 }
 0xcf0   :  { %v2908_v53 = vmul.f32 -1.442695, %v2617_v5  ;;  %4670 = vtanh.f32 %v2617_v5 }
 0xcf2   :  { %4672 = vpow2.f32 %v2908_v53 }
 0xcf3   :  { %v4667_v1 = vpop.eup %4666 }
 0xcf4   :  { %2640 = vrot.lane.b32.xlu1 %v4667_v1, %s4685_s27 }
 0xcf5   :  { %v4669_v3 = vpop.eup %4668 }
 0xcf6   :  { %v2628_v60 = vadd.f32 1.0, %v4669_v3 }
 0xcf8   :  { %4674 = vrcp.f32 %v2628_v60 }
 0xcfa   :  { %v4671_v62 = vpop.eup %4670 }
 0xcfb   :  { %2642 = vrot.lane.b32.xlu1 %v4671_v62, %s4685_s27 }
 0xcfc   :  { %v4673_v42 = vpop.eup %4672 }
 0xcfd   :  { %v2629_v35 = vadd.f32 1.0, %v4673_v42 }
 0xcff   :  { %4676 = vrcp.f32 %v2629_v35 }
 0xd02   :  { %v4675_v52 = vpop.eup %4674 }
 0xd03   :  { %v3792_v59 = vpop.f32.mrb[32].mxu1  ;;  %2636 = vrot.lane.b32.xlu0 %v4675_v52, %s4684_s19 }
 0xd04   :  { %v2775_v47 = vadd.f32 %v3792_v59, %v5990_v6  ;;  %v2769_v49 = vpop.f32.mrb[33].mxu1 }
 0xd05   :  { %v2770_v13 = vadd.f32 %v5990_v6, %v2769_v49 }
 0xd06   :  { %2849 = vst [vmem:[%s6070_s8 + $0x8] sm:$0xff] %v2775_v47 }
 0xd07   :  { %2848 = vst [vmem:[%s6070_s8] sm:$0xff] %v2770_v13  ;;  %v3795_v21 = vpop.f32.mrb[34].mxu1 }
 0xd08   :  { %v2785_v22 = vadd.f32 %v3795_v21, %v5990_v6  ;;  %v2779_v27 = vpop.f32.mrb[35].mxu1 }
 0xd09   :  { %v4677_v32 = vpop.eup %4676  ;;  %v2780_v50 = vadd.f32 %v5990_v6, %v2779_v27 }
 0xd0a   :  { %2851 = vst [vmem:[%s6070_s8 + $0x18] sm:$0xff] %v2785_v22  ;;  %2646 = vrot.lane.b32.xlu1 %v4677_v32, %s4686_s28  ;;  %2638 = vrot.lane.b32.xlu0 %v4677_v32, %s4684_s19 }
 0xd0b   :  { %2850 = vst [vmem:[%s6070_s8 + $0x10] sm:$0xff] %v2780_v50  ;;  %v3798_v48 = vpop.f32.mrb[36].mxu1 }
 0xd0c   :  { %v2795_v9 = vadd.f32 %v3798_v48, %v5990_v6  ;;  %v2789_v25 = vpop.f32.mrb[37].mxu1 }
 0xd0d   :  { %v2790_v37 = vadd.f32 %v5990_v6, %v2789_v25 }
 0xd0e   :  { %2853 = vst [vmem:[%s6070_s8 + $0x28] sm:$0xff] %v2795_v9  ;;  %2644 = vrot.lane.b32.xlu0 %v4675_v52, %s4686_s28 }
 0xd0f   :  { %2852 = vst [vmem:[%s6070_s8 + $0x20] sm:$0xff] %v2790_v37  ;;  %v3801_v17 = vpop.f32.mrb[38].mxu1 }
 0xd10   :  { %v2805_v41 = vadd.f32 %v3801_v17, %v5990_v6  ;;  %v2799_v24 = vpop.f32.mrb[39].mxu1 }
 0xd11   :  { %v2800_v15 = vadd.f32 %v5990_v6, %v2799_v24 }
 0xd12   :  { %2855 = vst [vmem:[%s6070_s8 + $0x38] sm:$0xff] %v2805_v41 }
 0xd13   :  { %2854 = vst [vmem:[%s6070_s8 + $0x30] sm:$0xff] %v2800_v15  ;;  %v3804_v12 = vpop.f32.mrb[40].mxu1 }
 0xd14   :  { %v2815_v18 = vadd.f32 %v3804_v12, %v5990_v6  ;;  %v2809_v38 = vpop.f32.mrb[41].mxu1 }
 0xd15   :  { %v2810_v29 = vadd.f32 %v5990_v6, %v2809_v38 }
 0xd16   :  { %2857 = vst [vmem:[%s6070_s8 + $0x48] sm:$0xff] %v2815_v18 }
 0xd17   :  { %2856 = vst [vmem:[%s6070_s8 + $0x40] sm:$0xff] %v2810_v29  ;;  %v3807_v31 = vpop.f32.mrb[42].mxu1 }
 0xd18   :  { %v2825_v36 = vadd.f32 %v3807_v31, %v5990_v6  ;;  %v2819_v40 = vpop.f32.mrb[43].mxu1 }
 0xd19   :  { %v2820_v56 = vadd.f32 %v5990_v6, %v2819_v40 }
 0xd1a   :  { %2859 = vst [vmem:[%s6070_s8 + $0x58] sm:$0xff] %v2825_v36 }
 0xd1b   :  { %2858 = vst [vmem:[%s6070_s8 + $0x50] sm:$0xff] %v2820_v56  ;;  %v3810_v2 = vpop.f32.mrb[44].mxu1 }
 0xd1c   :  { %v2835_v4 = vadd.f32 %v3810_v2, %v5990_v6  ;;  %v2829_v28 = vpop.f32.mrb[45].mxu1 }
 0xd1d   :  { %v2830_v58 = vadd.f32 %v5990_v6, %v2829_v28 }
 0xd1e   :  { %2861 = vst [vmem:[%s6070_s8 + $0x68] sm:$0xff] %v2835_v4 }
 0xd1f   :  { %2860 = vst [vmem:[%s6070_s8 + $0x60] sm:$0xff] %v2830_v58 }
 0xd66   :  { %v2641_v63 = vpop.permute.xlu1 %2640 }
 0xd67   :  { %v2650_v19 = vmul.f32 %v4675_v52, %v2641_v63 }
 0xd6d   :  { %v2643_v20 = vpop.permute.xlu1 %2642 }
 0xd6e   :  { %v2651_v54 = vmul.f32 %v4677_v32, %v2643_v20 }
 0xd75   :  { %v2637_v10 = vpop.permute.xlu0 %2636 }
 0xd76   :  { %v2648_v34 = vmul.f32 %v2637_v10, %v5921_v11 }
 0xd78   :  { %v2652_v39 = vadd.f32 %v2650_v19, %v2648_v34 }
 0xd7a   :  { %4678 = vtanh.f32 %v2652_v39 }
 0xd7c   :  { %v2639_v46 = vpop.permute.xlu0 %2638  ;;  %v2647_v57 = vpop.permute.xlu1 %2646 }
 0xd7d   :  { %v2649_v30 = vmul.f32 %v2639_v46, %v5925_v16 }
 0xd7f   :  { %v2653_v55 = vadd.f32 %v2651_v54, %v2649_v30 }
 0xd80   :  { %v2645_v23 = vpop.permute.xlu0 %2644 }
 0xd81   :  { %4680 = vtanh.f32 %v2653_v55 }
 0xd84   :  { %v4679_v8 = vpop.eup %4678 }
 0xd85   :  { %v2656_v51 = vmul.f32 %v4679_v8, %v2645_v23 }
 0xd87   :  { %3811 = vmatprep.mubr.f32.mxu1 %v2656_v51 }
 0xd8b   :  { %v4681_v0 = vpop.eup %4680 }
 0xd8c   :  { %v2657_v14 = vmul.f32 %v4681_v0, %v2647_v57 }
 0xd8e   :  { %3812 = vmatmul.mubr.f32.gmra.mrb[46].mxu1 %v2657_v14 }
 0xe61   :  { %v3813_v33 = vpop.f32.mrb[46].mxu1 }
 0xe62   :  { %v2845_v11 = vadd.f32 %v3813_v33, %v5990_v6  ;;  %v2839_v43 = vpop.f32.mrb[47].mxu1 }
 0xe63   :  { %v2840_v61 = vadd.f32 %v5990_v6, %v2839_v43 }
 0xe64   :  { %2863 = vst [vmem:[%s6070_s8 + $0x78] sm:$0xff] %v2845_v11 }
 0xe65   :  { %2862 = vst [vmem:[%s6070_s8 + $0x70] sm:$0xff] %v2840_v61 }

</bundles_post_ra>
